<compile_context>
chip_gen: v6e
topology: v6e:2x2x1
jax: 0.10.0
libtpu: 0.0.40
codegen_flags: <defaults>
</compile_context>

<pallas_src>
import functools

import jax
import jax.numpy as jnp
from jax import lax
from jax.experimental import pallas as pl
from jax.experimental.pallas import tpu as pltpu

LANE = 128


def _round_up(v, m):
    return (v + m - 1) // m * m


def _pad_to(a, *target):
    return jnp.pad(a, [(0, t - s) for s, t in zip(a.shape, target)])


def fold_bn(gamma, beta, mean, var, eps=1e-5):
    scale = gamma / jnp.sqrt(var + eps)
    return scale, beta - mean * scale


def _bottleneck_kernel(x_ref, w1_ref, w2_ref, w3_ref,
                       b1_ref, b2_ref, b3_ref, out_ref, *, groups):
    """block_n batch images per grid step, flattened to (B*H*W, C) rows.

    x_ref  : (B, H, W, C)  bf16   C = padded inplanes (multiple of 128)
    w1_ref : (C, P)        bf16   1x1 reduce conv, bn1 scale folded in
    w2_ref : (9, P, P)     bf16   3x3 conv taps (k = kh*3 + kw), bn2 folded in
    w3_ref : (P, C)        bf16   1x1 expand conv, bn3 scale folded in
    b*_ref : (1, P|C)      f32    folded BatchNorm biases
    out_ref: (B, H, W, C)  bf16
    """
    B, H, W, C = x_ref.shape
    HW = H * W
    M = B * HW

    x_bf = x_ref[...].reshape(M, C)                              # bf16

    # ---- conv1 (1x1) + bn1 + relu (scale pre-folded, bias + relu here) ---
    y1 = jnp.dot(x_bf, w1_ref[...], preferred_element_type=jnp.float32)
    y1 = jnp.maximum(y1 + b1_ref[0], 0.0)                        # (M, P) f32

    # ---- conv2 (3x3, pad=1, stride=1) ------------------------------------
    # Tap (kh, kw) needs y1[h+kh-1, w+kw-1] with zero padding.  In the flat
    # row layout that is a sublane rotation by s = (kh-1)*W + (kw-1) (XLU
    # slot, no misaligned loads), plus zeroing rows that fell outside the
    # image.  Column (w) borders are pre-masked ONCE on y1 (3 shared
    # variants); the top/bottom row mask stays per tap (depends on kh only).
    # Valid taps never cross image boundaries of the flattened batch; the
    # wrapped/cross-image rows are exactly the masked ones.
    q = lax.broadcasted_iota(jnp.int32, (M, 1), 0)
    qm = q % HW                      # position within each image
    col = q % W
    top, bot = qm < W, qm >= (H - 1) * W
    variants = (jnp.where(col == W - 1, 0.0, y1),   # kw == 0 taps
                y1,                                  # kw == 1 taps
                jnp.where(col == 0, 0.0, y1))        # kw == 2 taps

    def tap_window(k):
        kh, kw = k // 3, k % 3
        s = (kh - 1) * W + (kw - 1)
        # NOTE: rolls stay f32 (packed-bf16 odd-shift rotates are not
        # guaranteed to lower); only the MXU operand is cast to bf16.
        win = variants[kw]
        if s != 0:
            win = pltpu.roll(win, shift=(-s) % M, axis=0)
        if kh == 0:
            win = jnp.where(top, 0.0, win)
        elif kh == 2:
            win = jnp.where(bot, 0.0, win)
        return win.astype(jnp.bfloat16)

    # Tap groups: pairs fused along K (K = 2P) when P == 128 so each MXU pass
    # on the 256-deep v6e/v7x MXUs is fully occupied.  Single accumulation
    # chain (v7x MRB friendly); first dot initialises the accumulator.
    acc = None
    for group in groups:                                         # unrolled
        if len(group) == 1:
            win, wmat = tap_window(group[0]), w2_ref[group[0]]
        else:
            win = jnp.concatenate([tap_window(k) for k in group], axis=-1)
            wmat = jnp.concatenate([w2_ref[k] for k in group], axis=0)
        tap = jnp.dot(win, wmat, preferred_element_type=jnp.float32)
        acc = tap if acc is None else acc + tap
    y2 = jnp.maximum(acc + b2_ref[0], 0.0)                       # (M, P) f32

    # ---- conv3 (1x1 expand) + bn3 + residual + relu ----------------------
    y3 = jnp.dot(y2.astype(jnp.bfloat16), w3_ref[...],
                 preferred_element_type=jnp.float32)
    out = jnp.maximum(y3 + b3_ref[0] + x_bf.astype(jnp.float32), 0.0)
    out_ref[...] = out.reshape(B, H, W, C).astype(out_ref.dtype)


def _pick_block_and_vmem(N, H, W, C, P):
    """Per-step batch block + VMEM limit from the actual block sizes."""
    try:
        vmem_cap = pltpu.get_tpu_info().vmem_capacity_bytes
    except Exception:                      # conservative fallback
        vmem_cap = 128 * 1024 * 1024
    budget = min(int(vmem_cap * 0.6), 80 * 1024 * 1024)

    def est(bn):
        m = bn * H * W
        io = 2 * 2 * m * C * 2                        # x + out blocks, bf16, 2x buffered
        wts = 2 * 2 * (C * P + 9 * P * P + P * C)     # bf16 weights, 2x buffered
        vecs = 2 * 4 * (2 * P + C)                    # f32 bias vectors
        live = 4 * m * (5 * P + C) + 2 * m * (2 * P + C)  # f32 intermediates + bf16 temps
        return io + wts + vecs + live

    max_bn = N if N == 1 else max(1, N // 2)   # keep >= 2 grid steps (megacore)
    block_n = 1
    for bn in range(max_bn, 0, -1):
        if N % bn == 0 and est(bn) <= budget:
            block_n = bn
            break
    vmem_limit = int(min(max(est(block_n) + 8 * 1024 * 1024, 32 * 1024 * 1024),
                         vmem_cap * 0.9))
    return block_n, vmem_limit


def _bottleneck_pallas(x, w1, w2, w3, b1, b2, b3, *, block_n, vmem_limit, groups):
    N, H, W, C = x.shape
    P = w1.shape[1]
    const = lambda shape: pl.BlockSpec(shape, lambda n: (0,) * len(shape))
    # TODO(synk): single-buffer the constant operands (pl.Buffered(1)) once
    # pipeline_mode is reliably supported on the top-level TPU pipeline.
    grid_spec = pltpu.PrefetchScalarGridSpec(
        num_scalar_prefetch=0,
        grid=(N // block_n,),
        in_specs=[
            pl.BlockSpec((block_n, H, W, C), lambda n: (n, 0, 0, 0)),  # x
            const((C, P)),                                             # w1
            const((9, P, P)),                                          # w2
            const((P, C)),                                             # w3
            const((1, P)), const((1, P)), const((1, C)),               # b1,b2,b3
        ],
        out_specs=pl.BlockSpec((block_n, H, W, C), lambda n: (n, 0, 0, 0)),
    )
    kernel = functools.partial(_bottleneck_kernel, groups=groups)
    return pl.pallas_call(
        kernel,
        out_shape=jax.ShapeDtypeStruct((N, H, W, C), jnp.bfloat16),
        grid_spec=grid_spec,
        compiler_params=pltpu.CompilerParams(
            dimension_semantics=("parallel",),
            vmem_limit_bytes=vmem_limit),
    )(x, w1, w2, w3, b1, b2, b3)


def bottleneck_forward(x_nchw, conv1_w, conv2_w, conv3_w, bn1, bn2, bn3,
                       eps=1e-5):
    """Eval-mode Bottleneck forward (stride=1, no downsample).  NCHW in/out."""
    N, Cin, H, W = x_nchw.shape
    planes = conv1_w.shape[0]
    if conv3_w.shape[0] != Cin:
        raise ValueError("identity residual requires inplanes == planes*4")

    Cp = _round_up(Cin, LANE)
    Pp = _round_up(planes, LANE)

    s1, b1 = fold_bn(*bn1, eps=eps)
    s2, b2 = fold_bn(*bn2, eps=eps)
    s3, b3 = fold_bn(*bn3, eps=eps)

    # NHWC, channels zero-padded to a lane multiple, bf16 for the MXU.
    x_nhwc = jnp.transpose(x_nchw, (0, 2, 3, 1))
    x_p = _pad_to(x_nhwc, N, H, W, Cp).astype(jnp.bfloat16)

    # Conv weights as per-tap (Cin, Cout) matrices with the BN scale folded in
    # (fold in f32, then cast) so the kernel epilogues are just bias + relu.
    w1 = jnp.transpose(conv1_w[:, :, 0, 0]) * s1[None, :]
    w1 = _pad_to(w1, Cp, Pp).astype(jnp.bfloat16)
    w3 = jnp.transpose(conv3_w[:, :, 0, 0]) * s3[None, :]
    w3 = _pad_to(w3, Pp, Cp).astype(jnp.bfloat16)
    w2 = jnp.transpose(conv2_w, (2, 3, 1, 0)).reshape(9, planes, planes)
    w2 = w2 * s2[None, None, :]
    w2 = _pad_to(w2, 9, Pp, Pp).astype(jnp.bfloat16)

    vec = lambda v, n: _pad_to(v, n)[None, :].astype(jnp.float32)

    # K=256 tap-pair fusion only when the padded planes dim is a single
    # 128-lane tile (fills the 256-deep MXU on v6e/v7x); plain 9 taps
    # otherwise (no benefit for Pp >= 256 or v5e's 128-deep MXU).
    if Pp == 128:
        groups = ((0, 1), (2, 3), (4, 5), (6, 7), (8,))
    else:
        groups = tuple((k,) for k in range(9))

    block_n, vmem_limit = _pick_block_and_vmem(N, H, W, Cp, Pp)

    out_p = _bottleneck_pallas(
        x_p, w1, w2, w3, vec(b1, Pp), vec(b2, Pp), vec(b3, Cp),
        block_n=block_n, vmem_limit=vmem_limit, groups=groups)

    out = out_p[..., :Cin]                     # drop lane padding (exact zeros)
    return jnp.transpose(out, (0, 3, 1, 2)).astype(x_nchw.dtype)


def reference_forward(x_nchw, conv1_w, conv2_w, conv3_w, bn1, bn2, bn3,
                      eps=1e-5):
    """Pure-JAX (lax.conv) reference mirroring the kernel's bf16 rounding."""
    s1, b1 = fold_bn(*bn1, eps=eps)
    s2, b2 = fold_bn(*bn2, eps=eps)
    s3, b3 = fold_bn(*bn3, eps=eps)

    dn = ("NHWC", "HWIO", "NHWC")
    conv = functools.partial(lax.conv_general_dilated, window_strides=(1, 1),
                             dimension_numbers=dn,
                             preferred_element_type=jnp.float32)
    # Same host-side fold as the kernel: scale in f32, then cast to bf16.
    hwio = lambda w, s: (jnp.transpose(w, (2, 3, 1, 0)) * s).astype(jnp.bfloat16)

    x = jnp.transpose(x_nchw, (0, 2, 3, 1)).astype(jnp.bfloat16)
    y = conv(x, hwio(conv1_w, s1), padding="VALID")
    y = jnp.maximum(y + b1, 0.0)
    y = conv(y.astype(jnp.bfloat16), hwio(conv2_w, s2), padding=((1, 1), (1, 1)))
    y = jnp.maximum(y + b2, 0.0)
    y = conv(y.astype(jnp.bfloat16), hwio(conv3_w, s3), padding="VALID")
    y = y + b3
    y = jnp.maximum(y + x.astype(jnp.float32), 0.0)
    return jnp.transpose(y, (0, 3, 1, 2))


if __name__ == "__main__":
    # Small shapes implied by the module: inplanes = planes * expansion so the
    # identity residual is valid with downsample=None, stride=1.
    N, H, W = 2, 16, 16
    planes = 4
    inplanes = planes * 4          # 16

    key = jax.random.PRNGKey(0)
    ks = jax.random.split(key, 16)

    x_nchw = jax.random.normal(ks[0], (N, inplanes, H, W), jnp.float32)

    # PyTorch-convention conv weights (Cout, Cin, kh, kw), bias=False.
    conv1_w = 0.1 * jax.random.normal(ks[1], (planes, inplanes, 1, 1), jnp.float32)
    conv2_w = 0.1 * jax.random.normal(ks[2], (planes, planes, 3, 3), jnp.float32)
    conv3_w = 0.1 * jax.random.normal(ks[3], (planes * 4, planes, 1, 1), jnp.float32)

    def bn_params(kg, kb, km, kv, c):
        gamma = 1.0 + 0.1 * jax.random.normal(kg, (c,), jnp.float32)
        beta = 0.1 * jax.random.normal(kb, (c,), jnp.float32)
        mean = 0.1 * jax.random.normal(km, (c,), jnp.float32)
        var = jnp.abs(jax.random.normal(kv, (c,), jnp.float32)) + 0.5
        return gamma, beta, mean, var

    bn1 = bn_params(ks[4], ks[5], ks[6], ks[7], planes)
    bn2 = bn_params(ks[8], ks[9], ks[10], ks[11], planes)
    bn3 = bn_params(ks[12], ks[13], ks[14], ks[15], planes * 4)

    out = bottleneck_forward(x_nchw, conv1_w, conv2_w, conv3_w, bn1, bn2, bn3)
    out = jax.block_until_ready(out)

    ref = reference_forward(x_nchw, conv1_w, conv2_w, conv3_w, bn1, bn2, bn3)
    ref = jax.block_until_ready(ref)

    assert out.shape == (N, inplanes, H, W)
    # bf16 MXU inputs + bf16 output store (kernel and reference use matching
    # weight rounding) -> keep the loosened tolerance.
    max_err = float(jnp.max(jnp.abs(out - ref)))
    assert jnp.allclose(out, ref, atol=2e-2, rtol=2e-2), max_err
    print("KERNEL_OK")
</pallas_src>

<mosaic_0001>
module attributes {stable_mosaic.version = 11 : i64} {
  func.func @_bottleneck_kernel(%arg0: i32, %arg1: memref<1x16x16x128xbf16, #tpu.memory_space<vmem>>, %arg2: memref<128x128xbf16, #tpu.memory_space<vmem>>, %arg3: memref<9x128x128xbf16, #tpu.memory_space<vmem>>, %arg4: memref<128x128xbf16, #tpu.memory_space<vmem>>, %arg5: memref<1x128xf32, #tpu.memory_space<vmem>>, %arg6: memref<1x128xf32, #tpu.memory_space<vmem>>, %arg7: memref<1x128xf32, #tpu.memory_space<vmem>>, %arg8: memref<1x16x16x128xbf16, #tpu.memory_space<vmem>>) attributes {dimension_semantics = [#tpu.dimension_semantics<parallel>], iteration_bounds = array<i64: 2>, scalar_prefetch = 0 : i64, scratch_operands = 0 : i64, tpu.core_type = #tpu.core_type<tc>, window_params = [{transform_indices = @transform_0, window_bounds = array<i64: 1, 16, 16, 128>}, {pipeline_mode = #tpu.pipeline_mode<synchronous>, transform_indices = @transform_1, window_bounds = array<i64: 128, 128>}, {pipeline_mode = #tpu.pipeline_mode<synchronous>, transform_indices = @transform_2, window_bounds = array<i64: 9, 128, 128>}, {pipeline_mode = #tpu.pipeline_mode<synchronous>, transform_indices = @transform_3, window_bounds = array<i64: 128, 128>}, {pipeline_mode = #tpu.pipeline_mode<synchronous>, transform_indices = @transform_4, window_bounds = array<i64: 1, 128>}, {pipeline_mode = #tpu.pipeline_mode<synchronous>, transform_indices = @transform_5, window_bounds = array<i64: 1, 128>}, {pipeline_mode = #tpu.pipeline_mode<synchronous>, transform_indices = @transform_6, window_bounds = array<i64: 1, 128>}, {transform_indices = @transform_7, window_bounds = array<i64: 1, 16, 16, 128>}]} {
    %c0 = arith.constant 0 : index
    %c0_0 = arith.constant 0 : index
    %c0_1 = arith.constant 0 : index
    %c0_2 = arith.constant 0 : index
    %0 = vector.load %arg1[%c0, %c0_0, %c0_1, %c0_2] : memref<1x16x16x128xbf16, #tpu.memory_space<vmem>>, vector<1x16x16x128xbf16>
    %1 = vector.shape_cast %0 : vector<1x16x16x128xbf16> to vector<256x128xbf16>
    %c0_3 = arith.constant 0 : index
    %c0_4 = arith.constant 0 : index
    %2 = vector.load %arg2[%c0_3, %c0_4] : memref<128x128xbf16, #tpu.memory_space<vmem>>, vector<128x128xbf16>
    %cst = arith.constant dense<0.000000e+00> : vector<256x128xf32>
    %3 = tpu.matmul %1, %2, %cst {dimension_numbers = #tpu.dot_dimension_numbers<[1], [0], [0], [1], [0, 0, 1, 1], [], []>} : vector<256x128xbf16>, vector<128x128xbf16>, vector<256x128xf32> -> vector<256x128xf32>
    %c0_5 = arith.constant 0 : index
    %c0_6 = arith.constant 0 : index
    %4 = vector.load %arg5[%c0_5, %c0_6] : memref<1x128xf32, #tpu.memory_space<vmem>>, vector<1x128xf32>
    %5 = vector.shape_cast %4 : vector<1x128xf32> to vector<128xf32>
    %6 = vector.shape_cast %5 : vector<128xf32> to vector<1x128xf32>
    %7 = vector.broadcast %6 : vector<1x128xf32> to vector<256x128xf32>
    %8 = arith.addf %3, %7 : vector<256x128xf32>
    %cst_7 = arith.constant 0.000000e+00 : f32
    %9 = vector.broadcast %cst_7 : f32 to vector<256x128xf32>
    %10 = arith.maximumf %8, %9 : vector<256x128xf32>
    %11 = tpu.iota {dimensions = array<i32: 0>} : vector<256x1xi32>
    %c256_i32 = arith.constant 256 : i32
    %c0_i32 = arith.constant 0 : i32
    %12 = arith.cmpi eq, %c256_i32, %c0_i32 : i32
    %c1_i32 = arith.constant 1 : i32
    %13 = arith.select %12, %c1_i32, %c256_i32 : i32
    %14 = vector.broadcast %13 : i32 to vector<256x1xi32>
    %15 = arith.remsi %11, %14 : vector<256x1xi32>
    %c0_i32_8 = arith.constant 0 : i32
    %16 = vector.broadcast %c0_i32_8 : i32 to vector<256x1xi32>
    %17 = arith.cmpi ne, %15, %16 : vector<256x1xi32>
    %c0_i32_9 = arith.constant 0 : i32
    %18 = vector.broadcast %c0_i32_9 : i32 to vector<256x1xi32>
    %19 = arith.cmpi slt, %15, %18 : vector<256x1xi32>
    %c0_i32_10 = arith.constant 0 : i32
    %20 = arith.cmpi slt, %13, %c0_i32_10 : i32
    %21 = vector.broadcast %20 : i1 to vector<256x1xi1>
    %22 = vector.broadcast %21 : vector<256x1xi1> to vector<256x1xi1>
    %23 = arith.xori %19, %22 : vector<256x1xi1>
    %24 = arith.andi %23, %17 : vector<256x1xi1>
    %25 = vector.broadcast %13 : i32 to vector<256x1xi32>
    %26 = arith.addi %15, %25 : vector<256x1xi32>
    %27 = arith.select %24, %26, %15 : vector<256x1xi1>, vector<256x1xi32>
    %c16_i32 = arith.constant 16 : i32
    %c0_i32_11 = arith.constant 0 : i32
    %28 = arith.cmpi eq, %c16_i32, %c0_i32_11 : i32
    %c1_i32_12 = arith.constant 1 : i32
    %29 = arith.select %28, %c1_i32_12, %c16_i32 : i32
    %30 = vector.broadcast %29 : i32 to vector<256x1xi32>
    %31 = arith.remsi %11, %30 : vector<256x1xi32>
    %c0_i32_13 = arith.constant 0 : i32
    %32 = vector.broadcast %c0_i32_13 : i32 to vector<256x1xi32>
    %33 = arith.cmpi ne, %31, %32 : vector<256x1xi32>
    %c0_i32_14 = arith.constant 0 : i32
    %34 = vector.broadcast %c0_i32_14 : i32 to vector<256x1xi32>
    %35 = arith.cmpi slt, %31, %34 : vector<256x1xi32>
    %c0_i32_15 = arith.constant 0 : i32
    %36 = arith.cmpi slt, %29, %c0_i32_15 : i32
    %37 = vector.broadcast %36 : i1 to vector<256x1xi1>
    %38 = vector.broadcast %37 : vector<256x1xi1> to vector<256x1xi1>
    %39 = arith.xori %35, %38 : vector<256x1xi1>
    %40 = arith.andi %39, %33 : vector<256x1xi1>
    %41 = vector.broadcast %29 : i32 to vector<256x1xi32>
    %42 = arith.addi %31, %41 : vector<256x1xi32>
    %43 = arith.select %40, %42, %31 : vector<256x1xi1>, vector<256x1xi32>
    %c16_i32_16 = arith.constant 16 : i32
    %44 = vector.broadcast %c16_i32_16 : i32 to vector<256x1xi32>
    %45 = arith.cmpi slt, %27, %44 : vector<256x1xi32>
    %c240_i32 = arith.constant 240 : i32
    %46 = vector.broadcast %c240_i32 : i32 to vector<256x1xi32>
    %47 = arith.cmpi sge, %27, %46 : vector<256x1xi32>
    %c15_i32 = arith.constant 15 : i32
    %48 = vector.broadcast %c15_i32 : i32 to vector<256x1xi32>
    %49 = arith.cmpi eq, %43, %48 : vector<256x1xi32>
    %cst_17 = arith.constant 0.000000e+00 : f32
    %50 = vector.shape_cast %49 : vector<256x1xi1> to vector<256x1xi1>
    %51 = vector.broadcast %50 : vector<256x1xi1> to vector<256x128xi1>
    %52 = vector.broadcast %cst_17 : f32 to vector<256x128xf32>
    %53 = arith.select %51, %52, %10 : vector<256x128xi1>, vector<256x128xf32>
    %c0_i32_18 = arith.constant 0 : i32
    %54 = vector.broadcast %c0_i32_18 : i32 to vector<256x1xi32>
    %55 = arith.cmpi eq, %43, %54 : vector<256x1xi32>
    %cst_19 = arith.constant 0.000000e+00 : f32
    %56 = vector.shape_cast %55 : vector<256x1xi1> to vector<256x1xi1>
    %57 = vector.broadcast %56 : vector<256x1xi1> to vector<256x128xi1>
    %58 = vector.broadcast %cst_19 : f32 to vector<256x128xf32>
    %59 = arith.select %57, %58, %10 : vector<256x128xi1>, vector<256x128xf32>
    %c17_i32 = arith.constant 17 : i32
    %60 = tpu.dynamic_rotate %53 by %c17_i32 dim 0 : vector<256x128xf32>, i32 -> vector<256x128xf32>
    %cst_20 = arith.constant 0.000000e+00 : f32
    %61 = vector.shape_cast %45 : vector<256x1xi1> to vector<256x1xi1>
    %62 = vector.broadcast %61 : vector<256x1xi1> to vector<256x128xi1>
    %63 = vector.broadcast %cst_20 : f32 to vector<256x128xf32>
    %64 = arith.select %62, %63, %60 : vector<256x128xi1>, vector<256x128xf32>
    %65 = arith.truncf %64 : vector<256x128xf32> to vector<256x128xbf16>
    %c16_i32_21 = arith.constant 16 : i32
    %66 = tpu.dynamic_rotate %10 by %c16_i32_21 dim 0 : vector<256x128xf32>, i32 -> vector<256x128xf32>
    %cst_22 = arith.constant 0.000000e+00 : f32
    %67 = vector.shape_cast %45 : vector<256x1xi1> to vector<256x1xi1>
    %68 = vector.broadcast %67 : vector<256x1xi1> to vector<256x128xi1>
    %69 = vector.broadcast %cst_22 : f32 to vector<256x128xf32>
    %70 = arith.select %68, %69, %66 : vector<256x128xi1>, vector<256x128xf32>
    %71 = arith.truncf %70 : vector<256x128xf32> to vector<256x128xbf16>
    %72 = tpu.concatenate %65, %71 in 1 : vector<256x128xbf16>, vector<256x128xbf16> -> vector<256x256xbf16>
    %c0_23 = arith.constant 0 : index
    %c0_24 = arith.constant 0 : index
    %c0_25 = arith.constant 0 : index
    %73 = vector.load %arg3[%c0_23, %c0_24, %c0_25] : memref<9x128x128xbf16, #tpu.memory_space<vmem>>, vector<1x128x128xbf16>
    %74 = vector.shape_cast %73 : vector<1x128x128xbf16> to vector<128x128xbf16>
    %c1 = arith.constant 1 : index
    %c0_26 = arith.constant 0 : index
    %c0_27 = arith.constant 0 : index
    %75 = vector.load %arg3[%c1, %c0_26, %c0_27] : memref<9x128x128xbf16, #tpu.memory_space<vmem>>, vector<1x128x128xbf16>
    %76 = vector.shape_cast %75 : vector<1x128x128xbf16> to vector<128x128xbf16>
    %77 = tpu.concatenate %74, %76 in 0 : vector<128x128xbf16>, vector<128x128xbf16> -> vector<256x128xbf16>
    %cst_28 = arith.constant dense<0.000000e+00> : vector<256x128xf32>
    %78 = tpu.matmul %72, %77, %cst_28 {dimension_numbers = #tpu.dot_dimension_numbers<[1], [0], [0], [1], [0, 0, 1, 1], [], []>} : vector<256x256xbf16>, vector<256x128xbf16>, vector<256x128xf32> -> vector<256x128xf32>
    %c15_i32_29 = arith.constant 15 : i32
    %79 = tpu.dynamic_rotate %59 by %c15_i32_29 dim 0 : vector<256x128xf32>, i32 -> vector<256x128xf32>
    %cst_30 = arith.constant 0.000000e+00 : f32
    %80 = vector.shape_cast %45 : vector<256x1xi1> to vector<256x1xi1>
    %81 = vector.broadcast %80 : vector<256x1xi1> to vector<256x128xi1>
    %82 = vector.broadcast %cst_30 : f32 to vector<256x128xf32>
    %83 = arith.select %81, %82, %79 : vector<256x128xi1>, vector<256x128xf32>
    %84 = arith.truncf %83 : vector<256x128xf32> to vector<256x128xbf16>
    %c1_i32_31 = arith.constant 1 : i32
    %85 = tpu.dynamic_rotate %53 by %c1_i32_31 dim 0 : vector<256x128xf32>, i32 -> vector<256x128xf32>
    %86 = arith.truncf %85 : vector<256x128xf32> to vector<256x128xbf16>
    %87 = tpu.concatenate %84, %86 in 1 : vector<256x128xbf16>, vector<256x128xbf16> -> vector<256x256xbf16>
    %c2 = arith.constant 2 : index
    %c0_32 = arith.constant 0 : index
    %c0_33 = arith.constant 0 : index
    %88 = vector.load %arg3[%c2, %c0_32, %c0_33] : memref<9x128x128xbf16, #tpu.memory_space<vmem>>, vector<1x128x128xbf16>
    %89 = vector.shape_cast %88 : vector<1x128x128xbf16> to vector<128x128xbf16>
    %c3 = arith.constant 3 : index
    %c0_34 = arith.constant 0 : index
    %c0_35 = arith.constant 0 : index
    %90 = vector.load %arg3[%c3, %c0_34, %c0_35] : memref<9x128x128xbf16, #tpu.memory_space<vmem>>, vector<1x128x128xbf16>
    %91 = vector.shape_cast %90 : vector<1x128x128xbf16> to vector<128x128xbf16>
    %92 = tpu.concatenate %89, %91 in 0 : vector<128x128xbf16>, vector<128x128xbf16> -> vector<256x128xbf16>
    %cst_36 = arith.constant dense<0.000000e+00> : vector<256x128xf32>
    %93 = tpu.matmul %87, %92, %cst_36 {dimension_numbers = #tpu.dot_dimension_numbers<[1], [0], [0], [1], [0, 0, 1, 1], [], []>} : vector<256x256xbf16>, vector<256x128xbf16>, vector<256x128xf32> -> vector<256x128xf32>
    %94 = arith.addf %78, %93 : vector<256x128xf32>
    %95 = arith.truncf %10 : vector<256x128xf32> to vector<256x128xbf16>
    %c255_i32 = arith.constant 255 : i32
    %96 = tpu.dynamic_rotate %59 by %c255_i32 dim 0 : vector<256x128xf32>, i32 -> vector<256x128xf32>
    %97 = arith.truncf %96 : vector<256x128xf32> to vector<256x128xbf16>
    %98 = tpu.concatenate %95, %97 in 1 : vector<256x128xbf16>, vector<256x128xbf16> -> vector<256x256xbf16>
    %c4 = arith.constant 4 : index
    %c0_37 = arith.constant 0 : index
    %c0_38 = arith.constant 0 : index
    %99 = vector.load %arg3[%c4, %c0_37, %c0_38] : memref<9x128x128xbf16, #tpu.memory_space<vmem>>, vector<1x128x128xbf16>
    %100 = vector.shape_cast %99 : vector<1x128x128xbf16> to vector<128x128xbf16>
    %c5 = arith.constant 5 : index
    %c0_39 = arith.constant 0 : index
    %c0_40 = arith.constant 0 : index
    %101 = vector.load %arg3[%c5, %c0_39, %c0_40] : memref<9x128x128xbf16, #tpu.memory_space<vmem>>, vector<1x128x128xbf16>
    %102 = vector.shape_cast %101 : vector<1x128x128xbf16> to vector<128x128xbf16>
    %103 = tpu.concatenate %100, %102 in 0 : vector<128x128xbf16>, vector<128x128xbf16> -> vector<256x128xbf16>
    %cst_41 = arith.constant dense<0.000000e+00> : vector<256x128xf32>
    %104 = tpu.matmul %98, %103, %cst_41 {dimension_numbers = #tpu.dot_dimension_numbers<[1], [0], [0], [1], [0, 0, 1, 1], [], []>} : vector<256x256xbf16>, vector<256x128xbf16>, vector<256x128xf32> -> vector<256x128xf32>
    %105 = arith.addf %94, %104 : vector<256x128xf32>
    %c241_i32 = arith.constant 241 : i32
    %106 = tpu.dynamic_rotate %53 by %c241_i32 dim 0 : vector<256x128xf32>, i32 -> vector<256x128xf32>
    %cst_42 = arith.constant 0.000000e+00 : f32
    %107 = vector.shape_cast %47 : vector<256x1xi1> to vector<256x1xi1>
    %108 = vector.broadcast %107 : vector<256x1xi1> to vector<256x128xi1>
    %109 = vector.broadcast %cst_42 : f32 to vector<256x128xf32>
    %110 = arith.select %108, %109, %106 : vector<256x128xi1>, vector<256x128xf32>
    %111 = arith.truncf %110 : vector<256x128xf32> to vector<256x128xbf16>
    %c240_i32_43 = arith.constant 240 : i32
    %112 = tpu.dynamic_rotate %10 by %c240_i32_43 dim 0 : vector<256x128xf32>, i32 -> vector<256x128xf32>
    %cst_44 = arith.constant 0.000000e+00 : f32
    %113 = vector.shape_cast %47 : vector<256x1xi1> to vector<256x1xi1>
    %114 = vector.broadcast %113 : vector<256x1xi1> to vector<256x128xi1>
    %115 = vector.broadcast %cst_44 : f32 to vector<256x128xf32>
    %116 = arith.select %114, %115, %112 : vector<256x128xi1>, vector<256x128xf32>
    %117 = arith.truncf %116 : vector<256x128xf32> to vector<256x128xbf16>
    %118 = tpu.concatenate %111, %117 in 1 : vector<256x128xbf16>, vector<256x128xbf16> -> vector<256x256xbf16>
    %c6 = arith.constant 6 : index
    %c0_45 = arith.constant 0 : index
    %c0_46 = arith.constant 0 : index
    %119 = vector.load %arg3[%c6, %c0_45, %c0_46] : memref<9x128x128xbf16, #tpu.memory_space<vmem>>, vector<1x128x128xbf16>
    %120 = vector.shape_cast %119 : vector<1x128x128xbf16> to vector<128x128xbf16>
    %c7 = arith.constant 7 : index
    %c0_47 = arith.constant 0 : index
    %c0_48 = arith.constant 0 : index
    %121 = vector.load %arg3[%c7, %c0_47, %c0_48] : memref<9x128x128xbf16, #tpu.memory_space<vmem>>, vector<1x128x128xbf16>
    %122 = vector.shape_cast %121 : vector<1x128x128xbf16> to vector<128x128xbf16>
    %123 = tpu.concatenate %120, %122 in 0 : vector<128x128xbf16>, vector<128x128xbf16> -> vector<256x128xbf16>
    %cst_49 = arith.constant dense<0.000000e+00> : vector<256x128xf32>
    %124 = tpu.matmul %118, %123, %cst_49 {dimension_numbers = #tpu.dot_dimension_numbers<[1], [0], [0], [1], [0, 0, 1, 1], [], []>} : vector<256x256xbf16>, vector<256x128xbf16>, vector<256x128xf32> -> vector<256x128xf32>
    %125 = arith.addf %105, %124 : vector<256x128xf32>
    %c239_i32 = arith.constant 239 : i32
    %126 = tpu.dynamic_rotate %59 by %c239_i32 dim 0 : vector<256x128xf32>, i32 -> vector<256x128xf32>
    %cst_50 = arith.constant 0.000000e+00 : f32
    %127 = vector.shape_cast %47 : vector<256x1xi1> to vector<256x1xi1>
    %128 = vector.broadcast %127 : vector<256x1xi1> to vector<256x128xi1>
    %129 = vector.broadcast %cst_50 : f32 to vector<256x128xf32>
    %130 = arith.select %128, %129, %126 : vector<256x128xi1>, vector<256x128xf32>
    %131 = arith.truncf %130 : vector<256x128xf32> to vector<256x128xbf16>
    %c8 = arith.constant 8 : index
    %c0_51 = arith.constant 0 : index
    %c0_52 = arith.constant 0 : index
    %132 = vector.load %arg3[%c8, %c0_51, %c0_52] : memref<9x128x128xbf16, #tpu.memory_space<vmem>>, vector<1x128x128xbf16>
    %133 = vector.shape_cast %132 : vector<1x128x128xbf16> to vector<128x128xbf16>
    %cst_53 = arith.constant dense<0.000000e+00> : vector<256x128xf32>
    %134 = tpu.matmul %131, %133, %cst_53 {dimension_numbers = #tpu.dot_dimension_numbers<[1], [0], [0], [1], [0, 0, 1, 1], [], []>} : vector<256x128xbf16>, vector<128x128xbf16>, vector<256x128xf32> -> vector<256x128xf32>
    %135 = arith.addf %125, %134 : vector<256x128xf32>
    %c0_54 = arith.constant 0 : index
    %c0_55 = arith.constant 0 : index
    %136 = vector.load %arg6[%c0_54, %c0_55] : memref<1x128xf32, #tpu.memory_space<vmem>>, vector<1x128xf32>
    %137 = vector.shape_cast %136 : vector<1x128xf32> to vector<128xf32>
    %138 = vector.shape_cast %137 : vector<128xf32> to vector<1x128xf32>
    %139 = vector.broadcast %138 : vector<1x128xf32> to vector<256x128xf32>
    %140 = arith.addf %135, %139 : vector<256x128xf32>
    %cst_56 = arith.constant 0.000000e+00 : f32
    %141 = vector.broadcast %cst_56 : f32 to vector<256x128xf32>
    %142 = arith.maximumf %140, %141 : vector<256x128xf32>
    %143 = arith.truncf %142 : vector<256x128xf32> to vector<256x128xbf16>
    %c0_57 = arith.constant 0 : index
    %c0_58 = arith.constant 0 : index
    %144 = vector.load %arg4[%c0_57, %c0_58] : memref<128x128xbf16, #tpu.memory_space<vmem>>, vector<128x128xbf16>
    %cst_59 = arith.constant dense<0.000000e+00> : vector<256x128xf32>
    %145 = tpu.matmul %143, %144, %cst_59 {dimension_numbers = #tpu.dot_dimension_numbers<[1], [0], [0], [1], [0, 0, 1, 1], [], []>} : vector<256x128xbf16>, vector<128x128xbf16>, vector<256x128xf32> -> vector<256x128xf32>
    %c0_60 = arith.constant 0 : index
    %c0_61 = arith.constant 0 : index
    %146 = vector.load %arg7[%c0_60, %c0_61] : memref<1x128xf32, #tpu.memory_space<vmem>>, vector<1x128xf32>
    %147 = vector.shape_cast %146 : vector<1x128xf32> to vector<128xf32>
    %148 = vector.shape_cast %147 : vector<128xf32> to vector<1x128xf32>
    %149 = vector.broadcast %148 : vector<1x128xf32> to vector<256x128xf32>
    %150 = arith.addf %145, %149 : vector<256x128xf32>
    %151 = arith.extf %1 : vector<256x128xbf16> to vector<256x128xf32>
    %152 = arith.addf %150, %151 : vector<256x128xf32>
    %cst_62 = arith.constant 0.000000e+00 : f32
    %153 = vector.broadcast %cst_62 : f32 to vector<256x128xf32>
    %154 = arith.maximumf %152, %153 : vector<256x128xf32>
    %155 = vector.shape_cast %154 : vector<256x128xf32> to vector<1x16x16x128xf32>
    %156 = arith.truncf %155 : vector<1x16x16x128xf32> to vector<1x16x16x128xbf16>
    %c0_63 = arith.constant 0 : index
    %c0_64 = arith.constant 0 : index
    %c0_65 = arith.constant 0 : index
    %c0_66 = arith.constant 0 : index
    %157 = vector.load %arg8[%c0_63, %c0_64, %c0_65, %c0_66] : memref<1x16x16x128xbf16, #tpu.memory_space<vmem>>, vector<1x16x16x128xbf16>
    tpu.vector_store %arg8[%c0_63, %c0_64, %c0_65, %c0_66], %156 {strides = array<i32>} : memref<1x16x16x128xbf16, #tpu.memory_space<vmem>>, vector<1x16x16x128xbf16>,
    return
  }
  func.func @transform_0(%arg0: i32) -> (i32, i32, i32, i32) {
    %c0_i32 = arith.constant 0 : i32
    %c0_i32_0 = arith.constant 0 : i32
    %c0_i32_1 = arith.constant 0 : i32
    %c0_i32_2 = arith.constant 0 : i32
    return %arg0, %c0_i32, %c0_i32_0, %c0_i32_1 : i32, i32, i32, i32
  }
  func.func @transform_1(%arg0: i32) -> (i32, i32) {
    %c0_i32 = arith.constant 0 : i32
    %c0_i32_0 = arith.constant 0 : i32
    %c0_i32_1 = arith.constant 0 : i32
    return %c0_i32, %c0_i32_0 : i32, i32
  }
  func.func @transform_2(%arg0: i32) -> (i32, i32, i32) {
    %c0_i32 = arith.constant 0 : i32
    %c0_i32_0 = arith.constant 0 : i32
    %c0_i32_1 = arith.constant 0 : i32
    %c0_i32_2 = arith.constant 0 : i32
    return %c0_i32, %c0_i32_0, %c0_i32_1 : i32, i32, i32
  }
  func.func @transform_3(%arg0: i32) -> (i32, i32) {
    %c0_i32 = arith.constant 0 : i32
    %c0_i32_0 = arith.constant 0 : i32
    %c0_i32_1 = arith.constant 0 : i32
    return %c0_i32, %c0_i32_0 : i32, i32
  }
  func.func @transform_4(%arg0: i32) -> (i32, i32) {
    %c0_i32 = arith.constant 0 : i32
    %c0_i32_0 = arith.constant 0 : i32
    %c0_i32_1 = arith.constant 0 : i32
    return %c0_i32, %c0_i32_0 : i32, i32
  }
  func.func @transform_5(%arg0: i32) -> (i32, i32) {
    %c0_i32 = arith.constant 0 : i32
    %c0_i32_0 = arith.constant 0 : i32
    %c0_i32_1 = arith.constant 0 : i32
    return %c0_i32, %c0_i32_0 : i32, i32
  }
  func.func @transform_6(%arg0: i32) -> (i32, i32) {
    %c0_i32 = arith.constant 0 : i32
    %c0_i32_0 = arith.constant 0 : i32
    %c0_i32_1 = arith.constant 0 : i32
    return %c0_i32, %c0_i32_0 : i32, i32
  }
  func.func @transform_7(%arg0: i32) -> (i32, i32, i32, i32) {
    %c0_i32 = arith.constant 0 : i32
    %c0_i32_0 = arith.constant 0 : i32
    %c0_i32_1 = arith.constant 0 : i32
    %c0_i32_2 = arith.constant 0 : i32
    return %arg0, %c0_i32, %c0_i32_0, %c0_i32_1 : i32, i32, i32, i32
  }
}

</mosaic_0001>

<bundles_post_ra>
// kernel: tpu_custom_call.1
= control target key start
LH: loop header
LB: loop body
LE: loop exit
PB: predicated region body
PF: predicated region fallthrough
CT: control target
= control target key end

     0   :  { %s7855_s0 = inlined_call_operand.hbm [shape: bf16[2,16,16,128], index: 0, kind: input, shape index: {}]   ;;  %s7856_s1 = inlined_call_operand.hbm [shape: bf16[128,128], index: 1, kind: input, shape index: {}]   ;;  %s7857_s2 = inlined_call_operand.hbm [shape: bf16[9,128,128], index: 2, kind: input, shape index: {}]   ;;  %s7858_s3 = inlined_call_operand.hbm [shape: bf16[128,128], index: 3, kind: input, shape index: {}]   ;;  %s7859_s4 = inlined_call_operand.vmem [shape: f32[1,128], index: 4, kind: input, shape index: {}]   ;;  %s7860_s5 = inlined_call_operand.vmem [shape: f32[1,128], index: 5, kind: input, shape index: {}]   ;;  %s7861_s6 = inlined_call_operand.vmem [shape: f32[1,128], index: 6, kind: input, shape index: {}]   ;;  %s7862_s7 = inlined_call_operand.hbm [shape: bf16[2,16,16,128], index: 7, kind: output, shape index: {}]  }
   0x1   :  { %7891 = sst [smem:[#allocation42_spill]] %s7856_s1 }
   0x2   :  { %12 = vsyncpa [#allocation3], 0 }
   0x3   :  { %14 = vsyncpa [#allocation3 + $0x1], 0 }
   0x4   :  { %15 = vsyncpa [#allocation6], 0 }
   0x5   :  { %16 = vsyncpa [#allocation9], 0 }
   0x6   :  { %17 = vsyncpa [#allocation4], 0 }
   0x7   :  { %19 = vsyncpa [#allocation4 + $0x1], 0  ;;  %s6041_s24 = smov 0   ;;  %s6043_s25 = smov 0  }
   0x8   :  { %s6045_s26 = smov 0   ;;  %s6047_s27 = smov 0  }
   0x9 LB: > { %s6062_s28 = sadd.s32 4294967295, %s5989_s27   ;;  %s4625_s29 = sadd.s32 4294967294, %s5989_s27   ;;  %s5989_s27 = sphi %s6047_s27, %s8125_s27   ;;  %s5985_s26 = sphi %s6045_s26, %s8124_s26   ;;  %s5981_s25 = sphi %s6043_s25, %s8123_s25   ;;  %s5977_s24 = sphi %s6041_s24, %s8122_s24  }
   0xa   : > { %p45_p0 = scmp.ne.s32.totalorder %s5981_s25, %s5977_s24  ;;  %p7863_p1 = scmp.eq.s32.totalorder %s6062_s28, 0 }
   0xb   : > { %p195_p2 = scmp.eq.s32.totalorder %s6062_s28, 1  ;;  %p201_p3 = scmp.eq.s32.totalorder %s4625_s29, 1 }
   0xc   : > { %p6071_p4 = por %p7863_p1, %p45_p0  ;;  %p4626_p5 = scmp.ge.s32.totalorder %s5989_s27, 1 }
   0xd   : > { %p6076_p6 = por %p201_p3, %p45_p0  ;;  %p208_p7 = scmp.lt.s32.totalorder %s5989_s27, 3 }
   0xe   : > { %s7892_s30 = scalar_select %p6071_p4, 1, 0 }
   0xf   : > { %s7893_s8 = scalar_select %p6076_p6, 1, 0 }
  0x10   : > { %p6081_p8 = pnand %p4626_p5, %p208_p7  ;;  %s5991_s10 = smov [#allocation5]  }
  0x11   : > { %s220_s11 = sshll.u32 %s5991_s10, 4  ;;  %s5992_s13 = smov [#allocation7]   ;;  %s221_s11 = int_to_ptr.vmem [resolvable:$true] %s220_s11 }
  0x12   : > { %s7894_s9 = scalar_select %p6081_p8, 1, 0 }
  0x13   : > { %p5609_p9 = pneg %p6081_p8  ;;  %s233_s14 = sshll.u32 %s5992_s13, 4  ;;  %s234_s14 = int_to_ptr.vmem [resolvable:$true] %s233_s14 }
  0x14   : > { %s5993_s15 = smov [#allocation8]   ;;  %s5822_s17 = scalar_lea.vmem %s221_s11, 1024 }
  0x15   : > { %p6090_p11 = pnand %p5609_p9, %p7863_p1  ;;  %s246_s16 = sshll.u32 %s5993_s15, 4  ;;  %s247_s16 = int_to_ptr.vmem [resolvable:$true] %s246_s16 }
  0x16   : > { %p5823_p13 = scmp.ne.s32.totalorder %s221_s11, %s5822_s17  ;;  %p5830_p5 = scmp.lt.s32.totalorder %s221_s11, %s221_s11 }
  0x17   : > { %p5813_p12 = pneg %p6090_p11  ;;  %p5831_p7 = scmp.lt.s32.totalorder %s5822_s17, %s5822_s17 }
  0x19   : > { %p5825_p0 = pnand %p5823_p13, %p5813_p12  ;;  %p5832_p9 = por %p5831_p7, %p5830_p5 }
  0x1b   : > { %p5826_p3 = pneg %p5825_p0 }
  0x1d   : > { %p5833_p10 = pnand %p5832_p9, %p5826_p3 }
  0x1f   : > { %5836 = shalt.err (!%p5833_p10)
}
  0x20   : > { %s7864_s18 = smov 64   ;;  %s7865_s19 = smov 4  }
  0x21   : > { %s7896_s1 = sld [smem:[#allocation42_spill]]  ;;  %s5848_s22 = scalar_lea.vmem %s234_s14, 9216 }
  0x22   : > { %p5849_p13 = scmp.ne.s32.totalorder %s234_s14, %s5848_s22  ;;  %p5856_p3 = scmp.lt.s32.totalorder %s234_s14, %s234_s14 }
  0x23   : > { %p5857_p10 = scmp.lt.s32.totalorder %s5848_s22, %s5848_s22 }
  0x24   : > { %p5851_p0 = pnand %p5849_p13, %p5813_p12 }
  0x25   : > { %p5858_p7 = por %p5857_p10, %p5856_p3 }
  0x26   : > { %p5852_p5 = pneg %p5851_p0 }
  0x27   : > { %5612 = dma.hbm_to_vmem [thread:$0]  (!%p6090_p11), %s7896_s1, 1024, %s221_s11, [#allocation6], %s7864_s18, %s7864_s18, %s7865_s19  }
  0x28   : > { %p5859_p9 = pnand %p5858_p7, %p5852_p5 }
  0x2a   : > { %5862 = shalt.err (!%p5859_p9)
}
  0x2b   : > { %5615 = dma.hbm_to_vmem [thread:$0]  (!%p6090_p11), %s7857_s2, 9216, %s234_s14, [#allocation6], %s7864_s18, %s7864_s18, %s7865_s19  }
  0x2c   : > { %s5874_s10 = scalar_lea.vmem %s247_s16, 1024  ;;  %p5882_p3 = scmp.lt.s32.totalorder %s247_s16, %s247_s16 }
  0x2d   : > { %p5875_p1 = scmp.ne.s32.totalorder %s247_s16, %s5874_s10  ;;  %p5883_p5 = scmp.lt.s32.totalorder %s5874_s10, %s5874_s10 }
  0x2f   : > { %p5877_p13 = pnand %p5875_p1, %p5813_p12  ;;  %p5884_p10 = por %p5883_p5, %p5882_p3 }
  0x31   : > { %p5878_p0 = pneg %p5877_p13 }
  0x33   : > { %p5885_p7 = pnand %p5884_p10, %p5878_p0 }
  0x35   : > { %5888 = shalt.err (!%p5885_p7)
}
  0x36   : > { %5618 = dma.hbm_to_vmem [thread:$0]  (!%p6090_p11), %s7858_s3, 1024, %s247_s16, [#allocation9], %s7864_s18, %s7864_s18, %s7865_s19  }
  0x37   : > { %s6130_s14 = sadd.s32 1, %s5989_s27   ;;  %s32_s15 = sadd.s32 1, %s5985_s26 }
  0x38   : > { %s29_s12 = ssub.s32 %s5989_s27, %s6130_s14  ;;  %p39_p12 = scmp.ne.s32.totalorder %s5985_s26, %s5981_s25 }
  0x39   : > { %p30_p1 = scmp.eq.s32.totalorder %s29_s12, 0  ;;  %p40_p9 = scmp.eq.s32.totalorder %s5989_s27, 0 }
  0x3a   : > { %p5630_p13 = scmp.lt.s32.totalorder %s5989_s27, 2  ;;  %p6144_p3 = por %p195_p2, %p39_p12 }
  0x3b   : > { %s6140_s17 = scalar_select %p30_p1, %s5985_s26, %s32_s15  }
  0x3c   : > { %p41_p0 = por %p40_p9, %p39_p12  ;;  %s269_s21 = sand.u32 1, %s5985_s26  }
  0x3d   : > { %s7897_s20 = scalar_select %p6144_p3, 1, 0 }
  0x3e   : > { %s4784_s22 = sshll.u32 %s5989_s27, 11  ;;  %s4631_s16 = sshll.u32 %s269_s21, 7 }
  0x3f   : > { %s6153_s10 = scalar_lea.hbm %s7855_s0, %s4784_s22  ;;  %s273_s11 = scalar_lea.vmem [#allocation2], %s4631_s16 }
  0x40   : > { %s280_s13 = sshll.u32 %s273_s11, 4  ;;  %p6155_p11 = pnand %p5630_p13, %p41_p0  ;;  %s6159_s13 = int_to_ptr.vmem [resolvable:$true] %s280_s13 }
  0x41   : > { %s6161_s15 = scalar_lea.sflag [#allocation3], %s269_s21  ;;  %s5889_s18 = scalar_lea.hbm %s6153_s10, 2048 }
  0x42   : > { %p5890_p2 = scmp.ne.s32.totalorder %s6153_s10, %s5889_s18  ;;  %p5891_p5 = pneg %p6155_p11 }
  0x43   : > { %s5894_s16 = scalar_lea.hbm %s7855_s0, 4096  ;;  %p5895_p1 = scmp.lt.s32.totalorder %s6153_s10, %s7855_s0 }
  0x44   : > { %p5892_p10 = pnand %p5891_p5, %p5890_p2  ;;  %p5896_p12 = scmp.lt.s32.totalorder %s5894_s16, %s5889_s18 }
  0x46   : > { %p5893_p7 = pneg %p5892_p10  ;;  %p5897_p9 = por %p5896_p12, %p5895_p1 }
  0x48   : > { %p5898_p13 = pnand %p5897_p9, %p5893_p7 }
  0x4a   : > { %5901 = shalt.err (!%p5898_p13)
}
  0x4b   : > { %s5902_s21 = scalar_lea.vmem %s6159_s13, 2048  ;;  %s5996_s19 = smov [#allocation2]  }
  0x4c   : > { %p5903_p0 = scmp.ne.s32.totalorder %s6159_s13, %s5902_s21  ;;  %s5907_s1 = sshll.u32 %s5996_s19, 4  ;;  %s5908_s1 = int_to_ptr.vmem [resolvable:$false] %s5907_s1 }
  0x4d   : > { %s5909_s22 = scalar_lea.vmem %s5908_s1, 4096  ;;  %p5910_p10 = scmp.lt.s32.totalorder %s6159_s13, %s5908_s1 }
  0x4e   : > { %p5905_p6 = pnand %p5903_p0, %p5891_p5  ;;  %p5911_p3 = scmp.lt.s32.totalorder %s5909_s22, %s5902_s21 }
  0x50   : > { %p5906_p2 = pneg %p5905_p6  ;;  %p5912_p4 = por %p5911_p3, %p5910_p10 }
  0x52   : > { %p5913_p8 = pnand %p5912_p4, %p5906_p2 }
  0x54   : > { %5916 = shalt.err (!%p5913_p8)
}
  0x55   : > { %s7899_s18 = smov 4   ;;  %s7900_s23 = smov 64  }
  0x56   : > { %5622 = dma.hbm_to_vmem [thread:$0]  (!%p6155_p11), %s6153_s10, 2048, %s6159_s13, %s6161_s15, %s7900_s23, %s7900_s23, %s7899_s18  }
  0x57   : > { %p7901_p6 = scmp.ne.s32.totalorder %s7894_s9, 0 }
  0x59   : > { %292 = sbr.rel (%p7901_p6) target bundleno = 1123 (0x463), region = 48 }
  0x5e   : > { %s6188_s19 = sand.u32 1, %s5981_s25   ;;  %p7902_p4 = scmp.ne.s32.totalorder %s7892_s30, 0 }
  0x5f   : > { %s4635_s1 = sshll.u32 %s6188_s19, 7  ;;  %s295_s16 = scalar_lea.sflag [#allocation3], %s6188_s19 }
  0x60   : > { %s6194_s12 = scalar_lea.vmem [#allocation2], %s4635_s1 }
  0x61   : > { %5960 = dma.done.wait (%p7902_p4), %s295_s16, 2048  }
  0x62   : > { %5962 = vsyncadd (%p7902_p4), %s295_s16, 4294965248  ;;  %p7903_p8 = scmp.eq.s32.totalorder %s6062_s28, 0 }
  0x64   : > { %5964 = dma.done.wait (%p7903_p8), [#allocation6], 10240   ;;  %p7904_p3 = pmov %p7903_p8 }
  0x66   : > { %5966 = vsyncadd (%p7904_p3), [#allocation6], 4294957056  ;;  %p7905_p11 = pmov %p7904_p3 }
  0x67   : > { %p7906_p5 = pmov %p7904_p3 }
  0x68   : > { %5968 = dma.done.wait (%p7905_p11), [#allocation9], 1024  }
  0x69   : > { %5970 = vsyncadd (%p7906_p5), [#allocation9], 4294966272  ;;  %v5675_v0 = vld [vmem:[#allocation5 + $0x38] sm:$0xff]   ;;  %v5676_v1 = vld [vmem:[#allocation5 + $0x30] sm:$0xff]   ;;  %v7869_v51 = vmov 0.0|0.0   ;;  %v734_v60 = vlaneseq  ;;  %s7749_s11 = scalar_lea.vmem [#allocation10], %s4635_s1 }
  0x6a   : > { %5433 = vmatprep.subr.bf16.mxu0 %v5675_v0  ;;  %5577 = vmatprep.subr.bf16.mxu1 %v5675_v0  ;;  %v5677_v2 = vld [vmem:[#allocation5 + $0x28] sm:$0xff]   ;;  %v5678_v3 = vld [vmem:[#allocation5 + $0x20] sm:$0xff]   ;;  %v5679_v6 = vld [vmem:[#allocation5 + $0x18] sm:$0xff]   ;;  %s4817_s21 = sshll.u32 %s6062_s28, 11  ;;  %s4523_s22 = sshll.u32 %s7749_s11, 4  ;;  %s7810_s22 = int_to_ptr.vmem [resolvable:$true] %s4523_s22 }
  0x6b   : > { %5434 = vmatpush3.bf16.msra.mxu0 %v5675_v0  ;;  %5585 = vmatpush3.bf16.msra.mxu1 %v5675_v0  ;;  %v342_v4 = vld [vmem:[%s6194_s12] sm:$0xff]   ;;  %v5680_v7 = vld [vmem:[#allocation5 + $0x10] sm:$0xff]   ;;  %v5681_v8 = vld [vmem:[#allocation5 + $0x8] sm:$0xff]   ;;  %v6226_v61 = vshrl.u32 %v734_v60, 7  ;;  %s7808_s1 = scalar_lea.hbm %s7862_s7, %s4817_s21  ;;  %s4510_s16 = scalar_lea.sflag [#allocation4], %s6188_s19 }
  0x6c   : > { %5435 = vmatprep.subr.bf16.mxu0 %v5676_v1  ;;  %5578 = vmatprep.subr.bf16.mxu1 %v5676_v1  ;;  %v358_v5 = vld [vmem:[%s6194_s12 + $0x40] sm:$0xff]   ;;  %v344_v10 = vld [vmem:[%s6194_s12 + $0x8] sm:$0xff]   ;;  %v346_v12 = vld [vmem:[%s6194_s12 + $0x10] sm:$0xff]   ;;  %p8119_p1 = scmp.ne.s32.totalorder %s7897_s20, 0  ;;  %s5998_s28 = smov [#allocation10]  }
  0x6d   : > { %5449 = vmatprep.mubr.bf16.mxu0 %v342_v4  ;;  %5465 = vmatprep.mubr.bf16.mxu1 %v358_v5  ;;  %v5682_v9 = vld [vmem:[#allocation5] sm:$0xff]   ;;  %v360_v11 = vld [vmem:[%s6194_s12 + $0x48] sm:$0xff]   ;;  %v362_v13 = vld [vmem:[%s6194_s12 + $0x50] sm:$0xff]   ;;  %v753_v0 = vadd.s32 144, %v6226_v61  ;;  %v754_v4 = vadd.s32 152, %v6226_v61  ;;  %v762_v60 = vadd.s32 216, %v6226_v61 }
  0x6e   : > { %v5699_v14 = vld [vmem:[#allocation7 + $0x78] sm:$0xff]   ;;  %v350_v18 = vld [vmem:[%s6194_s12 + $0x20] sm:$0xff]   ;;  %v352_v20 = vld [vmem:[%s6194_s12 + $0x28] sm:$0xff]   ;;  %s5921_s30 = sshll.u32 %s5998_s28, 4  ;;  %s5922_s30 = int_to_ptr.vmem [resolvable:$false] %s5921_s30 }
  0x6f   : > { %5436 = vmatpush3.bf16.msra.mxu0 %v5676_v1  ;;  %5586 = vmatpush3.bf16.msra.mxu1 %v5676_v1  ;;  %v5700_v15 = vld [vmem:[#allocation7 + $0x38] sm:$0xff]   ;;  %v366_v19 = vld [vmem:[%s6194_s12 + $0x60] sm:$0xff]   ;;  %v368_v21 = vld [vmem:[%s6194_s12 + $0x68] sm:$0xff]   ;;  %v751_v1 = vadd.s32 128, %v6226_v61  ;;  %s5923_s9 = scalar_lea.vmem %s5922_s30, 4096  ;;  %p5924_p13 = scmp.lt.s32.totalorder %s7810_s22, %s5922_s30 }
  0x70   : > { %5437 = vmatprep.subr.bf16.mxu0 %v5677_v2  ;;  %5579 = vmatprep.subr.bf16.mxu1 %v5677_v2  ;;  %v348_v16 = vld [vmem:[%s6194_s12 + $0x18] sm:$0xff]   ;;  %v354_v22 = vld [vmem:[%s6194_s12 + $0x30] sm:$0xff]   ;;  %v5703_v28 = vld [vmem:[#allocation7 + $0x68] sm:$0xff]  }
  0x71   : > { %v364_v17 = vld [vmem:[%s6194_s12 + $0x58] sm:$0xff]   ;;  %v370_v23 = vld [vmem:[%s6194_s12 + $0x70] sm:$0xff]   ;;  %v5704_v29 = vld [vmem:[#allocation7 + $0x28] sm:$0xff]  }
  0x72   : > { %v356_v24 = vld [vmem:[%s6194_s12 + $0x38] sm:$0xff]   ;;  %v5701_v26 = vld [vmem:[#allocation7 + $0x70] sm:$0xff]   ;;  %v5707_v31 = vld [vmem:[#allocation7 + $0x60] sm:$0xff]  }
  0x73   : > { %5438 = vmatpush3.bf16.msra.mxu0 %v5677_v2  ;;  %5587 = vmatpush3.bf16.msra.mxu1 %v5677_v2  ;;  %v372_v25 = vld [vmem:[%s6194_s12 + $0x78] sm:$0xff]   ;;  %v5702_v27 = vld [vmem:[#allocation7 + $0x30] sm:$0xff]   ;;  %v5708_v33 = vld [vmem:[#allocation7 + $0x20] sm:$0xff]  }
  0x74   : > { %5439 = vmatprep.subr.bf16.mxu0 %v5678_v3  ;;  %5580 = vmatprep.subr.bf16.mxu1 %v5678_v3  ;;  %v5705_v30 = vld [vmem:[#allocation7 + $0xf8] sm:$0xff]   ;;  %v5709_v34 = vld [vmem:[#allocation7 + $0xf0] sm:$0xff]   ;;  %v5713_v38 = vld [vmem:[#allocation7 + $0xe8] sm:$0xff]  }
  0x75   : > { %v5706_v32 = vld [vmem:[#allocation7 + $0xb8] sm:$0xff]   ;;  %v5710_v36 = vld [vmem:[#allocation7 + $0xb0] sm:$0xff]   ;;  %v5714_v40 = vld [vmem:[#allocation7 + $0xa8] sm:$0xff]  }
  0x76   : > { %v5711_v35 = vld [vmem:[#allocation7 + $0x58] sm:$0xff]   ;;  %v5715_v39 = vld [vmem:[#allocation7 + $0x50] sm:$0xff]   ;;  %v5717_v42 = vld [vmem:[#allocation7 + $0xe0] sm:$0xff]  }
  0x77   : > { %5440 = vmatpush3.bf16.msra.mxu0 %v5678_v3  ;;  %5588 = vmatpush3.bf16.msra.mxu1 %v5678_v3  ;;  %v5712_v37 = vld [vmem:[#allocation7 + $0x18] sm:$0xff]   ;;  %v5716_v41 = vld [vmem:[#allocation7 + $0x10] sm:$0xff]   ;;  %v5719_v43 = vld [vmem:[#allocation7 + $0x48] sm:$0xff]   ;;  %v1281_v3 = vand.u32 15, %v753_v0  ;;  %v7918_v0 = vmov 0 }
  0x78   : > { %5441 = vmatprep.subr.bf16.mxu0 %v5679_v6  ;;  %5581 = vmatprep.subr.bf16.mxu1 %v5679_v6  ;;  %v5718_v44 = vld [vmem:[#allocation7 + $0xa0] sm:$0xff]   ;;  %v5720_v45 = vld [vmem:[#allocation7 + $0x8] sm:$0xff]   ;;  %v5721_v46 = vld [vmem:[#allocation7 + $0xd8] sm:$0xff]  }
  0x79   : > { %v5723_v47 = vld [vmem:[#allocation7 + $0x40] sm:$0xff]   ;;  %v5722_v48 = vld [vmem:[#allocation7 + $0x98] sm:$0xff]   ;;  %v5725_v50 = vld [vmem:[#allocation7 + $0xd0] sm:$0xff]   ;;  %vm6242_vm0 = vcmp.eq.s32.totalorder %v1281_v3, 0 }
  0x7a   : > { %v5724_v49 = vld [vmem:[#allocation7] sm:$0xff]   ;;  %v5726_v52 = vld [vmem:[#allocation7 + $0x90] sm:$0xff]   ;;  %v5727_v53 = vld [vmem:[#allocation7 + $0xc8] sm:$0xff]  }
  0x7b   : > { %5442 = vmatpush3.bf16.msra.mxu0 %v5679_v6  ;;  %5589 = vmatpush3.bf16.msra.mxu1 %v5679_v6  ;;  %v5728_v54 = vld [vmem:[#allocation7 + $0x88] sm:$0xff]   ;;  %v5729_v55 = vld [vmem:[#allocation7 + $0xc0] sm:$0xff]   ;;  %v5731_v57 = vld [vmem:[#allocation7 + $0x178] sm:$0xff]  }
  0x7c   : > { %5443 = vmatprep.subr.bf16.mxu0 %v5680_v7  ;;  %5582 = vmatprep.subr.bf16.mxu1 %v5680_v7  ;;  %v5730_v56 = vld [vmem:[#allocation7 + $0x80] sm:$0xff]   ;;  %v5739_v58 = vld [vmem:[#allocation7 + $0x1f8] sm:$0xff]   ;;  %v5743_v62 = vld [vmem:[#allocation7 + $0x1f0] sm:$0xff]  }
  0x7d   : > { %v5740_v59 = vld [vmem:[#allocation7 + $0x1b8] sm:$0xff]   ;;  %v5744_v63 = vld [vmem:[#allocation7 + $0x1b0] sm:$0xff]   ;;  %v6233_v2 = vld [vmem:[%s7859_s4] ss:$0 sm:$0xff] }
  0x7f   : > { %5444 = vmatpush3.bf16.msra.mxu0 %v5680_v7  ;;  %5590 = vmatpush3.bf16.msra.mxu1 %v5680_v7  ;;  %v6239_v7 = vadd.s32 16, %v6226_v61 }
  0x80   : > { %5445 = vmatprep.subr.bf16.mxu0 %v5681_v8  ;;  %5583 = vmatprep.subr.bf16.mxu1 %v5681_v8 }
  0x83   : > { %5446 = vmatpush3.bf16.msra.mxu0 %v5681_v8  ;;  %5591 = vmatpush3.bf16.msra.mxu1 %v5681_v8 }
  0x84   : > { %5447 = vmatprep.subr.bf16.mxu0 %v5682_v9  ;;  %5584 = vmatprep.subr.bf16.mxu1 %v5682_v9 }
  0x87   : > { %5448 = vmatpush3.bf16.msra.mxu0 %v5682_v9  ;;  %5592 = vmatpush3.bf16.msra.mxu1 %v5682_v9  ;;  %v1267_v9 = vand.u32 15, %v751_v1 }
  0x88   : > { %5049 = vmatprep.subr.bf16.mxu0 %v5699_v14  ;;  %4937 = vmatprep.subr.bf16.mxu1 %v5705_v30 }
  0x89   : > { %vm6259_vm1 = vcmp.eq.s32.totalorder %v1267_v9, 0  ;;  %v5754_v9 = vld [vmem:[#allocation7 + $0x198] sm:$0xff]  }
  0x8a   : > { %5450 = vmatmul.mubr.bf16.vlgmr.msra.gmra.mxu0 %v344_v10  ;;  %5466 = vmatmul.mubr.bf16.vlgmr.msra.gmra.mxu1 %v360_v11 }
  0x8b   : > { %5453 = vmatprep.mubr.bf16.mxu0 %v346_v12  ;;  %5469 = vmatprep.mubr.bf16.mxu1 %v362_v13 }
  0x8c   : > { %5050 = vmatpush3.bf16.msra.mxu0 %v5700_v15  ;;  %4938 = vmatpush3.bf16.msra.mxu1 %v5706_v32  ;;  %v1288_v15 = vand.u32 15, %v754_v4  ;;  %v756_v32 = vadd.s32 168, %v6226_v61 }
  0x8d   : > { %5051 = vmatprep.subr.bf16.mxu0 %v5701_v26  ;;  %4939 = vmatprep.subr.bf16.mxu1 %v5709_v34  ;;  %v6268_v26 = vadd.s32 24, %v6226_v61 }
  0x8e   : > { %vm6276_vm2 = vcmp.eq.s32.totalorder %v1288_v15, 15  ;;  %v6342_v15 = vadd.s32 64, %v6226_v61 }
  0x90   : > { %5052 = vmatpush3.bf16.msra.mxu0 %v5702_v27  ;;  %4940 = vmatpush3.bf16.msra.mxu1 %v5710_v36 }
  0x91   : > { %5053 = vmatprep.subr.bf16.mxu0 %v5703_v28  ;;  %4941 = vmatprep.subr.bf16.mxu1 %v5713_v38  ;;  %v6273_v28 = vadd.s32 136, %v6226_v61 }
  0x92   : > { %5454 = vmatmul.mubr.bf16.gmra.mxu0 %v348_v16  ;;  %5470 = vmatmul.mubr.bf16.gmra.mxu1 %v364_v17 }
  0x93   : > { %5457 = vmatprep.mubr.bf16.mxu0 %v350_v18  ;;  %5473 = vmatprep.mubr.bf16.mxu1 %v366_v19  ;;  %v757_v18 = vadd.s32 176, %v6226_v61  ;;  %v755_v19 = vadd.s32 160, %v6226_v61 }
  0x94   : > { %5054 = vmatpush3.bf16.msra.mxu0 %v5704_v29  ;;  %4942 = vmatpush3.bf16.msra.mxu1 %v5714_v40  ;;  %v6295_v40 = vadd.s32 32, %v6226_v61 }
  0x95   : > { %5055 = vmatprep.subr.bf16.mxu0 %v5707_v31  ;;  %4943 = vmatprep.subr.bf16.mxu1 %v5717_v42  ;;  %v6281_v31 = vadd.s32 8, %v6226_v61  ;;  %v1295_v38 = vand.u32 15, %v755_v19  ;;  %v761_v42 = vadd.s32 208, %v6226_v61 }
  0x97   : > { %vm6321_vm4 = vcmp.eq.s32.totalorder %v1295_v38, 0  ;;  %v1337_v1 = vand.u32 15, %v761_v42  ;;  %v763_v38 = vadd.s32 224, %v6226_v61  ;;  %v5752_v42 = vld [vmem:[#allocation7 + $0x1a0] sm:$0xff]  }
  0x98   : > { %5056 = vmatpush3.bf16.msra.mxu0 %v5708_v33  ;;  %4944 = vmatpush3.bf16.msra.mxu1 %v5718_v44  ;;  %v5748_v44 = vld [vmem:[#allocation7 + $0x1a8] sm:$0xff]  }
  0x99   : > { %5057 = vmatprep.subr.bf16.mxu0 %v5711_v35  ;;  %4945 = vmatprep.subr.bf16.mxu1 %v5721_v46  ;;  %v6290_v35 = vadd.s32 48, %v6226_v61  ;;  %v1274_v46 = vand.u32 15, %v6273_v28  ;;  %vm6367_vm9 = vcmp.eq.s32.totalorder %v1337_v1, 0 }
  0x9a   : > { %5458 = vmatmul.mubr.bf16.gmra.mxu0 %v352_v20  ;;  %5474 = vmatmul.mubr.bf16.gmra.mxu1 %v368_v21  ;;  %v1169_v20 = vand.u32 15, %v6239_v7  ;;  %v6333_v7 = vadd.s32 80, %v6226_v61 }
  0x9b   : > { %5461 = vmatprep.mubr.bf16.mxu0 %v354_v22  ;;  %5477 = vmatprep.mubr.bf16.mxu1 %v370_v23  ;;  %v758_v23 = vadd.s32 184, %v6226_v61  ;;  %vm6426_vm14 = vcmp.eq.s32.totalorder %v1274_v46, 15 }
  0x9c   : > { %5058 = vmatpush3.bf16.msra.mxu0 %v5712_v37  ;;  %4946 = vmatpush3.bf16.msra.mxu1 %v5722_v48  ;;  %v1309_v37 = vand.u32 15, %v757_v18  ;;  %7920 = vst [vmem:[#allocation16_spill] sm:$0xff] %v6333_v7  ;;  %vm6344_vm7 = vcmp.eq.s32.totalorder %v1169_v20, 0 }
  0x9d   : > { %5059 = vmatprep.subr.bf16.mxu0 %v5715_v39  ;;  %4947 = vmatprep.subr.bf16.mxu1 %v5725_v50 }
  0x9e   : > { %vm6312_vm3 = vcmp.eq.s32.totalorder %v1309_v37, 0  ;;  %v765_v37 = vadd.s32 240, %v6226_v61 }
  0xa0   : > { %5060 = vmatpush3.bf16.msra.mxu0 %v5716_v41  ;;  %4948 = vmatpush3.bf16.msra.mxu1 %v5726_v52  ;;  %v1316_v41 = vand.u32 15, %v758_v23  ;;  %v1162_v52 = vand.u32 15, %v6281_v31  ;;  %v760_v31 = vadd.s32 200, %v6226_v61 }
  0xa1   : > { %5061 = vmatprep.subr.bf16.mxu0 %v5719_v43  ;;  %4949 = vmatprep.subr.bf16.mxu1 %v5727_v53  ;;  %v5747_v43 = vld [vmem:[#allocation7 + $0x1e8] sm:$0xff]   ;;  %v6307_v53 = vadd.s32 56, %v6226_v61 }
  0xa2   : > { %5462 = vmatmul.mubr.bf16.gmra.mxu0 %v356_v24  ;;  %5478 = vmatmul.mubr.bf16.gmra.mxu1 %v372_v25  ;;  %v1155_v24 = vand.u32 15, %v6226_v61  ;;  %vm6325_vm5 = vcmp.eq.s32.totalorder %v1316_v41, 15  ;;  %v5751_v41 = vld [vmem:[#allocation7 + $0x1e0] sm:$0xff]   ;;  %vm6404_vm13 = vcmp.eq.s32.totalorder %v1162_v52, 15 }
  0xa3   : > { %2661 = vmatprep.mubr.bf16.mxu0 %v7869_v51  ;;  %v7919_v0 = vsel %vm6325_vm5, 4294967295, %v7918_v0 }
  0xa4   : > { %5062 = vmatpush3.bf16.msra.mxu0 %v5720_v45  ;;  %4950 = vmatpush3.bf16.msra.mxu1 %v5728_v54  ;;  %v1176_v45 = vand.u32 15, %v6268_v26  ;;  %v1302_v54 = vand.u32 15, %v756_v32  ;;  %vm6355_vm8 = vcmp.eq.s32.totalorder %v1155_v24, 0 }
  0xa5   : > { %5063 = vmatprep.subr.bf16.mxu0 %v5723_v47  ;;  %4951 = vmatprep.subr.bf16.mxu1 %v5729_v55 }
  0xa6   : > { %vm6337_vm6 = vcmp.eq.s32.totalorder %v1302_v54, 15  ;;  %vm6386_vm11 = vcmp.eq.s32.totalorder %v1176_v45, 15  ;;  %v1365_v45 = vand.u32 15, %v765_v37  ;;  %v6420_v37 = vadd.s32 104, %v6226_v61  ;;  %v5762_v54 = vld [vmem:[#allocation7 + $0x180] sm:$0xff]  }
  0xa8   : > { %5064 = vmatpush3.bf16.msra.mxu0 %v5724_v49  ;;  %4952 = vmatpush3.bf16.msra.mxu1 %v5730_v56  ;;  %v759_v49 = vadd.s32 192, %v6226_v61  ;;  %v1197_v56 = vand.u32 15, %v6290_v35  ;;  %7937 = vst [vmem:[#allocation17_spill] sm:$0xff] %v6420_v37  ;;  %vm6454_vm5 = vcmp.eq.s32.totalorder %v1365_v45, 0 }
  0xa9   : > { %5161 = vmatprep.subr.bf16.mxu1 %v5731_v57  ;;  %5273 = vmatprep.subr.bf16.mxu0 %v5739_v58 }
  0xab   : > { %2662 = vmatmul.mubr.bf16.vlgmr.msra.gmra.mxu0 %v7869_v51  ;;  %v1351_v51 = vand.u32 15, %v763_v38 }
  0xac   : > { %5274 = vmatpush3.bf16.msra.mxu0 %v5740_v59  ;;  %v6317_v59 = vadd.s32 40, %v6226_v61 }
  0xad   : > { %5275 = vmatprep.subr.bf16.mxu0 %v5743_v62  ;;  %v1183_v62 = vand.u32 15, %v6295_v40 }
  0xb0   : > { %5276 = vmatpush3.bf16.msra.mxu0 %v5744_v63  ;;  %v7916_v63 = vmov 0 }
  0xb1   : > { %5277 = vmatprep.subr.bf16.mxu0 %v5747_v43  ;;  %v7917_v63 = vsel %vm6321_vm4, 4294967295, %v7916_v63  ;;  %vm6465_vm4 = vcmp.eq.s32.totalorder %v1351_v51, 0 }
  0xb4   : > { %5278 = vmatpush3.bf16.msra.mxu0 %v5748_v44  ;;  %v1330_v44 = vand.u32 15, %v760_v31  ;;  %v764_v31 = vadd.s32 232, %v6226_v61 }
  0xb5   : > { %5279 = vmatprep.subr.bf16.mxu0 %v5751_v41 }
  0xb6   : > { %vm6435_vm15 = vcmp.eq.s32.totalorder %v1330_v44, 15  ;;  %v1358_v21 = vand.u32 15, %v764_v31 }
  0xb8   : > { %5280 = vmatpush3.bf16.msra.mxu0 %v5752_v42 }
 0x14a   : > { %v6236_v5 = vpop.f32.mrf.mxu0  ;;  %v5467_v6 = vpop.f32.mrf.mxu1 }
 0x14b   : > { %v648_v8 = vadd.f32 %v5467_v6, %v6233_v2 }
 0x14c   : > { %v6246_v11 = vpop.f32.mrf.mxu0  ;;  %v639_v12 = vpop.f32.mrf.mxu1 }
 0x14d   : > { %v6248_v13 = vmax.f32 %v648_v8, 0.0  ;;  %v640_v14 = vadd.f32 %v6233_v2, %v639_v12  ;;  %v1323_v8 = vand.u32 15, %v759_v49  ;;  %v584_v49 = vadd.f32 %v6236_v5, %v6233_v2 }
 0x14e   : > { %v6251_v16 = vpop.f32.mrf.mxu0  ;;  %v5468_v17 = vpop.f32.mrf.mxu1  ;;  %v576_v1 = vadd.f32 %v6233_v2, %v6246_v11  ;;  %v6402_v11 = vadd.s32 72, %v6226_v61 }
 0x14f   : > { %v6265_v25 = vmax.f32 %v640_v14, 0.0  ;;  %v651_v29 = vadd.f32 %v5468_v17, %v6233_v2  ;;  %v7921_v14 = vmov 0  ;;  %vm6371_vm10 = vcmp.eq.s32.totalorder %v1323_v8, 0 }
 0x150   : > { %v6270_v27 = vpop.f32.mrf.mxu1  ;;  %v6287_v34 = vpop.f32.mrf.mxu0  ;;  %v7922_v14 = vsel %vm6337_vm6, 4294967295, %v7921_v14  ;;  %v6412_v42 = vmax.f32 %v584_v49, 0.0  ;;  %v6422_v38 = vmax.f32 %v576_v1, 0.0  ;;  %vm6447_vm6 = vcmp.eq.s32.totalorder %v1197_v56, 0 }
 0x151   : > { %7911 = vst [vmem:[#allocation15_spill] sm:$0xff] %v6265_v25  ;;  %v6292_v39 = vmax.f32 %v651_v29, 0.0  ;;  %v1344_v29 = vand.u32 15, %v762_v60  ;;  %v6382_v60 = vadd.s32 88, %v6226_v61  ;;  %v579_v1 = vadd.f32 %v6233_v2, %v6287_v34 }
 0x152   : > { %v5471_v36 = vpop.f32.mrf.mxu1  ;;  %v6309_v55 = vpop.f32.mrf.mxu0  ;;  %v1825_v35 = vsel %vm6344_vm7, 0.0, %v6412_v42  ;;  %v643_v33 = vadd.f32 %v6233_v2, %v6270_v27  ;;  %v1823_v17 = vsel %vm6355_vm8, 0.0, %v6422_v38  ;;  %vm6477_vm7 = vcmp.eq.s32.totalorder %v1183_v62, 0 }
 0x153   : > { %v664_v47 = vadd.f32 %v5471_v36, %v6233_v2  ;;  %vm6395_vm12 = vcmp.eq.s32.totalorder %v1344_v29, 15  ;;  %v6493_v40 = vrot.slane %v1825_v35, 1  ;;  %v7950_v62 = vsel %vm6242_vm0, 0.0, %v6248_v13 }
 0x154   : > { %v655_v48 = vpop.f32.mrf.mxu1  ;;  %v6351_v19 = vpop.f32.mrf.mxu0  ;;  %vm6517_vm0 = vcmp.eq.s32.totalorder %v1358_v21, 15  ;;  %v6521_v35 = vrot.slane %v1823_v17, 1  ;;  %v7961_v21 = vand.u32 15, %v6317_v59 }
 0x155   : > { %v6329_v3 = vmax.f32 %v664_v47, 0.0  ;;  %v656_v4 = vadd.f32 %v6233_v2, %v655_v48  ;;  %v592_v10 = vadd.f32 %v6233_v2, %v6351_v19 }
 0x156   : > { %v5472_v58 = vpop.f32.mrf.mxu1 }
 0x157   : > { %v667_v12 = vadd.f32 %v5472_v58, %v6233_v2  ;;  %v6359_v20 = vmax.f32 %v656_v4, 0.0  ;;  %v766_v58 = vadd.s32 248, %v6226_v61  ;;  %v7956_v4 = vsel %vm6259_vm1, 0.0, %v6265_v25 }
 0x158   : > { %v658_v6 = vpop.f32.mrf.mxu1  ;;  %vm1887_vm1 = vcmp.lt.s32.totalorder %v6226_v61, 1  ;;  %v7973_v31 = vsel %vm6312_vm3, 0.0, %v6329_v3  ;;  %vm7984_vm3 = vnez %v7917_v63 }
 0x159   : > { %v6361_v36 = vmax.f32 %v667_v12, 0.0  ;;  %v659_v43 = vadd.f32 %v6233_v2, %v658_v6  ;;  %v6390_v6 = vpop.f32.mrf.mxu0  ;;  %v7933_v12 = vmov 0 }
 0x15a   : > { %v5475_v26 = vpop.f32.mrf.mxu1  ;;  %v7934_v12 = vsel %vm6395_vm12, 4294967295, %v7933_v12  ;;  %vm6537_vm12 = vcmp.eq.s32.totalorder %v7961_v21, 15  ;;  %v5761_v21 = vld [vmem:[#allocation7 + $0x1c0] sm:$0xff]  }
 0x15b   : > { %v6399_v41 = vmax.f32 %v659_v43, 0.0  ;;  %v680_v5 = vadd.f32 %v5475_v26, %v6233_v2  ;;  %v587_v43 = vadd.f32 %v6251_v16, %v6233_v2  ;;  %v5753_v26 = vld [vmem:[#allocation7 + $0x1d8] sm:$0xff]   ;;  %v6430_v49 = vpop.f32.mrf.mxu0 }
 0x15c   : > { %v671_v24 = vpop.f32.mrf.mxu1  ;;  %5281 = vmatprep.subr.bf16.mxu0 %v5753_v26  ;;  %v5756_v26 = vld [vmem:[#allocation7 + $0x190] sm:$0xff]  }
 0x15d   : > { %v672_v29 = vadd.f32 %v6233_v2, %v671_v24  ;;  %v6432_v50 = vmax.f32 %v680_v5, 0.0  ;;  %v5755_v5 = vld [vmem:[#allocation7 + $0x1d0] sm:$0xff]   ;;  %5282 = vmatpush3.bf16.msra.mxu0 %v5754_v9  ;;  %v6461_v56 = vmax.f32 %v587_v43, 0.0  ;;  %v6481_v51 = vpop.f32.mrf.mxu0  ;;  %v6486_v43 = vmax.f32 %v579_v1, 0.0 }
 0x15e   : > { %v5476_v8 = vpop.f32.mrf.mxu1  ;;  %5283 = vmatprep.subr.bf16.mxu0 %v5755_v5  ;;  %v600_v5 = vadd.f32 %v6309_v55, %v6233_v2  ;;  %v6499_v9 = vrot.slane %v7950_v62, 1  ;;  %v7982_v62 = vrot.slane %v6412_v42, 7 }
 0x15f   : > { %v6441_v28 = vmax.f32 %v672_v29, 0.0  ;;  %v683_v46 = vadd.f32 %v5476_v8, %v6233_v2  ;;  %v1372_v8 = vand.u32 15, %v766_v58  ;;  %v1698_v55 = vsel %vm6386_vm11, 0.0, %v6461_v56  ;;  %v607_v17 = vpop.f32.mrf.mxu0  ;;  %v5760_v58 = vld [vmem:[#allocation7 + $0x188] sm:$0xff]  }
 0x160   : > { %v674_v18 = vpop.f32.mrf.mxu1  ;;  %v6552_v25 = vrot.slane %v1698_v55, 7  ;;  %v595_v55 = vadd.f32 %v6233_v2, %v6430_v49  ;;  %v7991_v49 = vmov 0.0|0.0   ;;  %v8001_v52 = vrot.slane %v6461_v56, 1 }
 0x161   : > { %v6490_v45 = vmax.f32 %v683_v46, 0.0  ;;  %v675_v32 = vadd.f32 %v6233_v2, %v674_v18  ;;  %vm6503_vm8 = vcmp.eq.s32.totalorder %v1372_v8, 15  ;;  %5284 = vmatpush3.bf16.msra.mxu0 %v5756_v26  ;;  %v6510_v18 = vmax.f32 %v643_v33, 0.0  ;;  %v5758_v8 = vld [vmem:[#allocation7 + $0x1c8] sm:$0xff]  }
 0x162   : > { %v5479_v23 = vpop.f32.mrf.mxu1  ;;  %v6527_v33 = vrot.slane %v7956_v4, 1  ;;  %v7958_v26 = vand.u32 15, %v6307_v53  ;;  %v1696_v53 = vsel %vm6404_vm13, 0.0, %v6486_v43  ;;  %5285 = vmatprep.subr.bf16.mxu0 %v5758_v8  ;;  %v5460_v4 = vpop.f32.mrf.mxu0 }
 0x163   : > { %v696_v1 = vadd.f32 %v5479_v23, %v6233_v2  ;;  %v7953_v23 = vmov 0  ;;  %v6541_v46 = vmax.f32 %v675_v32, 0.0  ;;  %v1856_v24 = vrot.slane %v1696_v53, 7 }
 0x164   : > { %v687_v29 = vpop.f32.mrf.mxu1  ;;  %v7954_v23 = vsel %vm6517_vm0, 4294967295, %v7953_v23  ;;  %7957 = vst [vmem:[#allocation19_spill] sm:$0xff] %v6527_v33  ;;  %vm6531_vm11 = vcmp.eq.s32.totalorder %v7958_v26, 15  ;;  %v6549_v26 = vmax.f32 %v600_v5, 0.0  ;;  %v6563_v5 = vmax.f32 %v592_v10, 0.0  ;;  %v610_v44 = vpop.f32.mrf.mxu0 }
 0x165   : > { %7955 = vst [vmem:[#allocation18_spill] sm:$0xff] %v7954_v23  ;;  %v6543_v22 = vmax.f32 %v696_v1, 0.0  ;;  %v688_v59 = vadd.f32 %v6233_v2, %v687_v29  ;;  %v603_v1 = vadd.f32 %v6390_v6, %v6233_v2  ;;  %5286 = vmatpush3.bf16.msra.mxu0 %v5760_v58  ;;  %v1712_v29 = vsel %vm6426_vm14, 0.0, %v6510_v18  ;;  %v5732_v23 = vld [vmem:[#allocation7 + $0x138] sm:$0xff]  }
 0x166   : > { %v5480_v27 = vpop.f32.mrf.mxu1  ;;  %5287 = vmatprep.subr.bf16.mxu0 %v5761_v21  ;;  %v7964_v58 = vsel %vm6276_vm2, 0.0, %v6292_v39  ;;  %v7965_v32 = vand.u32 15, %v6342_v15  ;;  %v1829_v30 = vsel %vm6447_vm6, 0.0, %v6549_v26  ;;  %v6592_v53 = vpack.c.bf16 %v6486_v43, %v6422_v38 }
 0x167   : > { %v6575_v8 = vrot.slane %v7964_v58, 7  ;;  %v6584_v6 = vmax.f32 %v688_v59, 0.0  ;;  %v699_v21 = vadd.f32 %v5480_v27, %v6233_v2  ;;  %v6595_v15 = vrot.slane %v1712_v29, 7 }
 0x168   : > { %v690_v7 = vpop.f32.mrf.mxu1  ;;  %vm6580_vm13 = vcmp.eq.s32.totalorder %v7965_v32, 0  ;;  %7968 = vst [vmem:[#allocation20_spill] sm:$0xff] %v6592_v53  ;;  %v6598_v10 = vmax.f32 %v603_v1, 0.0  ;;  %v7969_v59 = vand.u32 15, %v6402_v11  ;;  %v6612_v27 = vmax.f32 %v595_v55, 0.0  ;;  %2669 = vmatprep.mubr.bf16.mxu0 %v6592_v53  ;;  %v6659_v11 = vpop.f32.mrf.mxu0 }
 0x169   : > { %v691_v58 = vadd.f32 %v6233_v2, %v690_v7  ;;  %5288 = vmatpush3.bf16.msra.mxu0 %v5762_v54  ;;  %v1827_v7 = vsel %vm6477_vm7, 0.0, %v6563_v5  ;;  %v608_v1 = vadd.f32 %v6233_v2, %v607_v17  ;;  %v6615_v29 = vmax.f32 %v699_v21, 0.0  ;;  %7979 = vst [vmem:[#allocation24_spill] sm:$0xff] %v6659_v11 }
 0x16a   : > { %vm6602_vm2 = vcmp.eq.s32.totalorder %v7969_v59, 15  ;;  %v6619_v59 = vrot.slane %v1829_v30, 1  ;;  %v6628_v55 = vrot.slane %v7973_v31, 1  ;;  %v1859_v17 = vrot.slane %v6563_v5, 7 }
 0x16b   : > { %v6622_v54 = vmax.f32 %v691_v58, 0.0  ;;  %v7975_v21 = vand.u32 15, %v6382_v60  ;;  %v611_v30 = vadd.f32 %v6233_v2, %v610_v44  ;;  %v1726_v58 = vsel %vm6503_vm8, 0.0, %v6615_v29 }
 0x16c   : > { %7974 = vst [vmem:[#allocation22_spill] sm:$0xff] %v6628_v55  ;;  %vm2241_vm14 = vcmp.lt.s32.totalorder %v6226_v61, 7  ;;  %v6642_v57 = vrot.slane %v1827_v7, 1  ;;  %v6645_v32 = vrot.slane %v1726_v58, 7  ;;  %v1702_v44 = vsel %vm6531_vm11, 0.0, %v6598_v10 }
 0x16d   : > { %7972 = vst [vmem:[#allocation21_spill] sm:$0xff] %v6622_v54  ;;  %vm6633_vm6 = vcmp.eq.s32.totalorder %v7975_v21, 15  ;;  %v1700_v37 = vsel %vm6537_vm12, 0.0, %v6612_v27  ;;  %v6656_v21 = vmax.f32 %v608_v1, 0.0  ;;  %v619_v7 = vadd.f32 %v5460_v4, %v6233_v2 }
 0x16e   : > { %7978 = vst [vmem:[#allocation23_spill] sm:$0xff] %v6645_v32  ;;  %v7980_v58 = vrot.slane %v6422_v38, 7  ;;  %v1916_v1 = vsel %vm1887_vm1, %v7982_v62, %v6552_v25  ;;  %v7983_v4 = vmov %v7982_v62  ;;  %v6689_v55 = vrot.slane %v1702_v44, 7 }
 0x16f   : > { %v1917_v11 = vsel %vm1887_vm1, %v1856_v24, %v7983_v4  ;;  %vm7986_vm12 = vnez %v7919_v0  ;;  %v6700_v4 = vpack.c.bf16 %v6461_v56, %v6412_v42  ;;  %v2214_v0 = vrot.slane %v6612_v27, 1 }
 0x170   : > { %v1918_v31 = vsel %vm1887_vm1, %v7980_v58, %v1856_v24  ;;  %v7981_v60 = vmov %v7980_v58  ;;  %v7985_v58 = vsel %vm7984_vm3, 0.0, %v6359_v20  ;;  %v7987_v24 = vsel %vm7986_vm12, 0.0, %v6361_v36 }
 0x171   : > { %v1919_v19 = vsel %vm1887_vm1, %v6645_v32, %v7981_v60  ;;  %v6683_v38 = vrot.slane %v7985_v58, 1  ;;  %v616_v60 = vadd.f32 %v6481_v51, %v6233_v2  ;;  %v6687_v32 = vmax.f32 %v611_v30, 0.0  ;;  %7988 = vst [vmem:[#allocation25_spill] sm:$0xff] %v6700_v4  ;;  %v5733_v58 = vld [vmem:[#allocation7 + $0x170] sm:$0xff]  }
 0x172   : > { %v2017_v54 = vpack.c.bf16 %v1918_v31, %v1919_v19  ;;  %v6696_v63 = vrot.slane %v7987_v24, 7  ;;  %v1860_v30 = vrot.slane %v1700_v37, 7  ;;  %v1831_v31 = vsel %vm6580_vm13, 0.0, %v6656_v21  ;;  %v6718_v37 = vpop.f32.mrf.mxu0 }
 0x173   : > { %v6706_v44 = vpack.c.bf16 %v1916_v1, %v1917_v11  ;;  %vm7989_vm7 = vnez %v7922_v14  ;;  %v6716_v62 = vmax.f32 %v619_v7, 0.0  ;;  %v6722_v11 = vmax.f32 %v616_v60, 0.0 }
 0x174   : > { %2500 = vmatprep.mubr.bf16.mxu1 %v2017_v54  ;;  %2670 = vmatmul.mubr.bf16.gmra.mxu0 %v2017_v54  ;;  %v7990_v19 = vsel %vm7989_vm7, 0.0, %v6399_v41  ;;  %v7992_v14 = vsel %vm6367_vm9, 0.0, %v6432_v50  ;;  %v1704_v7 = vsel %vm6602_vm2, 0.0, %v6687_v32  ;;  %v1863_v51 = vrot.slane %v6656_v21, 7  ;;  %v6772_v24 = vpop.f32.mrf.mxu0 }
 0x175   : > { %v6713_v42 = vrot.slane %v7990_v19, 7  ;;  %2501 = vmatmul.mubr.bf16.vlgmr.msra.gmra.mxu1 %v7991_v49  ;;  %2677 = vmatprep.mubr.bf16.mxu0 %v6700_v4  ;;  %v6729_v1 = vrot.slane %v7992_v14, 1  ;;  %v5734_v19 = vld [vmem:[#allocation7 + $0x130] sm:$0xff]   ;;  %v6736_v60 = vrot.slane %v1831_v31, 1  ;;  %v7994_v54 = vrot.slane %v6486_v43, 1  ;;  %7999 = vst [vmem:[#allocation27_spill] sm:$0xff] %v6772_v24 }
 0x176   : > { %5162 = vmatpush3.bf16.msra.mxu1 %v5732_v23  ;;  %2508 = vmatprep.mubr.bf16.mxu1 %v6706_v44  ;;  %v5735_v23 = vld [vmem:[#allocation7 + $0x168] sm:$0xff]   ;;  %v7996_v31 = vsel %vm6371_vm10, 0.0, %v6441_v28  ;;  %v1914_v4 = vsel %vm1887_vm1, %v1859_v17, %v1860_v30  ;;  %v1915_v43 = vsel %vm1887_vm1, %v6552_v25, %v1859_v17  ;;  %vm7997_vm9 = vnez %v7934_v12  ;;  %v626_v24 = vpop.f32.mrf.mxu0 }
 0x177   : > { %7993 = vst [vmem:[#allocation26_spill] sm:$0xff] %v6736_v60  ;;  %v2271_v47 = vsel %vm2241_vm14, %v7994_v54, %v6493_v40  ;;  %v7995_v14 = vmov %v7994_v54  ;;  %5163 = vmatprep.subr.bf16.mxu1 %v5733_v58  ;;  %v6753_v49 = vrot.slane %v7996_v31, 1  ;;  %v7998_v54 = vsel %vm7997_vm9, 0.0, %v6490_v45 }
 0x178   : > { %v2272_v33 = vsel %vm2241_vm14, %v6521_v35, %v7995_v14  ;;  %v6767_v48 = vrot.slane %v7998_v54, 7  ;;  %v6770_v31 = vrot.slane %v1704_v7, 7  ;;  %v8000_v25 = vsel %vm6435_vm15, 0.0, %v6541_v46  ;;  %v5736_v54 = vld [vmem:[#allocation7 + $0x128] sm:$0xff]  }
 0x179   : > { %v6778_v17 = vrot.slane %v8000_v25, 7  ;;  %v6782_v60 = vpack.c.bf16 %v2271_v47, %v2272_v33  ;;  %v6786_v7 = vpack.c.bf16 %v6612_v27, %v6563_v5  ;;  %v6788_v14 = vpack.c.bf16 %v1914_v4, %v1915_v43  ;;  %v5737_v47 = vld [vmem:[#allocation7 + $0x160] sm:$0xff]  }
 0x17a   : > { %5164 = vmatpush3.bf16.msra.mxu1 %v5734_v19  ;;  %v2269_v25 = vsel %vm2241_vm14, %v8001_v52, %v6642_v57  ;;  %v8002_v58 = vmov %v8001_v52  ;;  %v8003_v5 = vrot.slane %v6549_v26, 7  ;;  %v2267_v56 = vsel %vm2241_vm14, %v2214_v0, %v6619_v59 }
 0x17b   : > { %v2270_v19 = vsel %vm2241_vm14, %v6493_v40, %v8002_v58  ;;  %5165 = vmatprep.subr.bf16.mxu1 %v5735_v23  ;;  %v2268_v40 = vsel %vm2241_vm14, %v6642_v57, %v2214_v0  ;;  %v8005_v23 = vsel %vm6454_vm5, 0.0, %v6543_v22  ;;  %v1911_v57 = vsel %vm1887_vm1, %v6689_v55, %v1863_v51 }
 0x17c   : > { %2678 = vmatmul.mubr.bf16.gmra.mxu0 %v6706_v44  ;;  %v1912_v27 = vsel %vm1887_vm1, %v8003_v5, %v6689_v55  ;;  %v8004_v4 = vmov %v8003_v5  ;;  %v6820_v43 = vrot.slane %v8005_v23, 1  ;;  %v8006_v34 = vsel %vm6465_vm4, 0.0, %v6584_v6  ;;  %v5738_v23 = vld [vmem:[#allocation7 + $0x120] sm:$0xff]  }
 0x17d   : > { %v1913_v33 = vsel %vm1887_vm1, %v1860_v30, %v8004_v4  ;;  %2509 = vmatmul.mubr.bf16.gmra.mxu1 %v6782_v60  ;;  %2685 = vmatprep.mubr.bf16.mxu0 %v6786_v7  ;;  %v1910_v30 = vsel %vm1887_vm1, %v1863_v51, %v6770_v31  ;;  %v6835_v0 = vrot.slane %v8006_v34, 1  ;;  %v6840_v5 = vadd.f32 %v6233_v2, %v626_v24  ;;  %v5741_v34 = vld [vmem:[#allocation7 + $0x158] sm:$0xff]  }
 0x17e   : > { %2516 = vmatprep.mubr.bf16.mxu1 %v6788_v14  ;;  %v6844_v4 = vpack.c.bf16 %v6598_v10, %v6549_v26  ;;  %5166 = vmatpush3.bf16.msra.mxu1 %v5736_v54  ;;  %v6846_v55 = vpack.c.bf16 %v2269_v25, %v2270_v19  ;;  %v6848_v16 = vpack.c.bf16 %v1912_v27, %v1913_v33  ;;  %v8008_v54 = vrot.slane %v6248_v13, 7 }
 0x17f   : > { %v6850_v51 = vpack.c.bf16 %v2267_v56, %v2268_v40  ;;  %5167 = vmatprep.subr.bf16.mxu1 %v5737_v47  ;;  %v6854_v52 = vpack.c.bf16 %v6292_v39, %v6248_v13  ;;  %v6858_v24 = vpack.c.bf16 %v6687_v32, %v6656_v21  ;;  %v6860_v26 = vpack.c.bf16 %v1910_v30, %v1911_v57  ;;  %v8012_v40 = vld [vmem:[#allocation19_spill] sm:$0xff]  ;;  %v5742_v57 = vld [vmem:[#allocation7 + $0x118] sm:$0xff]  }
 0x180   : > { %8007 = vst [vmem:[#allocation28_spill] sm:$0xff] %v6846_v55  ;;  %v1900_v25 = vsel %vm1887_vm1, %v8008_v54, %v6575_v8  ;;  %v8009_v19 = vmov %v8008_v54  ;;  %v8010_v21 = vrot.slane %v6510_v18, 1  ;;  %v6886_v13 = vpack.c.bf16 %v6399_v41, %v6359_v20 }
 0x181   : > { %v1901_v47 = vsel %vm1887_vm1, %v6595_v15, %v8009_v19  ;;  %v747_v53 = vadd.s32 96, %v6226_v61 }
 0x182   : > { %v6872_v27 = vpack.c.bf16 %v1900_v25, %v1901_v47  ;;  %v2255_v33 = vsel %vm2241_vm14, %v8010_v21, %v6499_v9  ;;  %v8011_v56 = vmov %v8010_v21  ;;  %5168 = vmatpush3.bf16.msra.mxu1 %v5738_v23  ;;  %v8013_v25 = vrot.slane %v6359_v20, 7 }
 0x183   : > { %v2256_v30 = vsel %vm2241_vm14, %v8012_v40, %v8011_v56  ;;  %v8015_v56 = vrot.slane %v6292_v39, 1  ;;  %5169 = vmatprep.subr.bf16.mxu1 %v5741_v34 }
 0x184   : > { %v6888_v54 = vpack.c.bf16 %v2255_v33, %v2256_v30  ;;  %v1898_v19 = vsel %vm1887_vm1, %v8013_v25, %v6713_v42  ;;  %v8014_v47 = vmov %v8013_v25  ;;  %v5745_v30 = vld [vmem:[#allocation7 + $0x150] sm:$0xff]   ;;  %v6914_v25 = vpack.c.bf16 %v6361_v36, %v6329_v3  ;;  %2686 = vmatmul.mubr.bf16.gmra.mxu0 %v6788_v14 }
 0x185   : > { %v1899_v21 = vsel %vm1887_vm1, %v6575_v8, %v8014_v47  ;;  %v2253_v23 = vsel %vm2241_vm14, %v8015_v56, %v6683_v38  ;;  %v8016_v12 = vmov %v8015_v56  ;;  %v8017_v8 = vrot.slane %v6329_v3, 7  ;;  %2517 = vmatmul.mubr.bf16.gmra.mxu1 %v6846_v55  ;;  %2693 = vmatprep.mubr.bf16.mxu0 %v6844_v4 }
 0x186   : > { %v6905_v33 = vpack.c.bf16 %v1898_v19, %v1899_v21  ;;  %v2254_v20 = vsel %vm2241_vm14, %v6499_v9, %v8016_v12  ;;  %v8019_v12 = vld [vmem:[#allocation22_spill] sm:$0xff]  ;;  %v8020_v19 = vrot.slane %v6399_v41, 1  ;;  %v6951_v41 = vpack.c.bf16 %v6541_v46, %v6441_v28  ;;  %2524 = vmatprep.mubr.bf16.mxu1 %v6848_v16  ;;  %5170 = vmatpush3.bf16.msra.mxu1 %v5742_v57 }
 0x187   : > { %v1896_v47 = vsel %vm1887_vm1, %v8017_v8, %v6696_v63  ;;  %v6922_v34 = vpack.c.bf16 %v2253_v23, %v2254_v20  ;;  %v8018_v39 = vmov %v8017_v8  ;;  %v8023_v20 = vld [vmem:[#allocation21_spill] sm:$0xff]  ;;  %5171 = vmatprep.subr.bf16.mxu1 %v5745_v30 }
 0x188   : > { %v1897_v9 = vsel %vm1887_vm1, %v6713_v42, %v8018_v39  ;;  %v2251_v21 = vsel %vm2241_vm14, %v8020_v19, %v8019_v12  ;;  %v8021_v56 = vmov %v8020_v19  ;;  %v8024_v3 = vsel %vm6517_vm0, 0.0, %v8023_v20 }
 0x189   : > { %v2252_v8 = vsel %vm2241_vm14, %v6683_v38, %v8021_v56  ;;  %v1884_v58 = vrot.slane %v8024_v3, 7  ;;  %v6945_v42 = vpack.c.bf16 %v1896_v47, %v1897_v9  ;;  %v2238_v19 = vrot.slane %v8023_v20, 1  ;;  %v5746_v38 = vld [vmem:[#allocation7 + $0x110] sm:$0xff]   ;;  %v5749_v3 = vld [vmem:[#allocation7 + $0x148] sm:$0xff]  }
 0x18a   : > { %v6947_v39 = vpack.c.bf16 %v2251_v21, %v2252_v8  ;;  %v8025_v56 = vrot.slane %v6441_v28, 7  ;;  %v8027_v21 = vrot.slane %v6361_v36, 1  ;;  %5172 = vmatpush3.bf16.msra.mxu1 %v5746_v38  ;;  %v8037_v38 = vld [vmem:[#allocation23_spill] sm:$0xff] }
 0x18b   : > { %5173 = vmatprep.subr.bf16.mxu1 %v5749_v3  ;;  %v2244_v3 = vsel %vm2241_vm14, %v6835_v0, %v2238_v19 }
 0x18c   : > { %v1894_v23 = vsel %vm1887_vm1, %v8025_v56, %v6778_v17  ;;  %v8026_v47 = vmov %v8025_v56  ;;  %v2249_v8 = vsel %vm2241_vm14, %v8027_v21, %v6753_v49  ;;  %v8028_v55 = vmov %v8027_v21  ;;  %2694 = vmatmul.mubr.bf16.gmra.mxu0 %v6848_v16 }
 0x18d   : > { %v1895_v9 = vsel %vm1887_vm1, %v6696_v63, %v8026_v47  ;;  %v2250_v28 = vsel %vm2241_vm14, %v8019_v12, %v8028_v55  ;;  %v6979_v56 = vpack.c.bf16 %v6490_v45, %v6432_v50  ;;  %v8029_v63 = vrot.slane %v6432_v50, 7  ;;  %2525 = vmatmul.mubr.bf16.gmra.mxu1 %v6850_v51  ;;  %2701 = vmatprep.mubr.bf16.mxu0 %v6858_v24 }
 0x18e   : > { %v6970_v57 = vpack.c.bf16 %v1894_v23, %v1895_v9  ;;  %v6986_v30 = vpack.c.bf16 %v2249_v8, %v2250_v28  ;;  %v8031_v55 = vrot.slane %v6541_v46, 1  ;;  %v7009_v50 = vpack.c.bf16 %v8023_v20, %v6584_v6  ;;  %2532 = vmatprep.mubr.bf16.mxu1 %v6860_v26 }
 0x18f   : > { %v1892_v47 = vsel %vm1887_vm1, %v8029_v63, %v6767_v48  ;;  %v8030_v23 = vmov %v8029_v63 }
 0x190   : > { %v1893_v36 = vsel %vm1887_vm1, %v6778_v17, %v8030_v23  ;;  %v2247_v12 = vsel %vm2241_vm14, %v8031_v55, %v6729_v1  ;;  %v8032_v9 = vmov %v8031_v55  ;;  %v8033_v17 = vrot.slane %v6584_v6, 7  ;;  %v5750_v23 = vld [vmem:[#allocation7 + $0x108] sm:$0xff]  }
 0x191   : > { %v2248_v21 = vsel %vm2241_vm14, %v6753_v49, %v8032_v9  ;;  %v7003_v8 = vpack.c.bf16 %v1892_v47, %v1893_v36  ;;  %v8035_v47 = vrot.slane %v6490_v45, 1  ;;  %v5757_v9 = vld [vmem:[#allocation7 + $0x140] sm:$0xff]   ;;  %5174 = vmatpush3.bf16.msra.mxu1 %v5750_v23 }
 0x192   : > { %v7005_v28 = vpack.c.bf16 %v2247_v12, %v2248_v21  ;;  %v1890_v63 = vsel %vm1887_vm1, %v8033_v17, %v1884_v58  ;;  %v8034_v46 = vmov %v8033_v17  ;;  %v8038_v12 = vrot.slane %v6543_v22, 7  ;;  %5175 = vmatprep.subr.bf16.mxu1 %v5757_v9 }
 0x193   : > { %v1891_v49 = vsel %vm1887_vm1, %v6767_v48, %v8034_v46  ;;  %v2245_v20 = vsel %vm2241_vm14, %v8035_v47, %v6835_v0  ;;  %v8036_v36 = vmov %v8035_v47  ;;  %v1865_v47 = vrot.slane %v6722_v11, 7 }
 0x194   : > { %v2246_v55 = vsel %vm2241_vm14, %v6729_v1, %v8036_v36  ;;  %v1888_v6 = vsel %vm1887_vm1, %v8038_v12, %v8037_v38  ;;  %v7035_v48 = vpack.c.bf16 %v1890_v63, %v1891_v49  ;;  %v8039_v17 = vmov %v8038_v12  ;;  %2702 = vmatmul.mubr.bf16.gmra.mxu0 %v6860_v26 }
 0x195   : > { %v7037_v21 = vpack.c.bf16 %v2245_v20, %v2246_v55  ;;  %v1889_v45 = vsel %vm1887_vm1, %v1884_v58, %v8039_v17  ;;  %v2243_v1 = vsel %vm2241_vm14, %v2238_v19, %v6820_v43  ;;  %v7054_v63 = vpack.c.bf16 %v6615_v29, %v6543_v22 }
 0x196   : > { %v7047_v46 = vpack.c.bf16 %v1888_v6, %v1889_v45  ;;  %v8040_v49 = vrot.slane %v6615_v29, 1  ;;  %v8041_v20 = vsel %vm6633_vm6, 0.0, %v6716_v62  ;;  %v7068_v0 = vpack.c.bf16 %v2243_v1, %v2244_v3  ;;  %v5759_v6 = vld [vmem:[#allocation7 + $0x100] sm:$0xff]   ;;  %v8047_v29 = vld [vmem:[#allocation17_spill] sm:$0xff]  ;;  %v7096_v3 = vld [vmem:[#allocation7 + $0x238] sm:$0xff]  }
 0x197   : > { %v1866_v36 = vrot.slane %v8041_v20, 7  ;;  %v7083_v12 = vmax.f32 %v6840_v5, 0.0  ;;  %v8048_v45 = vand.u32 15, %v8047_v29  ;;  %v8051_v5 = vld [vmem:[#allocation26_spill] sm:$0xff]  ;;  %v750_v9 = vadd.s32 120, %v6226_v61  ;;  %5176 = vmatpush3.bf16.msra.mxu1 %v5759_v6 }
 0x198   : > { %v2242_v58 = vsel %vm2241_vm14, %v6820_v43, %v8040_v49  ;;  %v8042_v22 = vmov %v8040_v49  ;;  %v8043_v43 = vld [vmem:[#allocation16_spill] sm:$0xff]  ;;  %v8052_v49 = vrot.slane %v6598_v10, 1  ;;  %v7124_v38 = vpack.c.bf16 %v6716_v62, %v6722_v11  ;;  %5481 = vmatprep.subr.bf16.mxu1 %v7096_v3 }
 0x199   : > { %v2273_v19 = vsel %vm2241_vm14, %v8042_v22, %v6521_v35  ;;  %v8044_v55 = vand.u32 15, %v8043_v43  ;;  %v624_v35 = vadd.f32 %v6233_v2, %v6718_v37  ;;  %vm7092_vm5 = vcmp.eq.s32.totalorder %v8048_v45, 15 }
 0x19a   : > { %v7086_v17 = vpack.c.bf16 %v2273_v19, %v2242_v58  ;;  %v2265_v23 = vsel %vm2241_vm14, %v8052_v49, %v8051_v5  ;;  %v8053_v58 = vmov %v8052_v49  ;;  %v1908_v22 = vsel %vm1887_vm1, %v1865_v47, %v1866_v36  ;;  %2709 = vmatprep.mubr.bf16.mxu0 %v7124_v38 }
 0x19b   : > { %vm7077_vm4 = vcmp.eq.s32.totalorder %v8044_v55, 0  ;;  %v2266_v37 = vsel %vm2241_vm14, %v6619_v59, %v8053_v58  ;;  %v1909_v19 = vsel %vm1887_vm1, %v6770_v31, %v1865_v47  ;;  %v1239_v43 = vand.u32 15, %v747_v53  ;;  %v8054_v31 = vld [vmem:[#allocation27_spill] sm:$0xff] }
 0x19c   : > { %v1833_v20 = vsel %vm7077_vm4, 0.0, %v6722_v11  ;;  %v1708_v10 = vsel %vm7092_vm5, 0.0, %v7083_v12  ;;  %v714_v59 = vmax.f32 %v624_v35, 0.0  ;;  %v7120_v55 = vpack.c.bf16 %v2265_v23, %v2266_v37 }
 0x19d   : > { %v2219_v29 = vrot.slane %v1833_v20, 1  ;;  %v2218_v45 = vrot.slane %v6687_v32, 1  ;;  %v635_v47 = vadd.f32 %v8054_v31, %v6233_v2  ;;  %v7131_v53 = vpack.c.bf16 %v1908_v22, %v1909_v19  ;;  %v8057_v32 = vld [vmem:[#allocation24_spill] sm:$0xff] }
 0x19e   : > { %v1867_v6 = vrot.slane %v714_v59, 7  ;;  %v1260_v35 = vand.u32 15, %v750_v9  ;;  %v1868_v1 = vrot.slane %v1708_v10, 7  ;;  %2533 = vmatmul.mubr.bf16.gmra.mxu1 %v7120_v55  ;;  %vm7135_vm10 = vcmp.eq.s32.totalorder %v1239_v43, 0 }
 0x19f   : > { %2540 = vmatprep.mubr.bf16.mxu1 %v7131_v53  ;;  %v632_v49 = vadd.f32 %v8057_v32, %v6233_v2  ;;  %v749_v23 = vadd.s32 112, %v6226_v61  ;;  %v717_v58 = vmax.f32 %v635_v47, 0.0  ;;  %v2263_v37 = vsel %vm2241_vm14, %v2218_v45, %v2219_v29  ;;  %2710 = vmatmul.mubr.bf16.gmra.mxu0 %v7131_v53  ;;  %v8061_v61 = vld [vmem:[#allocation25_spill] sm:$0xff] }
 0x1a0   : > { %v2264_v20 = vsel %vm2241_vm14, %v8051_v5, %v2218_v45  ;;  %v1835_v9 = vsel %vm7135_vm10, 0.0, %v714_v59  ;;  %vm7150_vm15 = vcmp.eq.s32.totalorder %v1260_v35, 15  ;;  %v1906_v2 = vsel %vm1887_vm1, %v1867_v6, %v1868_v1 }
 0x1a1   : > { %v1907_v19 = vsel %vm1887_vm1, %v1866_v36, %v1867_v6  ;;  %v716_v43 = vmax.f32 %v632_v49, 0.0  ;;  %v1253_v10 = vand.u32 15, %v749_v23  ;;  %v7158_v31 = vpack.c.bf16 %v2263_v37, %v2264_v20 }
 0x1a2   : > { %v7161_v47 = vpack.c.bf16 %v7083_v12, %v714_v59  ;;  %v2220_v5 = vrot.slane %v6716_v62, 1  ;;  %v2221_v45 = vrot.slane %v1835_v9, 1  ;;  %v1710_v35 = vsel %vm7150_vm15, 0.0, %v717_v58 }
 0x1a3   : > { %v7167_v11 = vpack.c.bf16 %v1906_v2, %v1907_v19  ;;  %v1869_v32 = vrot.slane %v716_v43, 7  ;;  %v1870_v36 = vrot.slane %v1710_v35, 7  ;;  %vm1741_vm8 = vcmp.eq.s32.totalorder %v1253_v10, 0  ;;  %v8060_v2 = vld [vmem:[#allocation15_spill] sm:$0xff]  ;;  %v5065_v10 = vpop.f32.mrf.mxu0 }
 0x1a4   : > { %2717 = vmatprep.mubr.bf16.mxu0 %v7161_v47  ;;  %v2261_v62 = vsel %vm2241_vm14, %v2220_v5, %v2221_v45  ;;  %v2262_v59 = vsel %vm2241_vm14, %v2219_v29, %v2220_v5  ;;  %v1837_v23 = vsel %vm1741_vm8, 0.0, %v716_v43  ;;  %v7182_v20 = vpack.c.bf16 %v717_v58, %v716_v43 }
 0x1a5   : > { %v1904_v6 = vsel %vm1887_vm1, %v1869_v32, %v1870_v36  ;;  %v1905_v49 = vsel %vm1887_vm1, %v1868_v1, %v1869_v32  ;;  %v7180_v37 = vpack.c.bf16 %v2261_v62, %v2262_v59  ;;  %v2222_v9 = vrot.slane %v7083_v12, 1 }
 0x1a6   : > { %2541 = vmatmul.mubr.bf16.gmra.mxu1 %v7158_v31  ;;  %v7186_v22 = vpack.c.bf16 %v1904_v6, %v1905_v49  ;;  %v2223_v29 = vrot.slane %v1837_v23, 1  ;;  %v1871_v1 = vrot.slane %v8060_v2, 7  ;;  %v7202_v35 = vpack.c.bf16 %v6510_v18, %v8060_v2  ;;  %v8062_v6 = vld [vmem:[#allocation20_spill] sm:$0xff] }
 0x1a7   : > { %2548 = vmatprep.mubr.bf16.mxu1 %v7167_v11  ;;  %2718 = vmatmul.mubr.bf16.gmra.mxu0 %v7167_v11  ;;  %v2260_v43 = vsel %vm2241_vm14, %v2221_v45, %v2222_v9  ;;  %v2224_v62 = vrot.slane %v717_v58, 1  ;;  %v5066_v45 = vpop.f32.mrf.mxu0  ;;  %v8063_v49 = vld [vmem:[#allocation28_spill] sm:$0xff] }
 0x1a8   : > { %2725 = vmatprep.mubr.bf16.mxu0 %v7182_v20  ;;  %v2259_v19 = vsel %vm2241_vm14, %v2222_v9, %v2223_v29  ;;  %v1903_v12 = vsel %vm1887_vm1, %v1870_v36, %v1871_v1  ;;  %v1902_v32 = vsel %vm1887_vm1, %v1871_v1, %v6595_v15  ;;  %v7213_v36 = vadd.f32 %v5066_v45, %v5065_v10  ;;  %v5765_v23 = vld [vmem:[#allocation7 + $0x228] sm:$0xff]  }
 0x1a9   : > { %v7198_v5 = vpack.c.bf16 %v2259_v19, %v2260_v43  ;;  %v7208_v59 = vpack.c.bf16 %v1902_v32, %v1903_v12  ;;  %v2257_v18 = vsel %vm2241_vm14, %v2224_v62, %v8012_v40  ;;  %v2258_v15 = vsel %vm2241_vm14, %v2223_v29, %v2224_v62  ;;  %v5764_v40 = vld [vmem:[#allocation7 + $0x230] sm:$0xff]  }
 0x1aa   : > { %v7220_v58 = vpack.c.bf16 %v2257_v18, %v2258_v15 }
 0x1ae   : > { %2549 = vmatmul.mubr.bf16.gmra.mxu1 %v7180_v37 }
 0x1af   : > { %2556 = vmatprep.mubr.bf16.mxu1 %v7186_v22  ;;  %2726 = vmatmul.mubr.bf16.gmra.mxu0 %v7186_v22 }
 0x1b0   : > { %2733 = vmatprep.mubr.bf16.mxu0 %v7202_v35 }
 0x1b6   : > { %2557 = vmatmul.mubr.bf16.gmra.mxu1 %v7198_v5 }
 0x1b7   : > { %2564 = vmatprep.mubr.bf16.mxu1 %v7208_v59  ;;  %2734 = vmatmul.mubr.bf16.gmra.mxu0 %v7208_v59 }
 0x1b8   : > { %2741 = vmatprep.mubr.bf16.mxu0 %v6854_v52 }
 0x1be   : > { %2565 = vmatmul.mubr.bf16.gmra.mxu1 %v7220_v58 }
 0x1bf   : > { %2572 = vmatprep.mubr.bf16.mxu1 %v6872_v27  ;;  %2742 = vmatmul.mubr.bf16.gmra.mxu0 %v6872_v27 }
 0x1c0   : > { %2749 = vmatprep.mubr.bf16.mxu0 %v6886_v13 }
 0x1c6   : > { %2573 = vmatmul.mubr.bf16.gmra.mxu1 %v6888_v54 }
 0x1c7   : > { %2580 = vmatprep.mubr.bf16.mxu1 %v6905_v33  ;;  %2750 = vmatmul.mubr.bf16.gmra.mxu0 %v6905_v33 }
 0x1c8   : > { %2757 = vmatprep.mubr.bf16.mxu0 %v6914_v25 }
 0x1ce   : > { %2581 = vmatmul.mubr.bf16.gmra.mxu1 %v6922_v34 }
 0x1cf   : > { %2588 = vmatprep.mubr.bf16.mxu1 %v6945_v42  ;;  %2758 = vmatmul.mubr.bf16.gmra.mxu0 %v6945_v42 }
 0x1d0   : > { %2765 = vmatprep.mubr.bf16.mxu0 %v6951_v41 }
 0x1d6   : > { %2589 = vmatmul.mubr.bf16.gmra.mxu1 %v6947_v39 }
 0x1d7   : > { %2596 = vmatprep.mubr.bf16.mxu1 %v6970_v57  ;;  %2766 = vmatmul.mubr.bf16.gmra.mxu0 %v6970_v57 }
 0x1d8   : > { %2773 = vmatprep.mubr.bf16.mxu0 %v6979_v56 }
 0x1de   : > { %2597 = vmatmul.mubr.bf16.gmra.mxu1 %v6986_v30 }
 0x1df   : > { %2604 = vmatprep.mubr.bf16.mxu1 %v7003_v8  ;;  %2774 = vmatmul.mubr.bf16.gmra.mxu0 %v7003_v8 }
 0x1e0   : > { %2781 = vmatprep.mubr.bf16.mxu0 %v7009_v50 }
 0x1e6   : > { %2605 = vmatmul.mubr.bf16.gmra.mxu1 %v7005_v28 }
 0x1e7   : > { %2612 = vmatprep.mubr.bf16.mxu1 %v7035_v48  ;;  %2782 = vmatmul.mubr.bf16.gmra.mxu0 %v7035_v48 }
 0x1e8   : > { %3467 = vmatprep.mubr.bf16.mxu0 %v8061_v61 }
 0x1ee   : > { %2613 = vmatmul.mubr.bf16.gmra.mxu1 %v7037_v21 }
 0x1ef   : > { %2620 = vmatprep.mubr.bf16.mxu1 %v7047_v46  ;;  %3468 = vmatmul.mubr.bf16.vlgmr.msra.gmra.mxu0 %v6706_v44  ;;  %v5766_v44 = vld [vmem:[#allocation7 + $0x220] sm:$0xff]  }
 0x1f0   : > { %3475 = vmatprep.mubr.bf16.mxu0 %v6786_v7 }
 0x1f6   : > { %2621 = vmatmul.mubr.bf16.gmra.mxu1 %v7068_v0 }
 0x1f7   : > { %2984 = vmatprep.mubr.bf16.mxu1 %v6782_v60  ;;  %3476 = vmatmul.mubr.bf16.gmra.mxu0 %v6788_v14  ;;  %v5767_v60 = vld [vmem:[#allocation7 + $0x218] sm:$0xff]   ;;  %v5768_v14 = vld [vmem:[#allocation7 + $0x210] sm:$0xff]  }
 0x1f8   : > { %3483 = vmatprep.mubr.bf16.mxu0 %v6844_v4 }
 0x1fe   : > { %2985 = vmatmul.mubr.bf16.vlgmr.msra.gmra.mxu1 %v8062_v6 }
 0x1ff   : > { %5482 = vmatpush3.bf16.msra.mxu1 %v7096_v3  ;;  %2992 = vmatprep.mubr.bf16.mxu1 %v8063_v49  ;;  %v5770_v3 = vld [vmem:[#allocation7 + $0x200] sm:$0xff]  }
 0x200   : > { %5483 = vmatprep.subr.bf16.mxu1 %v5764_v40  ;;  %3484 = vmatmul.mubr.bf16.gmra.mxu0 %v6848_v16  ;;  %v5769_v16 = vld [vmem:[#allocation7 + $0x208] sm:$0xff]  }
 0x201   : > { %3491 = vmatprep.mubr.bf16.mxu0 %v6858_v24 }
 0x203   : > { %5484 = vmatpush3.bf16.msra.mxu1 %v5764_v40 }
 0x204   : > { %5485 = vmatprep.subr.bf16.mxu1 %v5765_v23 }
 0x206   : > { %2993 = vmatmul.mubr.bf16.gmra.mxu1 %v8061_v61 }
 0x207   : > { %3000 = vmatprep.mubr.bf16.mxu1 %v6850_v51  ;;  %5486 = vmatpush3.bf16.msra.mxu1 %v5765_v23 }
 0x208   : > { %5487 = vmatprep.subr.bf16.mxu1 %v5766_v44  ;;  %3492 = vmatmul.mubr.bf16.gmra.mxu0 %v6860_v26 }
 0x209   : > { %3499 = vmatprep.mubr.bf16.mxu0 %v7124_v38 }
 0x20b   : > { %5488 = vmatpush3.bf16.msra.mxu1 %v5766_v44  ;;  %v5771_v44 = vld [vmem:[#allocation8 + $0x38] sm:$0xff]  }
 0x20c   : > { %5489 = vmatprep.subr.bf16.mxu1 %v5767_v60  ;;  %5529 = vmatprep.subr.bf16.mxu0 %v5771_v44 }
 0x20d   : > { %5530 = vmatpush3.bf16.msra.mxu0 %v5771_v44  ;;  %v8064_v44 = vmov 0.0|0.0  }
 0x20e   : > { %3001 = vmatmul.mubr.bf16.gmra.mxu1 %v6786_v7  ;;  %v5068_v7 = vpop.f32.mrf.mxu0 }
 0x20f   : > { %3008 = vmatprep.mubr.bf16.mxu1 %v7120_v55  ;;  %5490 = vmatpush3.bf16.msra.mxu1 %v5767_v60 }
 0x210   : > { %5491 = vmatprep.subr.bf16.mxu1 %v5768_v14  ;;  %3500 = vmatmul.mubr.bf16.gmra.mxu0 %v7131_v53 }
 0x211   : > { %3507 = vmatprep.mubr.bf16.mxu0 %v7161_v47 }
 0x213   : > { %5492 = vmatpush3.bf16.msra.mxu1 %v5768_v14 }
 0x214   : > { %5493 = vmatprep.subr.bf16.mxu1 %v5769_v16 }
 0x216   : > { %3009 = vmatmul.mubr.bf16.gmra.mxu1 %v6844_v4  ;;  %v5069_v4 = vpop.f32.mrf.mxu0 }
 0x217   : > { %3016 = vmatprep.mubr.bf16.mxu1 %v7158_v31  ;;  %5494 = vmatpush3.bf16.msra.mxu1 %v5769_v16  ;;  %v5070_v9 = vadd.f32 %v5069_v4, %v5068_v7 }
 0x218   : > { %5495 = vmatprep.subr.bf16.mxu1 %v5770_v3  ;;  %3508 = vmatmul.mubr.bf16.gmra.mxu0 %v7167_v11 }
 0x219   : > { %3515 = vmatprep.mubr.bf16.mxu0 %v7182_v20 }
 0x21b   : > { %5496 = vmatpush3.bf16.msra.mxu1 %v5770_v3 }
 0x21e   : > { %3017 = vmatmul.mubr.bf16.gmra.mxu1 %v6858_v24 }
 0x21f   : > { %3024 = vmatprep.mubr.bf16.mxu1 %v7180_v37 }
 0x220   : > { %3516 = vmatmul.mubr.bf16.gmra.mxu0 %v7186_v22 }
 0x221   : > { %3523 = vmatprep.mubr.bf16.mxu0 %v7202_v35 }
 0x226   : > { %3025 = vmatmul.mubr.bf16.gmra.mxu1 %v7124_v38 }
 0x227   : > { %3032 = vmatprep.mubr.bf16.mxu1 %v7198_v5 }
 0x228   : > { %3524 = vmatmul.mubr.bf16.gmra.mxu0 %v7208_v59 }
 0x229   : > { %3531 = vmatprep.mubr.bf16.mxu0 %v6854_v52 }
 0x22e   : > { %3033 = vmatmul.mubr.bf16.gmra.mxu1 %v7161_v47 }
 0x22f   : > { %3040 = vmatprep.mubr.bf16.mxu1 %v7220_v58 }
 0x230   : > { %3532 = vmatmul.mubr.bf16.gmra.mxu0 %v6872_v27 }
 0x231   : > { %3539 = vmatprep.mubr.bf16.mxu0 %v6886_v13 }
 0x234   : > { %v5071_v24 = vpop.f32.mrf.mxu0 }
 0x235   : > { %v4953_v26 = vpop.f32.mrf.mxu1 }
 0x236   : > { %3041 = vmatmul.mubr.bf16.gmra.mxu1 %v7182_v20  ;;  %v5072_v38 = vpop.f32.mrf.mxu0 }
 0x237   : > { %3048 = vmatprep.mubr.bf16.mxu1 %v6888_v54  ;;  %v5073_v27 = vadd.f32 %v5072_v38, %v5071_v24  ;;  %v4954_v53 = vpop.f32.mrf.mxu1 }
 0x238   : > { %3540 = vmatmul.mubr.bf16.gmra.mxu0 %v6905_v33  ;;  %v4955_v47 = vadd.f32 %v4954_v53, %v4953_v26  ;;  %v5074_v11 = vpop.f32.mrf.mxu0 }
 0x239   : > { %3547 = vmatprep.mubr.bf16.mxu0 %v6914_v25  ;;  %v4956_v20 = vpop.f32.mrf.mxu1 }
 0x23a   : > { %v7292_v22 = vadd.f32 %v7213_v36, %v4955_v47  ;;  %v5075_v29 = vpop.f32.mrf.mxu0 }
 0x23b   : > { %v5076_v2 = vadd.f32 %v5075_v29, %v5074_v11  ;;  %v4957_v33 = vpop.f32.mrf.mxu1 }
 0x23c   : > { %v4958_v1 = vadd.f32 %v4957_v33, %v4956_v20  ;;  %v5077_v19 = vpop.f32.mrf.mxu0 }
 0x23d   : > { %v4959_v43 = vpop.f32.mrf.mxu1 }
 0x23e   : > { %3049 = vmatmul.mubr.bf16.gmra.mxu1 %v7202_v35  ;;  %v7297_v12 = vadd.f32 %v5070_v9, %v4958_v1  ;;  %v5078_v10 = vpop.f32.mrf.mxu0 }
 0x23f   : > { %3056 = vmatprep.mubr.bf16.mxu1 %v6922_v34  ;;  %v5079_v35 = vadd.f32 %v5078_v10, %v5077_v19  ;;  %v4960_v32 = vpop.f32.mrf.mxu1 }
 0x240   : > { %3548 = vmatmul.mubr.bf16.gmra.mxu0 %v6945_v42  ;;  %v4961_v62 = vadd.f32 %v4960_v32, %v4959_v43  ;;  %v5080_v59 = vpop.f32.mrf.mxu0  ;;  %v5772_v32 = vld [vmem:[#allocation8 + $0x30] sm:$0xff]  }
 0x241   : > { %3555 = vmatprep.mubr.bf16.mxu0 %v6951_v41  ;;  %v4962_v45 = vpop.f32.mrf.mxu1  ;;  %5531 = vmatprep.subr.bf16.mxu0 %v5772_v32 }
 0x242   : > { %v7300_v36 = vadd.f32 %v5073_v27, %v4961_v62  ;;  %v5081_v18 = vpop.f32.mrf.mxu0  ;;  %5532 = vmatpush3.bf16.msra.mxu0 %v5772_v32 }
 0x243   : > { %v5082_v15 = vadd.f32 %v5081_v18, %v5080_v59  ;;  %v4963_v42 = vpop.f32.mrf.mxu1 }
 0x244   : > { %v4964_v61 = vadd.f32 %v4963_v42, %v4962_v45  ;;  %v5083_v40 = vpop.f32.mrf.mxu0 }
 0x246   : > { %3057 = vmatmul.mubr.bf16.gmra.mxu1 %v6854_v52  ;;  %v4965_v52 = vpop.f32.mrf.mxu1  ;;  %v7305_v6 = vadd.f32 %v5076_v2, %v4964_v61  ;;  %v5084_v23 = vpop.f32.mrf.mxu0 }
 0x247   : > { %3064 = vmatprep.mubr.bf16.mxu1 %v6947_v39  ;;  %v5085_v60 = vadd.f32 %v5084_v23, %v5083_v40 }
 0x248   : > { %3556 = vmatmul.mubr.bf16.gmra.mxu0 %v6970_v57  ;;  %v4966_v14 = vpop.f32.mrf.mxu1  ;;  %v5086_v3 = vpop.f32.mrf.mxu0 }
 0x249   : > { %3563 = vmatprep.mubr.bf16.mxu0 %v6979_v56  ;;  %v4967_v16 = vadd.f32 %v4966_v14, %v4965_v52 }
 0x24a   : > { %v4968_v7 = vpop.f32.mrf.mxu1  ;;  %v5087_v57 = vpop.f32.mrf.mxu0 }
 0x24b   : > { %v7308_v4 = vadd.f32 %v5079_v35, %v4967_v16  ;;  %v5088_v24 = vadd.f32 %v5087_v57, %v5086_v3 }
 0x24c   : > { %v5089_v38 = vpop.f32.mrf.mxu0 }
 0x24e   : > { %3065 = vmatmul.mubr.bf16.gmra.mxu1 %v6886_v13  ;;  %v4969_v13 = vpop.f32.mrf.mxu1  ;;  %v5090_v47 = vpop.f32.mrf.mxu0 }
 0x24f   : > { %3072 = vmatprep.mubr.bf16.mxu1 %v6986_v30  ;;  %v4970_v26 = vadd.f32 %v4969_v13, %v4968_v7  ;;  %v5091_v11 = vadd.f32 %v5090_v47, %v5089_v38 }
 0x250   : > { %3564 = vmatmul.mubr.bf16.gmra.mxu0 %v7003_v8  ;;  %v4971_v27 = vpop.f32.mrf.mxu1  ;;  %v5092_v29 = vpop.f32.mrf.mxu0 }
 0x251   : > { %3571 = vmatprep.mubr.bf16.mxu0 %v7009_v50  ;;  %v7313_v53 = vadd.f32 %v5082_v15, %v4970_v26 }
 0x252   : > { %v4972_v20 = vpop.f32.mrf.mxu1  ;;  %v5093_v1 = vpop.f32.mrf.mxu0 }
 0x253   : > { %v4973_v9 = vadd.f32 %v4972_v20, %v4971_v27 }
 0x254   : > { %v4974_v2 = vpop.f32.mrf.mxu1  ;;  %v5095_v43 = vpop.f32.mrf.mxu0 }
 0x255   : > { %v7316_v33 = vadd.f32 %v5085_v60, %v4973_v9  ;;  %v5773_v9 = vld [vmem:[#allocation8 + $0x28] sm:$0xff]  }
 0x256   : > { %3073 = vmatmul.mubr.bf16.gmra.mxu1 %v6914_v25  ;;  %v4975_v19 = vpop.f32.mrf.mxu1  ;;  %v5096_v35 = vpop.f32.mrf.mxu0  ;;  %5533 = vmatprep.subr.bf16.mxu0 %v5773_v9 }
 0x257   : > { %3080 = vmatprep.mubr.bf16.mxu1 %v7005_v28  ;;  %v4976_v8 = vadd.f32 %v4975_v19, %v4974_v2  ;;  %v5097_v62 = vadd.f32 %v5096_v35, %v5095_v43  ;;  %5534 = vmatpush3.bf16.msra.mxu0 %v5773_v9 }
 0x258   : > { %3572 = vmatmul.mubr.bf16.gmra.mxu0 %v7035_v48  ;;  %v5098_v18 = vpop.f32.mrf.mxu0 }
 0x259   : > { %3579 = vmatprep.mubr.bf16.mxu0 %v7054_v63  ;;  %v7321_v10 = vadd.f32 %v5088_v24, %v4976_v8 }
 0x25a   : > { %v5099_v48 = vpop.f32.mrf.mxu0 }
 0x25e   : > { %v4977_v25 = vpop.f32.mrf.mxu1  ;;  %3081 = vmatmul.mubr.bf16.gmra.mxu1 %v6951_v41  ;;  %v5094_v41 = vadd.f32 %v5093_v1, %v5092_v29 }
 0x25f   : > { %3088 = vmatprep.mubr.bf16.mxu1 %v7037_v21  ;;  %v5101_v52 = vpop.f32.mrf.mxu0 }
 0x260   : > { %v4978_v59 = vpop.f32.mrf.mxu1  ;;  %3580 = vmatmul.mubr.bf16.gmra.mxu0 %v7047_v46  ;;  %v5100_v46 = vadd.f32 %v5099_v48, %v5098_v18 }
 0x261   : > { %v4979_v45 = vadd.f32 %v4978_v59, %v4977_v25  ;;  %3587 = vmatprep.mubr.bf16.mxu0 %v8064_v44  ;;  %v5102_v14 = vpop.f32.mrf.mxu0 }
 0x262   : > { %v4980_v15 = vpop.f32.mrf.mxu1  ;;  %v5103_v16 = vadd.f32 %v5102_v14, %v5101_v52 }
 0x263   : > { %v7324_v42 = vadd.f32 %v5091_v11, %v4979_v45  ;;  %v5104_v57 = vpop.f32.mrf.mxu0 }
 0x264   : > { %v4981_v61 = vpop.f32.mrf.mxu1 }
 0x265   : > { %v4982_v40 = vadd.f32 %v4981_v61, %v4980_v15  ;;  %v5105_v26 = vpop.f32.mrf.mxu0 }
 0x266   : > { %v4983_v23 = vpop.f32.mrf.mxu1  ;;  %3089 = vmatmul.mubr.bf16.gmra.mxu1 %v6979_v56  ;;  %v5106_v32 = vadd.f32 %v5105_v26, %v5104_v57 }
 0x267   : > { %v7329_v60 = vadd.f32 %v5094_v41, %v4982_v40  ;;  %3096 = vmatprep.mubr.bf16.mxu1 %v7068_v0  ;;  %v5107_v47 = vpop.f32.mrf.mxu0 }
 0x268   : > { %v4984_v3 = vpop.f32.mrf.mxu1  ;;  %3588 = vmatmul.mubr.bf16.gmra.mxu0 %v8064_v44 }
 0x269   : > { %v4985_v7 = vadd.f32 %v4984_v3, %v4983_v23  ;;  %v5108_v20 = vpop.f32.mrf.mxu0 }
 0x26a   : > { %v4986_v24 = vpop.f32.mrf.mxu1  ;;  %v5109_v29 = vadd.f32 %v5108_v20, %v5107_v47 }
 0x26b   : > { %v7332_v13 = vadd.f32 %v5097_v62, %v4985_v7  ;;  %v5110_v19 = vpop.f32.mrf.mxu0 }
 0x26c   : > { %v4987_v38 = vpop.f32.mrf.mxu1 }
 0x26d   : > { %v4988_v27 = vadd.f32 %v4987_v38, %v4986_v24  ;;  %v5111_v25 = vpop.f32.mrf.mxu0 }
 0x26e   : > { %v4989_v56 = vpop.f32.mrf.mxu1  ;;  %3097 = vmatmul.mubr.bf16.gmra.mxu1 %v7009_v50 }
 0x26f   : > { %v7336_v11 = vadd.f32 %v5100_v46, %v4988_v27  ;;  %3104 = vmatprep.mubr.bf16.mxu1 %v7086_v17  ;;  %v5113_v50 = vpop.f32.mrf.mxu0 }
 0x270   : > { %v4990_v2 = vpop.f32.mrf.mxu1 }
 0x271   : > { %v4991_v1 = vadd.f32 %v4990_v2, %v4989_v56  ;;  %v5114_v18 = vpop.f32.mrf.mxu0 }
 0x272   : > { %v4992_v8 = vpop.f32.mrf.mxu1  ;;  %v5115_v15 = vadd.f32 %v5114_v18, %v5113_v50 }
 0x273   : > { %v7339_v43 = vadd.f32 %v5103_v16, %v4991_v1  ;;  %v5116_v41 = vpop.f32.mrf.mxu0  ;;  %v5112_v16 = vadd.f32 %v5111_v25, %v5110_v19 }
 0x274   : > { %v4993_v35 = vpop.f32.mrf.mxu1 }
 0x275   : > { %v4994_v62 = vadd.f32 %v4993_v35, %v4992_v8  ;;  %v5117_v23 = vpop.f32.mrf.mxu0 }
 0x276   : > { %v4995_v59 = vpop.f32.mrf.mxu1  ;;  %3105 = vmatmul.mubr.bf16.gmra.mxu1 %v7054_v63 }
 0x277   : > { %v7342_v45 = vadd.f32 %v5106_v32, %v4994_v62  ;;  %5497 = vmatprep.mubr.bf16.mxu1 %v8063_v49  ;;  %v5119_v7 = vpop.f32.mrf.mxu0  ;;  %v5774_v49 = vld [vmem:[#allocation8 + $0x20] sm:$0xff]  }
 0x278   : > { %v4996_v48 = vpop.f32.mrf.mxu1  ;;  %5535 = vmatprep.subr.bf16.mxu0 %v5774_v49 }
 0x279   : > { %v4997_v61 = vadd.f32 %v4996_v48, %v4995_v59  ;;  %v5120_v24 = vpop.f32.mrf.mxu0  ;;  %5536 = vmatpush3.bf16.msra.mxu0 %v5774_v49 }
 0x27a   : > { %v4998_v40 = vpop.f32.mrf.mxu1  ;;  %v5121_v26 = vadd.f32 %v5120_v24, %v5119_v7 }
 0x27b   : > { %v7345_v52 = vadd.f32 %v5109_v29, %v4997_v61  ;;  %v5122_v27 = vpop.f32.mrf.mxu0  ;;  %v5118_v29 = vadd.f32 %v5117_v23, %v5116_v41 }
 0x27c   : > { %v4999_v14 = vpop.f32.mrf.mxu1 }
 0x27d   : > { %v5000_v3 = vadd.f32 %v4999_v14, %v4998_v40  ;;  %v5123_v20 = vpop.f32.mrf.mxu0 }
 0x27e   : > { %v5001_v57 = vpop.f32.mrf.mxu1  ;;  %5498 = vmatmul.mubr.bf16.vlgmr.msra.gmra.mxu1 %v6850_v51 }
 0x27f   : > { %v7348_v63 = vadd.f32 %v5112_v16, %v5000_v3  ;;  %5501 = vmatprep.mubr.bf16.mxu1 %v7120_v55  ;;  %v5125_v51 = vpop.f32.mrf.mxu0 }
 0x280   : > { %v5002_v38 = vpop.f32.mrf.mxu1 }
 0x281   : > { %v5003_v46 = vadd.f32 %v5002_v38, %v5001_v57  ;;  %v5126_v55 = vpop.f32.mrf.mxu0 }
 0x282   : > { %v5004_v47 = vpop.f32.mrf.mxu1  ;;  %v5127_v8 = vadd.f32 %v5126_v55, %v5125_v51 }
 0x283   : > { %v7351_v56 = vadd.f32 %v5115_v15, %v5003_v46  ;;  %v5128_v32 = vpop.f32.mrf.mxu0  ;;  %v5124_v15 = vadd.f32 %v5123_v20, %v5122_v27 }
 0x284   : > { %v5005_v9 = vpop.f32.mrf.mxu1 }
 0x285   : > { %v5006_v2 = vadd.f32 %v5005_v9, %v5004_v47  ;;  %v5129_v59 = vpop.f32.mrf.mxu0 }
 0x286   : > { %v5007_v1 = vpop.f32.mrf.mxu1  ;;  %5502 = vmatmul.mubr.bf16.gmra.mxu1 %v7158_v31 }
 0x287   : > { %v7354_v19 = vadd.f32 %v5118_v29, %v5006_v2  ;;  %5505 = vmatprep.mubr.bf16.mxu1 %v7180_v37  ;;  %v5131_v61 = vpop.f32.mrf.mxu0  ;;  %v5775_v37 = vld [vmem:[#allocation8 + $0x18] sm:$0xff]  }
 0x288   : > { %v5008_v25 = vpop.f32.mrf.mxu1  ;;  %5537 = vmatprep.subr.bf16.mxu0 %v5775_v37 }
 0x289   : > { %v5009_v35 = vadd.f32 %v5008_v25, %v5007_v1  ;;  %v5132_v40 = vpop.f32.mrf.mxu0  ;;  %5538 = vmatpush3.bf16.msra.mxu0 %v5775_v37 }
 0x28a   : > { %v5010_v62 = vpop.f32.mrf.mxu1  ;;  %v5133_v23 = vadd.f32 %v5132_v40, %v5131_v61 }
 0x28b   : > { %v7357_v50 = vadd.f32 %v5121_v26, %v5009_v35  ;;  %v5134_v3 = vpop.f32.mrf.mxu0  ;;  %v5130_v26 = vadd.f32 %v5129_v59, %v5128_v32 }
 0x28c   : > { %v5011_v18 = vpop.f32.mrf.mxu1 }
 0x28d   : > { %v5012_v48 = vadd.f32 %v5011_v18, %v5010_v62  ;;  %v5135_v24 = vpop.f32.mrf.mxu0 }
 0x28e   : > { %v5013_v41 = vpop.f32.mrf.mxu1  ;;  %5506 = vmatmul.mubr.bf16.gmra.mxu1 %v7198_v5  ;;  %v5136_v25 = vadd.f32 %v5135_v24, %v5134_v3 }
 0x28f   : > { %v7360_v31 = vadd.f32 %v5124_v15, %v5012_v48  ;;  %5509 = vmatprep.mubr.bf16.mxu1 %v7220_v58  ;;  %v5137_v5 = vpop.f32.mrf.mxu0 }
 0x290   : > { %v5014_v14 = vpop.f32.mrf.mxu1 }
 0x291   : > { %v5015_v16 = vadd.f32 %v5014_v14, %v5013_v41  ;;  %v5138_v58 = vpop.f32.mrf.mxu0 }
 0x292   : > { %v5016_v7 = vpop.f32.mrf.mxu1  ;;  %v5139_v47 = vadd.f32 %v5138_v58, %v5137_v5 }
 0x293   : > { %v7363_v57 = vadd.f32 %v5127_v8, %v5015_v16  ;;  %v5140_v29 = vpop.f32.mrf.mxu0 }
 0x294   : > { %v5017_v49 = vpop.f32.mrf.mxu1 }
 0x295   : > { %v5018_v38 = vadd.f32 %v5017_v49, %v5016_v7  ;;  %v5141_v1 = vpop.f32.mrf.mxu0 }
 0x296   : > { %v5019_v46 = vpop.f32.mrf.mxu1  ;;  %5510 = vmatmul.mubr.bf16.gmra.mxu1 %v6888_v54  ;;  %v5142_v55 = vadd.f32 %v5141_v1, %v5140_v29 }
 0x297   : > { %v7366_v27 = vadd.f32 %v5130_v26, %v5018_v38  ;;  %5513 = vmatprep.mubr.bf16.mxu1 %v6922_v34  ;;  %v5143_v32 = vpop.f32.mrf.mxu0  ;;  %v5776_v34 = vld [vmem:[#allocation8 + $0x10] sm:$0xff]  }
 0x298   : > { %v5020_v20 = vpop.f32.mrf.mxu1  ;;  %5539 = vmatprep.subr.bf16.mxu0 %v5776_v34 }
 0x299   : > { %v5021_v9 = vadd.f32 %v5020_v20, %v5019_v46  ;;  %v5144_v59 = vpop.f32.mrf.mxu0  ;;  %5540 = vmatpush3.bf16.msra.mxu0 %v5776_v34 }
 0x29a   : > { %v5022_v2 = vpop.f32.mrf.mxu1  ;;  %v5145_v18 = vadd.f32 %v5144_v59, %v5143_v32 }
 0x29b   : > { %v7369_v51 = vadd.f32 %v5133_v23, %v5021_v9  ;;  %v5146_v61 = vpop.f32.mrf.mxu0 }
 0x29c   : > { %v5023_v8 = vpop.f32.mrf.mxu1 }
 0x29d   : > { %v5024_v35 = vadd.f32 %v5023_v8, %v5022_v2  ;;  %v5147_v37 = vpop.f32.mrf.mxu0 }
 0x29e   : > { %v5025_v62 = vpop.f32.mrf.mxu1  ;;  %5514 = vmatmul.mubr.bf16.gmra.mxu1 %v6947_v39  ;;  %v5148_v23 = vadd.f32 %v5147_v37, %v5146_v61 }
 0x29f   : > { %v7372_v54 = vadd.f32 %v5136_v25, %v5024_v35  ;;  %5517 = vmatprep.mubr.bf16.mxu1 %v6986_v30  ;;  %v5149_v39 = vpop.f32.mrf.mxu0 }
 0x2a0   : > { %v5026_v15 = vpop.f32.mrf.mxu1 }
 0x2a1   : > { %v5027_v48 = vadd.f32 %v5026_v15, %v5025_v62  ;;  %v5150_v30 = vpop.f32.mrf.mxu0 }
 0x2a2   : > { %v5028_v41 = vpop.f32.mrf.mxu1  ;;  %v5151_v24 = vadd.f32 %v5150_v30, %v5149_v39 }
 0x2a3   : > { %v7375_v40 = vadd.f32 %v5139_v47, %v5027_v48  ;;  %v5152_v38 = vpop.f32.mrf.mxu0 }
 0x2a4   : > { %v5029_v14 = vpop.f32.mrf.mxu1 }
 0x2a5   : > { %v5030_v16 = vadd.f32 %v5029_v14, %v5028_v41  ;;  %v5153_v58 = vpop.f32.mrf.mxu0 }
 0x2a6   : > { %v5031_v3 = vpop.f32.mrf.mxu1  ;;  %5518 = vmatmul.mubr.bf16.gmra.mxu1 %v7005_v28  ;;  %v5154_v47 = vadd.f32 %v5153_v58, %v5152_v38 }
 0x2a7   : > { %v7378_v7 = vadd.f32 %v5142_v55, %v5030_v16  ;;  %5521 = vmatprep.mubr.bf16.mxu1 %v7037_v21  ;;  %v5155_v29 = vpop.f32.mrf.mxu0  ;;  %v5777_v21 = vld [vmem:[#allocation8 + $0x8] sm:$0xff]  }
 0x2a8   : > { %v5032_v49 = vpop.f32.mrf.mxu1  ;;  %5541 = vmatprep.subr.bf16.mxu0 %v5777_v21 }
 0x2a9   : > { %v5033_v26 = vadd.f32 %v5032_v49, %v5031_v3  ;;  %v5156_v1 = vpop.f32.mrf.mxu0  ;;  %5542 = vmatpush3.bf16.msra.mxu0 %v5777_v21 }
 0x2aa   : > { %v5034_v5 = vpop.f32.mrf.mxu1  ;;  %v5157_v55 = vadd.f32 %v5156_v1, %v5155_v29 }
 0x2ab   : > { %v7381_v46 = vadd.f32 %v5145_v18, %v5033_v26  ;;  %v5158_v35 = vpop.f32.mrf.mxu0 }
 0x2ac   : > { %v5035_v20 = vpop.f32.mrf.mxu1 }
 0x2ad   : > { %v5036_v9 = vadd.f32 %v5035_v20, %v5034_v5  ;;  %v5159_v59 = vpop.f32.mrf.mxu0 }
 0x2ae   : > { %v5037_v2 = vpop.f32.mrf.mxu1  ;;  %5522 = vmatmul.mubr.bf16.gmra.mxu1 %v7068_v0  ;;  %v5160_v34 = vadd.f32 %v5159_v59, %v5158_v35 }
 0x2af   : > { %v7384_v28 = vadd.f32 %v5148_v23, %v5036_v9  ;;  %5525 = vmatprep.mubr.bf16.mxu1 %v7086_v17  ;;  %v5289_v0 = vpop.f32.mrf.mxu0 }
 0x2b0   : > { %v5038_v8 = vpop.f32.mrf.mxu1 }
 0x2b1   : > { %v5039_v25 = vadd.f32 %v5038_v8, %v5037_v2  ;;  %v5290_v17 = vpop.f32.mrf.mxu0 }
 0x2b2   : > { %v5040_v32 = vpop.f32.mrf.mxu1  ;;  %v5291_v41 = vadd.f32 %v5290_v17, %v5289_v0 }
 0x2b3   : > { %v7387_v62 = vadd.f32 %v5151_v24, %v5039_v25  ;;  %v5292_v14 = vpop.f32.mrf.mxu0 }
 0x2b4   : > { %v5041_v18 = vpop.f32.mrf.mxu1 }
 0x2b5   : > { %v5042_v15 = vadd.f32 %v5041_v18, %v5040_v32  ;;  %v5293_v3 = vpop.f32.mrf.mxu0 }
 0x2b6   : > { %v5043_v48 = vpop.f32.mrf.mxu1  ;;  %5526 = vmatmul.mubr.bf16.gmra.mxu1 %v8064_v44  ;;  %v5778_v44 = vld [vmem:[#allocation8] sm:$0xff]   ;;  %v5294_v35 = vadd.f32 %v5293_v3, %v5292_v14 }
 0x2b7   : > { %v7390_v61 = vadd.f32 %v5154_v47, %v5042_v15  ;;  %v7394_v49 = vpop.f32.mrf.mxu0  ;;  %5543 = vmatprep.subr.bf16.mxu0 %v5778_v44 }
 0x2b8   : > { %v5044_v37 = vpop.f32.mrf.mxu1  ;;  %5544 = vmatpush3.bf16.msra.mxu0 %v5778_v44 }
 0x2b9   : > { %v5045_v23 = vadd.f32 %v5044_v37, %v5043_v48  ;;  %v7398_v5 = vpop.f32.mrf.mxu0 }
 0x2ba   : > { %v5046_v16 = vpop.f32.mrf.mxu1 }
 0x2bb   : > { %v7392_v39 = vadd.f32 %v5157_v55, %v5045_v23  ;;  %v7400_v20 = vpop.f32.mrf.mxu0 }
 0x2bc   : > { %v5047_v30 = vpop.f32.mrf.mxu1 }
 0x2bd   : > { %v5048_v24 = vadd.f32 %v5047_v30, %v5046_v16  ;;  %v7403_v2 = vpop.f32.mrf.mxu0 }
 0x2be   : > { %v5177_v26 = vpop.f32.mrf.mxu1 }
 0x2bf   : > { %v7396_v38 = vadd.f32 %v5160_v34, %v5048_v24 }
 0x2c0   : > { %v5178_v58 = vpop.f32.mrf.mxu1  ;;  %v7405_v55 = vpop.f32.mrf.mxu0 }
 0x2c1   : > { %8065 = vst [vmem:[#allocation19_spill] sm:$0xff] %v7396_v38  ;;  %v5179_v47 = vadd.f32 %v5178_v58, %v5177_v26 }
 0x2c2   : > { %v5180_v9 = vpop.f32.mrf.mxu1  ;;  %v7410_v59 = vpop.f32.mrf.mxu0 }
 0x2c3   : > { %v3113_v29 = vadd.f32 %v5179_v47, %v7292_v22 }
 0x2c4   : > { %v5181_v1 = vpop.f32.mrf.mxu1  ;;  %v7412_v15 = vpop.f32.mrf.mxu0 }
 0x2c5   : > { %v5182_v21 = vadd.f32 %v5181_v1, %v5180_v9  ;;  %v7407_v8 = vadd.f32 %v5291_v41, %v3113_v29 }
 0x2c6   : > { %v5183_v25 = vpop.f32.mrf.mxu1  ;;  %v7419_v17 = vpop.f32.mrf.mxu0 }
 0x2c7   : > { %v3114_v32 = vadd.f32 %v5182_v21, %v7297_v12 }
 0x2c8   : > { %v5184_v34 = vpop.f32.mrf.mxu1  ;;  %v7421_v23 = vpop.f32.mrf.mxu0 }
 0x2c9   : > { %v5185_v18 = vadd.f32 %v5184_v34, %v5183_v25  ;;  %v7414_v0 = vadd.f32 %v5294_v35, %v3114_v32 }
 0x2ca   : > { %v5186_v22 = vpop.f32.mrf.mxu1  ;;  %v7426_v16 = vpop.f32.mrf.mxu0 }
 0x2cb   : > { %v7417_v48 = vadd.f32 %v5185_v18, %v7300_v36 }
 0x2cc   : > { %v5187_v41 = vpop.f32.mrf.mxu1  ;;  %v7428_v24 = vpop.f32.mrf.mxu0 }
 0x2cd   : > { %v5188_v37 = vadd.f32 %v5187_v41, %v5186_v22 }
 0x2ce   : > { %v5189_v14 = vpop.f32.mrf.mxu1  ;;  %v7433_v44 = vpop.f32.mrf.mxu0 }
 0x2cf   : > { %v7424_v12 = vadd.f32 %v5188_v37, %v7305_v6 }
 0x2d0   : > { %v5190_v3 = vpop.f32.mrf.mxu1  ;;  %v7435_v9 = vpop.f32.mrf.mxu0 }
 0x2d1   : > { %v5191_v30 = vadd.f32 %v5190_v3, %v5189_v14 }
 0x2d2   : > { %v5192_v26 = vpop.f32.mrf.mxu1  ;;  %v7440_v1 = vpop.f32.mrf.mxu0 }
 0x2d3   : > { %v7431_v36 = vadd.f32 %v5191_v30, %v7308_v4 }
 0x2d4   : > { %v5193_v58 = vpop.f32.mrf.mxu1  ;;  %v7442_v35 = vpop.f32.mrf.mxu0 }
 0x2d5   : > { %v5194_v47 = vadd.f32 %v5193_v58, %v5192_v26 }
 0x2d6   : > { %v5195_v29 = vpop.f32.mrf.mxu1  ;;  %v7447_v34 = vpop.f32.mrf.mxu0 }
 0x2d7   : > { %v7438_v6 = vadd.f32 %v5194_v47, %v7313_v53  ;;  %8066 = vst [vmem:[#allocation22_spill] sm:$0xff] %v7447_v34 }
 0x2d8   : > { %v5196_v21 = vpop.f32.mrf.mxu1  ;;  %v7449_v41 = vpop.f32.mrf.mxu0 }
 0x2d9   : > { %v5197_v25 = vadd.f32 %v5196_v21, %v5195_v29 }
 0x2da   : > { %v5198_v32 = vpop.f32.mrf.mxu1  ;;  %v7454_v14 = vpop.f32.mrf.mxu0 }
 0x2db   : > { %v7445_v4 = vadd.f32 %v5197_v25, %v7316_v33 }
 0x2dc   : > { %v5199_v18 = vpop.f32.mrf.mxu1  ;;  %v7456_v26 = vpop.f32.mrf.mxu0 }
 0x2dd   : > { %v5200_v22 = vadd.f32 %v5199_v18, %v5198_v32 }
 0x2de   : > { %v5201_v37 = vpop.f32.mrf.mxu1  ;;  %v7461_v47 = vpop.f32.mrf.mxu0 }
 0x2df   : > { %v7452_v53 = vadd.f32 %v5200_v22, %v7321_v10 }
 0x2e0   : > { %v5202_v3 = vpop.f32.mrf.mxu1  ;;  %v7463_v25 = vpop.f32.mrf.mxu0 }
 0x2e1   : > { %v5203_v30 = vadd.f32 %v5202_v3, %v5201_v37  ;;  %8067 = vst [vmem:[#allocation18_spill] sm:$0xff] %v7463_v25 }
 0x2e2   : > { %v5204_v58 = vpop.f32.mrf.mxu1  ;;  %v7468_v18 = vpop.f32.mrf.mxu0 }
 0x2e3   : > { %v7459_v33 = vadd.f32 %v5203_v30, %v7324_v42  ;;  %8069 = vst [vmem:[#allocation23_spill] sm:$0xff] %v7468_v18 }
 0x2e4   : > { %v5205_v29 = vpop.f32.mrf.mxu1  ;;  %v7470_v3 = vpop.f32.mrf.mxu0 }
 0x2e5   : > { %v5206_v21 = vadd.f32 %v5205_v29, %v5204_v58  ;;  %8070 = vst [vmem:[#allocation16_spill] sm:$0xff] %v7470_v3 }
 0x2e6   : > { %v5207_v32 = vpop.f32.mrf.mxu1  ;;  %v7475_v30 = vpop.f32.mrf.mxu0 }
 0x2e7   : > { %v7466_v10 = vadd.f32 %v5206_v21, %v7329_v60  ;;  %8071 = vst [vmem:[#allocation17_spill] sm:$0xff] %v7475_v30 }
 0x2e8   : > { %v5208_v22 = vpop.f32.mrf.mxu1  ;;  %v7477_v29 = vpop.f32.mrf.mxu0 }
 0x2e9   : > { %8068 = vst [vmem:[#allocation21_spill] sm:$0xff] %v7466_v10  ;;  %v5209_v37 = vadd.f32 %v5208_v22, %v5207_v32  ;;  %8072 = vst [vmem:[#allocation26_spill] sm:$0xff] %v7477_v29 }
 0x2ea   : > { %v5210_v38 = vpop.f32.mrf.mxu1  ;;  %v7482_v21 = vpop.f32.mrf.mxu0 }
 0x2eb   : > { %v7473_v42 = vadd.f32 %v5209_v37, %v7332_v13  ;;  %8073 = vst [vmem:[#allocation27_spill] sm:$0xff] %v7482_v21 }
 0x2ec   : > { %v5211_v34 = vpop.f32.mrf.mxu1  ;;  %v7484_v22 = vpop.f32.mrf.mxu0 }
 0x2ed   : > { %v5212_v58 = vadd.f32 %v5211_v34, %v5210_v38 }
 0x2ee   : > { %v5213_v25 = vpop.f32.mrf.mxu1  ;;  %v7489_v37 = vpop.f32.mrf.mxu0 }
 0x2ef   : > { %v7480_v60 = vadd.f32 %v5212_v58, %v7336_v11  ;;  %8075 = vst [vmem:[#allocation15_spill] sm:$0xff] %v7489_v37 }
 0x2f0   : > { %v5214_v18 = vpop.f32.mrf.mxu1  ;;  %v7494_v11 = vpop.f32.mrf.mxu0 }
 0x2f1   : > { %v5215_v32 = vadd.f32 %v5214_v18, %v5213_v25  ;;  %8076 = vst [vmem:[#allocation25_spill] sm:$0xff] %v7494_v11 }
 0x2f2   : > { %v5216_v3 = vpop.f32.mrf.mxu1  ;;  %v7496_v25 = vpop.f32.mrf.mxu0 }
 0x2f3   : > { %v7487_v13 = vadd.f32 %v5215_v32, %v7339_v43  ;;  %8077 = vst [vmem:[#allocation20_spill] sm:$0xff] %v7496_v25 }
 0x2f4   : > { %v5217_v30 = vpop.f32.mrf.mxu1  ;;  %v7501_v37 = vpop.f32.mrf.mxu0 }
 0x2f5   : > { %8074 = vst [vmem:[#allocation24_spill] sm:$0xff] %v7487_v13  ;;  %v5218_v38 = vadd.f32 %v5217_v30, %v5216_v3  ;;  %8078 = vst [vmem:[#allocation28_spill] sm:$0xff] %v7501_v37 }
 0x2f6   : > { %v5219_v34 = vpop.f32.mrf.mxu1  ;;  %v7506_v11 = vpop.f32.mrf.mxu0 }
 0x2f7   : > { %v7492_v29 = vadd.f32 %v5218_v38, %v7342_v45  ;;  %8079 = vst [vmem:[#allocation29_spill] sm:$0xff] %v7506_v11 }
 0x2f8   : > { %v5220_v58 = vpop.f32.mrf.mxu1 }
 0x2f9   : > { %v5221_v21 = vadd.f32 %v5220_v58, %v5219_v34 }
 0x2fa   : > { %v5222_v10 = vpop.f32.mrf.mxu1 }
 0x2fb   : > { %v7499_v18 = vadd.f32 %v5221_v21, %v7345_v52  ;;  %v7511_v21 = vpop.f32.mrf.mxu0 }
 0x2fc   : > { %v5223_v43 = vpop.f32.mrf.mxu1 }
 0x2fd   : > { %v5224_v32 = vadd.f32 %v5223_v43, %v5222_v10 }
 0x2fe   : > { %v5225_v13 = vpop.f32.mrf.mxu1 }
 0x2ff   : > { %v7504_v3 = vadd.f32 %v5224_v32, %v7348_v63  ;;  %v7516_v32 = vpop.f32.mrf.mxu0 }
 0x300   : > { %v5226_v45 = vpop.f32.mrf.mxu1 }
 0x301   : > { %v5227_v30 = vadd.f32 %v5226_v45, %v5225_v13 }
 0x302   : > { %v5228_v38 = vpop.f32.mrf.mxu1 }
 0x303   : > { %v7509_v34 = vadd.f32 %v5227_v30, %v7351_v56  ;;  %v7521_v30 = vpop.f32.mrf.mxu0 }
 0x304   : > { %v5229_v58 = vpop.f32.mrf.mxu1  ;;  %8082 = vst [vmem:[#allocation32_spill] sm:$0xff] %v7521_v30 }
 0x305   : > { %8080 = vst [vmem:[#allocation30_spill] sm:$0xff] %v7509_v34  ;;  %v5230_v25 = vadd.f32 %v5229_v58, %v5228_v38 }
 0x306   : > { %v5231_v52 = vpop.f32.mrf.mxu1 }
 0x307   : > { %v7514_v10 = vadd.f32 %v5230_v25, %v7354_v19  ;;  %v7526_v25 = vpop.f32.mrf.mxu0 }
 0x308   : > { %v5232_v43 = vpop.f32.mrf.mxu1 }
 0x309   : > { %8081 = vst [vmem:[#allocation31_spill] sm:$0xff] %v7514_v10  ;;  %v5233_v37 = vadd.f32 %v5232_v43, %v5231_v52 }
 0x30a   : > { %v5234_v63 = vpop.f32.mrf.mxu1 }
 0x30b   : > { %v7519_v13 = vadd.f32 %v5233_v37, %v7357_v50  ;;  %v7531_v37 = vpop.f32.mrf.mxu0 }
 0x30c   : > { %v5235_v45 = vpop.f32.mrf.mxu1 }
 0x30d   : > { %v5236_v11 = vadd.f32 %v5235_v45, %v5234_v63 }
 0x30e   : > { %v5237_v56 = vpop.f32.mrf.mxu1 }
 0x30f   : > { %v7524_v38 = vadd.f32 %v5236_v11, %v7360_v31  ;;  %v7536_v11 = vpop.f32.mrf.mxu0 }
 0x310   : > { %v5238_v58 = vpop.f32.mrf.mxu1 }
 0x311   : > { %8083 = vst [vmem:[#allocation33_spill] sm:$0xff] %v7524_v38  ;;  %v5239_v34 = vadd.f32 %v5238_v58, %v5237_v56 }
 0x312   : > { %v5240_v19 = vpop.f32.mrf.mxu1 }
 0x313   : > { %v7529_v52 = vadd.f32 %v5239_v34, %v7363_v57  ;;  %v7541_v34 = vpop.f32.mrf.mxu0 }
 0x314   : > { %v5241_v43 = vpop.f32.mrf.mxu1  ;;  %8086 = vst [vmem:[#allocation36_spill] sm:$0xff] %v7541_v34 }
 0x315   : > { %8084 = vst [vmem:[#allocation34_spill] sm:$0xff] %v7529_v52  ;;  %v5242_v10 = vadd.f32 %v5241_v43, %v5240_v19 }
 0x316   : > { %v5243_v50 = vpop.f32.mrf.mxu1 }
 0x317   : > { %v7534_v63 = vadd.f32 %v5242_v10, %v7366_v27  ;;  %v7546_v10 = vpop.f32.mrf.mxu0 }
 0x318   : > { %v5244_v45 = vpop.f32.mrf.mxu1 }
 0x319   : > { %8085 = vst [vmem:[#allocation35_spill] sm:$0xff] %v7534_v63  ;;  %v5245_v30 = vadd.f32 %v5244_v45, %v5243_v50 }
 0x31a   : > { %v5246_v31 = vpop.f32.mrf.mxu1 }
 0x31b   : > { %v7539_v56 = vadd.f32 %v5245_v30, %v7369_v51  ;;  %v7551_v30 = vpop.f32.mrf.mxu0 }
 0x31c   : > { %v5247_v58 = vpop.f32.mrf.mxu1 }
 0x31d   : > { %v5248_v38 = vadd.f32 %v5247_v58, %v5246_v31 }
 0x31e   : > { %v5249_v57 = vpop.f32.mrf.mxu1 }
 0x31f   : > { %v7544_v19 = vadd.f32 %v5248_v38, %v7372_v54  ;;  %v7556_v38 = vpop.f32.mrf.mxu0 }
 0x320   : > { %v5250_v43 = vpop.f32.mrf.mxu1 }
 0x321   : > { %8087 = vst [vmem:[#allocation37_spill] sm:$0xff] %v7544_v19  ;;  %v5251_v52 = vadd.f32 %v5250_v43, %v5249_v57 }
 0x322   : > { %v5252_v27 = vpop.f32.mrf.mxu1 }
 0x323   : > { %v7549_v50 = vadd.f32 %v5251_v52, %v7375_v40  ;;  %v7561_v52 = vpop.f32.mrf.mxu0 }
 0x324   : > { %v5253_v45 = vpop.f32.mrf.mxu1 }
 0x325   : > { %8088 = vst [vmem:[#allocation38_spill] sm:$0xff] %v7549_v50  ;;  %v5254_v63 = vadd.f32 %v5253_v45, %v5252_v27 }
 0x326   : > { %v5255_v51 = vpop.f32.mrf.mxu1 }
 0x327   : > { %v7554_v31 = vadd.f32 %v5254_v63, %v7378_v7  ;;  %v7566_v63 = vpop.f32.mrf.mxu0 }
 0x328   : > { %v5256_v58 = vpop.f32.mrf.mxu1 }
 0x329   : > { %8089 = vst [vmem:[#allocation39_spill] sm:$0xff] %v7554_v31  ;;  %v5257_v34 = vadd.f32 %v5256_v58, %v5255_v51 }
 0x32a   : > { %v5258_v54 = vpop.f32.mrf.mxu1 }
 0x32b   : > { %v7559_v57 = vadd.f32 %v5257_v34, %v7381_v46  ;;  %v7571_v34 = vpop.f32.mrf.mxu0 }
 0x32c   : > { %v5259_v43 = vpop.f32.mrf.mxu1 }
 0x32d   : > { %8090 = vst [vmem:[#allocation40_spill] sm:$0xff] %v7559_v57  ;;  %v5260_v19 = vadd.f32 %v5259_v43, %v5258_v54 }
 0x32e   : > { %v5261_v40 = vpop.f32.mrf.mxu1 }
 0x32f   : > { %v7564_v27 = vadd.f32 %v5260_v19, %v7384_v28  ;;  %v5297_v19 = vadd.f32 %v7398_v5, %v7394_v49  ;;  %v7595_v49 = vld [vmem:[%s7860_s5] ss:$0 sm:$0xff] }
 0x330   : > { %v5262_v45 = vpop.f32.mrf.mxu1 }
 0x331   : > { %v5263_v50 = vadd.f32 %v5262_v45, %v5261_v40  ;;  %v7580_v40 = vpop.f32.mrf.mxu0  ;;  %v3598_v45 = vadd.f32 %v5297_v19, %v7417_v48  ;;  %v5309_v48 = vadd.f32 %v7426_v16, %v7421_v23  ;;  %v5303_v19 = vadd.f32 %v7410_v59, %v7405_v55 }
 0x332   : > { %v5264_v7 = vpop.f32.mrf.mxu1  ;;  %v5312_v23 = vadd.f32 %v7433_v44, %v7428_v24 }
 0x333   : > { %v7569_v51 = vadd.f32 %v5263_v50, %v7387_v62 }
 0x334   : > { %v5265_v58 = vpop.f32.mrf.mxu1 }
 0x335   : > { %v5266_v31 = vadd.f32 %v5265_v58, %v5264_v7 }
 0x336   : > { %v5267_v46 = vpop.f32.mrf.mxu1 }
 0x337   : > { %v7574_v54 = vadd.f32 %v5266_v31, %v7390_v61  ;;  %v5300_v61 = vadd.f32 %v7403_v2, %v7400_v20  ;;  %v7590_v31 = vpop.f32.mrf.mxu0 }
 0x338   : > { %v5268_v43 = vpop.f32.mrf.mxu1 }
 0x339   : > { %8091 = vst [vmem:[#allocation41_spill] sm:$0xff] %v7574_v54  ;;  %v5269_v57 = vadd.f32 %v5268_v43, %v5267_v46  ;;  %v7601_v43 = vpop.f32.mrf.mxu0 }
 0x33a   : > { %v7576_v28 = vpop.f32.mrf.mxu1 }
 0x33b   : > { %v7583_v62 = vadd.f32 %v5269_v57, %v7392_v39  ;;  %v3599_v57 = vadd.f32 %v5300_v61, %v7424_v12  ;;  %v3602_v12 = vadd.f32 %v5309_v48, %v7445_v4  ;;  %v3600_v61 = vadd.f32 %v5303_v19, %v7431_v36 }
 0x33c   : > { %v7585_v50 = vpop.f32.mrf.mxu1 }
 0x33e   : > { %v5499_v7 = vpop.f32.mrf.mxu1 }
 0x33f   : > { %v3904_v58 = vadd.f32 %v5499_v7, %v3598_v45 }
 0x340   : > { %v3775_v5 = vpop.f32.mrf.mxu1 }
 0x341   : > { %v3902_v39 = vadd.f32 %v3775_v5, %v7407_v8  ;;  %v3943_v20 = vadd.f32 %v7595_v49, %v3904_v58  ;;  %v7613_v58 = vpop.f32.mrf.mxu0 }
 0x342   : > { %v5500_v46 = vpop.f32.mrf.mxu1 }
 0x343   : > { %v3905_v2 = vadd.f32 %v5500_v46, %v3599_v57  ;;  %v3941_v7 = vadd.f32 %v7595_v49, %v3902_v39  ;;  %v3975_v5 = vmax.f32 %v3943_v20, 0.0  ;;  %v5306_v39 = vadd.f32 %v7419_v17, %v7412_v15 }
 0x344   : > { %v3778_v45 = vpop.f32.mrf.mxu1  ;;  %v5321_v20 = vadd.f32 %v7454_v14, %v7449_v41  ;;  %v5315_v15 = vadd.f32 %v7440_v1, %v7435_v9  ;;  %v5324_v41 = vadd.f32 %v7461_v47, %v7456_v26 }
 0x345   : > { %v3944_v54 = vadd.f32 %v7595_v49, %v3905_v2  ;;  %v3903_v8 = vadd.f32 %v3778_v45, %v7414_v0  ;;  %v3603_v0 = vadd.f32 %v5312_v23, %v7452_v53  ;;  %v3973_v4 = vmax.f32 %v3941_v7, 0.0 }
 0x346   : > { %v5503_v16 = vpop.f32.mrf.mxu1  ;;  %v3601_v36 = vadd.f32 %v5306_v39, %v7438_v6  ;;  %v3606_v6 = vadd.f32 %v5321_v20, %v7473_v42  ;;  %v3604_v23 = vadd.f32 %v5315_v15, %v7459_v33  ;;  %v3607_v42 = vadd.f32 %v5324_v41, %v7480_v60 }
 0x347   : > { %v3976_v57 = vmax.f32 %v3944_v54, 0.0  ;;  %v3942_v55 = vadd.f32 %v7595_v49, %v3903_v8  ;;  %v3908_v59 = vadd.f32 %v5503_v16, %v3602_v12  ;;  %v7622_v54 = vpop.f32.mrf.mxu0 }
 0x348   : > { %v3791_v46 = vpop.f32.mrf.mxu1 }
 0x349   : > { %v4006_v48 = vpack.c.bf16 %v3976_v57, %v3975_v5  ;;  %v3974_v2 = vmax.f32 %v3942_v55, 0.0  ;;  %v3906_v24 = vadd.f32 %v3791_v46, %v3600_v61  ;;  %v3947_v19 = vadd.f32 %v7595_v49, %v3908_v59  ;;  %v7633_v16 = vpop.f32.mrf.mxu0  ;;  %v8092_v57 = vld [vmem:[#allocation22_spill] sm:$0xff] }
 0x34a   : > { %v5504_v44 = vpop.f32.mrf.mxu1  ;;  %v5318_v55 = vadd.f32 %v8092_v57, %v7442_v35  ;;  %v8096_v35 = vld [vmem:[#allocation18_spill] sm:$0xff] }
 0x34b   : > { %v3909_v45 = vadd.f32 %v5504_v44, %v3603_v0  ;;  %v4005_v8 = vpack.c.bf16 %v3974_v2, %v3973_v4  ;;  %v3945_v53 = vadd.f32 %v7595_v49, %v3906_v24  ;;  %v3979_v61 = vmax.f32 %v3947_v19, 0.0  ;;  %v8093_v4 = vld [vmem:[#allocation21_spill] sm:$0xff]  ;;  %v8095_v2 = vld [vmem:[#allocation27_spill] sm:$0xff]  ;;  %v7642_v44 = vpop.f32.mrf.mxu0 }
 0x34c   : > { %v3794_v17 = vpop.f32.mrf.mxu1  ;;  %v3605_v33 = vadd.f32 %v5318_v55, %v8093_v4  ;;  %v8100_v55 = vld [vmem:[#allocation16_spill] sm:$0xff] }
 0x34d   : > { %v3948_v7 = vadd.f32 %v7595_v49, %v3909_v45  ;;  %v3907_v12 = vadd.f32 %v3794_v17, %v3601_v36  ;;  %5545 = vmatprep.mubr.bf16.mxu0 %v4005_v8  ;;  %v3977_v39 = vmax.f32 %v3945_v53, 0.0  ;;  %v8097_v45 = vld [vmem:[#allocation23_spill] sm:$0xff] }
 0x34e   : > { %v5507_v14 = vpop.f32.mrf.mxu1  ;;  %5546 = vmatmul.mubr.bf16.vlgmr.msra.gmra.mxu0 %v4006_v48  ;;  %v8094_v48 = vld [vmem:[#allocation26_spill] sm:$0xff]  ;;  %v5327_v8 = vadd.f32 %v8097_v45, %v8096_v35 }
 0x34f   : > { %v3980_v9 = vmax.f32 %v3948_v7, 0.0  ;;  %v3946_v1 = vadd.f32 %v7595_v49, %v3907_v12  ;;  %v3912_v5 = vadd.f32 %v5507_v14, %v3606_v6  ;;  %v5333_v24 = vadd.f32 %v8095_v2, %v8094_v48  ;;  %v8098_v12 = vld [vmem:[#allocation15_spill] sm:$0xff]  ;;  %v8099_v14 = vld [vmem:[#allocation24_spill] sm:$0xff] }
 0x350   : > { %v3807_v59 = vpop.f32.mrf.mxu1  ;;  %v5336_v6 = vadd.f32 %v8098_v12, %v7484_v22 }
 0x351   : > { %v4008_v46 = vpack.c.bf16 %v3980_v9, %v3979_v61  ;;  %v3978_v26 = vmax.f32 %v3946_v1, 0.0  ;;  %v3910_v47 = vadd.f32 %v3807_v59, %v3604_v23  ;;  %v3951_v36 = vadd.f32 %v7595_v49, %v3912_v5  ;;  %v7653_v61 = vpop.f32.mrf.mxu0  ;;  %v8101_v59 = vld [vmem:[#allocation17_spill] sm:$0xff] }
 0x352   : > { %v5508_v0 = vpop.f32.mrf.mxu1  ;;  %v3610_v7 = vadd.f32 %v5333_v24, %v7499_v18  ;;  %v3608_v23 = vadd.f32 %v5327_v8, %v8099_v14  ;;  %v3611_v18 = vadd.f32 %v5336_v6, %v7504_v3 }
 0x353   : > { %v3913_v20 = vadd.f32 %v5508_v0, %v3607_v42  ;;  %v4007_v19 = vpack.c.bf16 %v3978_v26, %v3977_v39  ;;  %v3949_v15 = vadd.f32 %v7595_v49, %v3910_v47  ;;  %v3983_v9 = vmax.f32 %v3951_v36, 0.0  ;;  %v7662_v48 = vpop.f32.mrf.mxu0 }
 0x354   : > { %v3810_v60 = vpop.f32.mrf.mxu1  ;;  %v5330_v42 = vadd.f32 %v8101_v59, %v8100_v55 }
 0x355   : > { %v3952_v17 = vadd.f32 %v7595_v49, %v3913_v20  ;;  %v3911_v53 = vadd.f32 %v3810_v60, %v3605_v33  ;;  %5549 = vmatprep.mubr.bf16.mxu0 %v4007_v19  ;;  %v3981_v26 = vmax.f32 %v3949_v15, 0.0  ;;  %v5345_v33 = vadd.f32 %v7516_v32, %v7511_v21  ;;  %v8102_v20 = vld [vmem:[#allocation25_spill] sm:$0xff]  ;;  %v8103_v19 = vld [vmem:[#allocation20_spill] sm:$0xff] }
 0x356   : > { %v5511_v41 = vpop.f32.mrf.mxu1  ;;  %5550 = vmatmul.mubr.bf16.gmra.mxu0 %v4008_v46  ;;  %v3609_v4 = vadd.f32 %v5330_v42, %v7492_v29  ;;  %v5339_v35 = vadd.f32 %v8103_v19, %v8102_v20  ;;  %v8104_v15 = vld [vmem:[#allocation32_spill] sm:$0xff] }
 0x357   : > { %v3984_v1 = vmax.f32 %v3952_v17, 0.0  ;;  %v3950_v5 = vadd.f32 %v7595_v49, %v3911_v53  ;;  %v3916_v57 = vadd.f32 %v5511_v41, %v3610_v7  ;;  %v3614_v29 = vadd.f32 %v5345_v33, %v7519_v13  ;;  %v8105_v17 = vld [vmem:[#allocation30_spill] sm:$0xff]  ;;  %v7673_v7 = vpop.f32.mrf.mxu0 }
 0x358   : > { %v3823_v39 = vpop.f32.mrf.mxu1  ;;  %v5348_v21 = vadd.f32 %v7526_v25, %v8104_v15  ;;  %v3612_v53 = vadd.f32 %v5339_v35, %v8105_v17  ;;  %v5351_v33 = vadd.f32 %v7536_v11, %v7531_v37 }
 0x359   : > { %v4010_v47 = vpack.c.bf16 %v3984_v1, %v3983_v9  ;;  %v3982_v22 = vmax.f32 %v3950_v5, 0.0  ;;  %v3914_v0 = vadd.f32 %v3823_v39, %v3608_v23  ;;  %v3955_v2 = vadd.f32 %v7595_v49, %v3916_v57  ;;  %v8106_v23 = vld [vmem:[#allocation28_spill] sm:$0xff]  ;;  %v8107_v9 = vld [vmem:[#allocation29_spill] sm:$0xff] }
 0x35a   : > { %v5512_v46 = vpop.f32.mrf.mxu1  ;;  %v5342_v1 = vadd.f32 %v8107_v9, %v8106_v23  ;;  %v8108_v57 = vld [vmem:[#allocation33_spill] sm:$0xff]  ;;  %v5369_v23 = vadd.f32 %v7622_v54, %v7613_v58  ;;  %v5372_v58 = vadd.f32 %v7642_v44, %v7633_v16 }
 0x35b   : > { %v3917_v24 = vadd.f32 %v5512_v46, %v3611_v18  ;;  %v4009_v36 = vpack.c.bf16 %v3982_v22, %v3981_v26  ;;  %v3953_v45 = vadd.f32 %v7595_v49, %v3914_v0  ;;  %v3987_v12 = vmax.f32 %v3955_v2, 0.0  ;;  %v8109_v18 = vld [vmem:[#allocation31_spill] sm:$0xff]  ;;  %v7682_v22 = vpop.f32.mrf.mxu0 }
 0x35c   : > { %v3826_v3 = vpop.f32.mrf.mxu1  ;;  %v3615_v13 = vadd.f32 %v5348_v21, %v8108_v57  ;;  %v3613_v26 = vadd.f32 %v5342_v1, %v8109_v18  ;;  %v8115_v18 = vld [vmem:[#allocation38_spill] sm:$0xff] }
 0x35d   : > { %v3956_v8 = vadd.f32 %v7595_v49, %v3917_v24  ;;  %v3915_v60 = vadd.f32 %v3826_v3, %v3609_v4  ;;  %5553 = vmatprep.mubr.bf16.mxu0 %v4009_v36  ;;  %v3985_v55 = vmax.f32 %v3953_v45, 0.0  ;;  %v5379_v24 = vpop.f32.mrf.mxu0  ;;  %v8110_v3 = vld [vmem:[#allocation34_spill] sm:$0xff] }
 0x35e   : > { %v5515_v32 = vpop.f32.mrf.mxu1  ;;  %5554 = vmatmul.mubr.bf16.gmra.mxu0 %v4010_v47  ;;  %v5357_v47 = vadd.f32 %v7556_v38, %v7551_v30  ;;  %v5360_v30 = vadd.f32 %v7566_v63, %v7561_v52  ;;  %v3616_v45 = vadd.f32 %v5351_v33, %v8110_v3  ;;  %v5272_v33 = vadd.f32 %v7585_v50, %v7576_v28 }
 0x35f   : > { %v3988_v6 = vmax.f32 %v3956_v8, 0.0  ;;  %v3954_v41 = vadd.f32 %v7595_v49, %v3915_v60  ;;  %v3920_v14 = vadd.f32 %v5515_v32, %v3614_v29  ;;  %v8111_v29 = vld [vmem:[#allocation36_spill] sm:$0xff]  ;;  %v8112_v32 = vld [vmem:[#allocation37_spill] sm:$0xff] }
 0x360   : > { %v3839_v5 = vpop.f32.mrf.mxu1  ;;  %v3618_v35 = vadd.f32 %v5357_v47, %v7539_v56  ;;  %v5354_v15 = vadd.f32 %v7546_v10, %v8111_v29  ;;  %v3619_v17 = vadd.f32 %v5360_v30, %v8112_v32  ;;  %v5363_v10 = vadd.f32 %v7580_v40, %v7571_v34 }
 0x361   : > { %v4012_v59 = vpack.c.bf16 %v3988_v6, %v3987_v12  ;;  %v3986_v25 = vmax.f32 %v3954_v41, 0.0  ;;  %v3918_v42 = vadd.f32 %v3839_v5, %v3612_v53  ;;  %v3959_v0 = vadd.f32 %v7595_v49, %v3920_v14  ;;  %v5380_v53 = vpop.f32.mrf.mxu0  ;;  %v8113_v41 = vld [vmem:[#allocation35_spill] sm:$0xff] }
 0x362   : > { %v5516_v39 = vpop.f32.mrf.mxu1  ;;  %v3617_v14 = vadd.f32 %v5354_v15, %v8113_v41 }
 0x363   : > { %v3921_v46 = vadd.f32 %v5516_v39, %v3615_v13  ;;  %v4011_v4 = vpack.c.bf16 %v3986_v25, %v3985_v55  ;;  %v3957_v36 = vadd.f32 %v7595_v49, %v3918_v42  ;;  %v3991_v8 = vmax.f32 %v3959_v0, 0.0  ;;  %v5382_v13 = vpop.f32.mrf.mxu0  ;;  %v8114_v42 = vld [vmem:[#allocation40_spill] sm:$0xff] }
 0x364   : > { %v3842_v2 = vpop.f32.mrf.mxu1  ;;  %v3622_v39 = vadd.f32 %v5369_v23, %v8114_v42 }
 0x365   : > { %v3960_v20 = vadd.f32 %v7595_v49, %v3921_v46  ;;  %v3919_v19 = vadd.f32 %v3842_v2, %v3613_v26  ;;  %5557 = vmatprep.mubr.bf16.mxu0 %v4011_v4  ;;  %v3989_v56 = vmax.f32 %v3957_v36, 0.0  ;;  %v3620_v26 = vadd.f32 %v5363_v10, %v8115_v18  ;;  %v5383_v16 = vpop.f32.mrf.mxu0 }
 0x366   : > { %v5519_v38 = vpop.f32.mrf.mxu1  ;;  %5558 = vmatmul.mubr.bf16.gmra.mxu0 %v4012_v59  ;;  %v5366_v46 = vadd.f32 %v7601_v43, %v7590_v31  ;;  %v5381_v4 = vadd.f32 %v5380_v53, %v5379_v24  ;;  %v3623_v36 = vadd.f32 %v5372_v58, %v7564_v27  ;;  %v5375_v31 = vadd.f32 %v7662_v48, %v7653_v61  ;;  %v8117_v43 = vld [vmem:[#allocation19_spill] sm:$0xff] }
 0x367   : > { %v3992_v60 = vmax.f32 %v3960_v20, 0.0  ;;  %v3958_v37 = vadd.f32 %v7595_v49, %v3919_v19  ;;  %v3924_v11 = vadd.f32 %v5519_v38, %v3618_v35  ;;  %v3144_v28 = vadd.f32 %v5272_v33, %v8117_v43  ;;  %v7735_v58 = vld [vmem:[%s7861_s6] ss:$0 sm:$0xff]  ;;  %v5798_v43 = vld [vmem:[%s6194_s12 + $0x10] sm:$0xff]  }
 0x368   : > { %v3855_v21 = vpop.f32.mrf.mxu1  ;;  %v5384_v50 = vadd.f32 %v5383_v16, %v5382_v13  ;;  %v3626_v29 = vadd.f32 %v5381_v4, %v7583_v62  ;;  %v5378_v53 = vadd.f32 %v7682_v22, %v7673_v7 }
 0x369   : > { %v4014_v12 = vpack.c.bf16 %v3992_v60, %v3991_v8  ;;  %v3990_v6 = vmax.f32 %v3958_v37, 0.0  ;;  %v3922_v52 = vadd.f32 %v3855_v21, %v3616_v45  ;;  %v3963_v9 = vadd.f32 %v7595_v49, %v3924_v11  ;;  %v8116_v45 = vld [vmem:[#allocation39_spill] sm:$0xff] }
 0x36a   : > { %v5520_v63 = vpop.f32.mrf.mxu1  ;;  %v3621_v8 = vadd.f32 %v5366_v46, %v8116_v45  ;;  %v3624_v21 = vadd.f32 %v5375_v31, %v7569_v51 }
 0x36b   : > { %v3925_v1 = vadd.f32 %v5520_v63, %v3619_v17  ;;  %v4013_v5 = vpack.c.bf16 %v3990_v6, %v3989_v56  ;;  %v3961_v55 = vadd.f32 %v7595_v49, %v3922_v52  ;;  %v3995_v47 = vmax.f32 %v3963_v9, 0.0  ;;  %v8118_v9 = vld [vmem:[#allocation41_spill] sm:$0xff] }
 0x36c   : > { %v3858_v57 = vpop.f32.mrf.mxu1  ;;  %v3625_v51 = vadd.f32 %v5378_v53, %v8118_v9  ;;  %v5800_v9 = vld [vmem:[%s6194_s12 + $0x20] sm:$0xff]  }
 0x36d   : > { %v3964_v59 = vadd.f32 %v7595_v49, %v3925_v1  ;;  %v3923_v25 = vadd.f32 %v3858_v57, %v3617_v14  ;;  %5561 = vmatprep.mubr.bf16.mxu0 %v4013_v5  ;;  %v3993_v44 = vmax.f32 %v3961_v55, 0.0 }
 0x36e   : > { %v5523_v54 = vpop.f32.mrf.mxu1  ;;  %5562 = vmatmul.mubr.bf16.gmra.mxu0 %v4014_v12  ;;  %v3627_v12 = vadd.f32 %v5384_v50, %v3144_v28  ;;  %v4257_v28 = vunpack.c.l.bf16 %v5798_v43 }
 0x36f   : > { %v3996_v0 = vmax.f32 %v3964_v59, 0.0  ;;  %v3962_v34 = vadd.f32 %v7595_v49, %v3923_v25  ;;  %v3928_v40 = vadd.f32 %v5523_v54, %v3622_v39 }
 0x370   : > { %v3871_v2 = vpop.f32.mrf.mxu1 }
 0x371   : > { %v4016_v20 = vpack.c.bf16 %v3996_v0, %v3995_v47  ;;  %v3994_v19 = vmax.f32 %v3962_v34, 0.0  ;;  %v3926_v35 = vadd.f32 %v3871_v2, %v3620_v26  ;;  %v3967_v38 = vadd.f32 %v7595_v49, %v3928_v40  ;;  %v5795_v26 = vld [vmem:[%s6194_s12 + $0x8] sm:$0xff]   ;;  %v5796_v34 = vld [vmem:[%s6194_s12] sm:$0xff]  }
 0x372   : > { %v5524_v30 = vpop.f32.mrf.mxu1  ;;  %v4255_v47 = vunpack.c.l.bf16 %v5795_v26  ;;  %v4256_v46 = vunpack.c.h.bf16 %v5795_v26  ;;  %v4254_v33 = vunpack.c.h.bf16 %v5796_v34 }
 0x373   : > { %v3929_v3 = vadd.f32 %v5524_v30, %v3623_v36  ;;  %v4015_v60 = vpack.c.bf16 %v3994_v19, %v3993_v44  ;;  %v3965_v27 = vadd.f32 %v7595_v49, %v3926_v35  ;;  %v3999_v32 = vmax.f32 %v3967_v38, 0.0  ;;  %v5797_v30 = vld [vmem:[%s6194_s12 + $0x18] sm:$0xff]  }
 0x374   : > { %v3874_v24 = vpop.f32.mrf.mxu1  ;;  %v4259_v38 = vunpack.c.l.bf16 %v5797_v30  ;;  %v4260_v50 = vunpack.c.h.bf16 %v5797_v30 }
 0x375   : > { %v3968_v37 = vadd.f32 %v7595_v49, %v3929_v3  ;;  %v3927_v11 = vadd.f32 %v3874_v24, %v3621_v8  ;;  %5565 = vmatprep.mubr.bf16.mxu0 %v4015_v60  ;;  %v3997_v6 = vmax.f32 %v3965_v27, 0.0 }
 0x376   : > { %v5527_v15 = vpop.f32.mrf.mxu1  ;;  %5566 = vmatmul.mubr.bf16.gmra.mxu0 %v4016_v20 }
 0x377   : > { %v4000_v17 = vmax.f32 %v3968_v37, 0.0  ;;  %v3966_v61 = vadd.f32 %v7595_v49, %v3927_v11  ;;  %v3932_v48 = vadd.f32 %v5527_v15, %v3626_v29 }
 0x378   : > { %v3887_v56 = vpop.f32.mrf.mxu1 }
 0x379   : > { %v4018_v52 = vpack.c.bf16 %v4000_v17, %v3999_v32  ;;  %v3998_v63 = vmax.f32 %v3966_v61, 0.0  ;;  %v3930_v41 = vadd.f32 %v3887_v56, %v3624_v21  ;;  %v3971_v62 = vadd.f32 %v7595_v49, %v3932_v48 }
 0x37a   : > { %v5528_v14 = vpop.f32.mrf.mxu1  ;;  %v4258_v17 = vunpack.c.h.bf16 %v5798_v43 }
 0x37b   : > { %v3933_v23 = vadd.f32 %v5528_v14, %v3627_v12  ;;  %v4017_v1 = vpack.c.bf16 %v3998_v63, %v3997_v6  ;;  %v3969_v10 = vadd.f32 %v7595_v49, %v3930_v41  ;;  %v4003_v22 = vmax.f32 %v3971_v62, 0.0  ;;  %v5799_v6 = vld [vmem:[%s6194_s12 + $0x28] sm:$0xff]  }
 0x37c   : > { %v3890_v5 = vpop.f32.mrf.mxu1 }
 0x37d   : > { %v3972_v57 = vadd.f32 %v7595_v49, %v3933_v23  ;;  %v3931_v7 = vadd.f32 %v3890_v5, %v3625_v51  ;;  %5569 = vmatprep.mubr.bf16.mxu0 %v4017_v1  ;;  %v4001_v59 = vmax.f32 %v3969_v10, 0.0  ;;  %v4261_v51 = vunpack.c.l.bf16 %v5800_v9 }
 0x37e   : > { %5570 = vmatmul.mubr.bf16.gmra.mxu0 %v4018_v52  ;;  %v4263_v52 = vunpack.c.l.bf16 %v5799_v6  ;;  %v4264_v1 = vunpack.c.h.bf16 %v5799_v6 }
 0x37f   : > { %v4004_v13 = vmax.f32 %v3972_v57, 0.0  ;;  %v3970_v55 = vadd.f32 %v7595_v49, %v3931_v7  ;;  %v4253_v49 = vunpack.c.l.bf16 %v5796_v34 }
 0x381   : > { %v4020_v25 = vpack.c.bf16 %v4004_v13, %v4003_v22  ;;  %v4002_v42 = vmax.f32 %v3970_v55, 0.0 }
 0x383   : > { %v4019_v39 = vpack.c.bf16 %v4002_v42, %v4001_v59 }
 0x385   : > { %5573 = vmatprep.mubr.bf16.mxu0 %v4019_v39 }
 0x386   : > { %5574 = vmatmul.mubr.bf16.gmra.mxu0 %v4020_v25  ;;  %v4262_v25 = vunpack.c.h.bf16 %v5800_v9 }
 0x40e   : > { %v5547_v54 = vpop.f32.mrf.mxu0 }
 0x40f   : > { %v4135_v18 = vadd.f32 %v5547_v54, %v7735_v58 }
 0x410   : > { %v4126_v0 = vpop.f32.mrf.mxu0 }
 0x411   : > { %v4127_v40 = vadd.f32 %v7735_v58, %v4126_v0  ;;  %v4287_v2 = vadd.f32 %v4255_v47, %v4135_v18  ;;  %v5801_v47 = vld [vmem:[%s6194_s12 + $0x38] sm:$0xff]  }
 0x412   : > { %v5548_v4 = vpop.f32.mrf.mxu0  ;;  %v4267_v0 = vunpack.c.l.bf16 %v5801_v47 }
 0x413   : > { %v4138_v36 = vadd.f32 %v5548_v4, %v7735_v58  ;;  %v4285_v44 = vadd.f32 %v4253_v49, %v4127_v40  ;;  %v4319_v3 = vmax.f32 %v4287_v2, 0.0 }
 0x414   : > { %v4129_v16 = vpop.f32.mrf.mxu0 }
 0x415   : > { %v4288_v20 = vadd.f32 %v4256_v46, %v4138_v36  ;;  %v4130_v19 = vadd.f32 %v7735_v58, %v4129_v16  ;;  %v4317_v24 = vmax.f32 %v4285_v44, 0.0  ;;  %v4268_v36 = vunpack.c.h.bf16 %v5801_v47 }
 0x416   : > { %v5551_v35 = vpop.f32.mrf.mxu0 }
 0x417   : > { %v4320_v45 = vmax.f32 %v4288_v20, 0.0  ;;  %v4286_v8 = vadd.f32 %v4254_v33, %v4130_v19  ;;  %v4151_v60 = vadd.f32 %v5551_v35, %v7735_v58  ;;  %v5802_v33 = vld [vmem:[%s6194_s12 + $0x30] sm:$0xff]  }
 0x418   : > { %v4142_v31 = vpop.f32.mrf.mxu0  ;;  %v4265_v2 = vunpack.c.l.bf16 %v5802_v33 }
 0x419   : > { %v4826_v27 = vpack.c.bf16 %v4320_v45, %v4319_v3  ;;  %v4318_v37 = vmax.f32 %v4286_v8, 0.0  ;;  %v4143_v11 = vadd.f32 %v7735_v58, %v4142_v31  ;;  %v4291_v21 = vadd.f32 %v4259_v38, %v4151_v60 }
 0x41a   : > { %v5552_v29 = vpop.f32.mrf.mxu0  ;;  %v4266_v45 = vunpack.c.h.bf16 %v5802_v33 }
 0x41b   : > { %4898 = vst [vmem:[%s7749_s11 + $0x8] sm:$0xff] %v4826_v27   ;;  %v4821_v15 = vpack.c.bf16 %v4318_v37, %v4317_v24  ;;  %v4154_v32 = vadd.f32 %v5552_v29, %v7735_v58  ;;  %v4289_v48 = vadd.f32 %v4257_v28, %v4143_v11  ;;  %v4323_v63 = vmax.f32 %v4291_v21, 0.0 }
 0x41c   : > { %v4145_v61 = vpop.f32.mrf.mxu0 }
 0x41d   : > { %4822 = vst [vmem:[%s7749_s11] sm:$0xff] %v4821_v15   ;;  %v4292_v53 = vadd.f32 %v4260_v50, %v4154_v32  ;;  %v4146_v56 = vadd.f32 %v7735_v58, %v4145_v61  ;;  %v4321_v5 = vmax.f32 %v4289_v48, 0.0  ;;  %v5803_v50 = vld [vmem:[%s6194_s12 + $0x48] sm:$0xff]   ;;  %v5804_v15 = vld [vmem:[%s6194_s12 + $0x40] sm:$0xff]  }
 0x41e   : > { %v5555_v12 = vpop.f32.mrf.mxu0  ;;  %v4271_v24 = vunpack.c.l.bf16 %v5803_v50  ;;  %v4269_v21 = vunpack.c.l.bf16 %v5804_v15  ;;  %v4270_v6 = vunpack.c.h.bf16 %v5804_v15 }
 0x41f   : > { %v4324_v41 = vmax.f32 %v4292_v53, 0.0  ;;  %v4290_v14 = vadd.f32 %v4258_v17, %v4146_v56  ;;  %v4167_v62 = vadd.f32 %v5555_v12, %v7735_v58  ;;  %v4272_v17 = vunpack.c.h.bf16 %v5803_v50 }
 0x420   : > { %v4158_v23 = vpop.f32.mrf.mxu0 }
 0x421   : > { %v4836_v10 = vpack.c.bf16 %v4324_v41, %v4323_v63  ;;  %v4322_v57 = vmax.f32 %v4290_v14, 0.0  ;;  %v4159_v7 = vadd.f32 %v7735_v58, %v4158_v23  ;;  %v4295_v55 = vadd.f32 %v4263_v52, %v4167_v62 }
 0x422   : > { %v5556_v22 = vpop.f32.mrf.mxu0 }
 0x423   : > { %4900 = vst [vmem:[%s7749_s11 + $0x18] sm:$0xff] %v4836_v10   ;;  %v4831_v13 = vpack.c.bf16 %v4322_v57, %v4321_v5  ;;  %v4170_v59 = vadd.f32 %v5556_v22, %v7735_v58  ;;  %v4293_v39 = vadd.f32 %v4261_v51, %v4159_v7  ;;  %v4327_v34 = vmax.f32 %v4295_v55, 0.0  ;;  %v5806_v55 = vld [vmem:[%s6194_s12 + $0x50] sm:$0xff]  }
 0x424   : > { %v4161_v42 = vpop.f32.mrf.mxu0 }
 0x425   : > { %4899 = vst [vmem:[%s7749_s11 + $0x10] sm:$0xff] %v4831_v13   ;;  %v4296_v54 = vadd.f32 %v4264_v1, %v4170_v59  ;;  %v4162_v18 = vadd.f32 %v7735_v58, %v4161_v42  ;;  %v4325_v16 = vmax.f32 %v4293_v39, 0.0  ;;  %v5805_v1 = vld [vmem:[%s6194_s12 + $0x58] sm:$0xff]   ;;  %v4273_v59 = vunpack.c.l.bf16 %v5806_v55 }
 0x426   : > { %v5559_v26 = vpop.f32.mrf.mxu0  ;;  %v4275_v5 = vunpack.c.l.bf16 %v5805_v1 }
 0x427   : > { %v4328_v49 = vmax.f32 %v4296_v54, 0.0  ;;  %v4294_v40 = vadd.f32 %v4262_v25, %v4162_v18  ;;  %v4183_v46 = vadd.f32 %v5559_v26, %v7735_v58  ;;  %v4276_v25 = vunpack.c.h.bf16 %v5805_v1 }
 0x428   : > { %v4174_v4 = vpop.f32.mrf.mxu0 }
 0x429   : > { %v4846_v44 = vpack.c.bf16 %v4328_v49, %v4327_v34  ;;  %v4326_v20 = vmax.f32 %v4294_v40, 0.0  ;;  %v4175_v19 = vadd.f32 %v7735_v58, %v4174_v4  ;;  %v4299_v38 = vadd.f32 %v4267_v0, %v4183_v46 }
 0x42a   : > { %v5560_v35 = vpop.f32.mrf.mxu0  ;;  %v4274_v49 = vunpack.c.h.bf16 %v5806_v55 }
 0x42b   : > { %4902 = vst [vmem:[%s7749_s11 + $0x28] sm:$0xff] %v4846_v44   ;;  %v4841_v30 = vpack.c.bf16 %v4326_v20, %v4325_v16  ;;  %v4186_v3 = vadd.f32 %v5560_v35, %v7735_v58  ;;  %v4297_v60 = vadd.f32 %v4265_v2, %v4175_v19  ;;  %v4331_v27 = vmax.f32 %v4299_v38, 0.0  ;;  %v5808_v38 = vld [vmem:[%s6194_s12 + $0x60] sm:$0xff]  }
 0x42c   : > { %v4177_v8 = vpop.f32.mrf.mxu0 }
 0x42d   : > { %4901 = vst [vmem:[%s7749_s11 + $0x20] sm:$0xff] %v4841_v30   ;;  %v4300_v31 = vadd.f32 %v4268_v36, %v4186_v3  ;;  %v4178_v43 = vadd.f32 %v7735_v58, %v4177_v8  ;;  %v4329_v61 = vmax.f32 %v4297_v60, 0.0  ;;  %v5807_v36 = vld [vmem:[%s6194_s12 + $0x68] sm:$0xff]   ;;  %v4277_v3 = vunpack.c.l.bf16 %v5808_v38 }
 0x42e   : > { %v5563_v28 = vpop.f32.mrf.mxu0  ;;  %v4279_v16 = vunpack.c.l.bf16 %v5807_v36 }
 0x42f   : > { %v4332_v37 = vmax.f32 %v4300_v31, 0.0  ;;  %v4298_v11 = vadd.f32 %v4266_v45, %v4178_v43  ;;  %v4199_v29 = vadd.f32 %v5563_v28, %v7735_v58  ;;  %v4280_v45 = vunpack.c.h.bf16 %v5807_v36 }
 0x430   : > { %v4190_v32 = vpop.f32.mrf.mxu0 }
 0x431   : > { %v4856_v48 = vpack.c.bf16 %v4332_v37, %v4331_v27  ;;  %v4330_v53 = vmax.f32 %v4298_v11, 0.0  ;;  %v4191_v56 = vadd.f32 %v7735_v58, %v4190_v32  ;;  %v4303_v63 = vadd.f32 %v4271_v24, %v4199_v29 }
 0x432   : > { %v5564_v12 = vpop.f32.mrf.mxu0  ;;  %v4278_v37 = vunpack.c.h.bf16 %v5808_v38 }
 0x433   : > { %4904 = vst [vmem:[%s7749_s11 + $0x38] sm:$0xff] %v4856_v48   ;;  %v4851_v52 = vpack.c.bf16 %v4330_v53, %v4329_v61  ;;  %v4202_v41 = vadd.f32 %v5564_v12, %v7735_v58  ;;  %v4301_v62 = vadd.f32 %v4269_v21, %v4191_v56  ;;  %v4335_v10 = vmax.f32 %v4303_v63, 0.0 }
 0x434   : > { %v4193_v14 = vpop.f32.mrf.mxu0 }
 0x435   : > { %4903 = vst [vmem:[%s7749_s11 + $0x30] sm:$0xff] %v4851_v52   ;;  %v4304_v23 = vadd.f32 %v4272_v17, %v4202_v41  ;;  %v4194_v9 = vadd.f32 %v7735_v58, %v4193_v14  ;;  %v4333_v42 = vmax.f32 %v4301_v62, 0.0  ;;  %v5809_v17 = vld [vmem:[%s6194_s12 + $0x78] sm:$0xff]   ;;  %v5810_v52 = vld [vmem:[%s6194_s12 + $0x70] sm:$0xff]   ;;  %s5917_s12 = scalar_lea.vmem %s7810_s22, 2048 }
 0x436   : > { %v5567_v51 = vpop.f32.mrf.mxu0  ;;  %v4283_v61 = vunpack.c.l.bf16 %v5809_v17  ;;  %v4281_v63 = vunpack.c.l.bf16 %v5810_v52  ;;  %v4284_v41 = vunpack.c.h.bf16 %v5809_v17  ;;  %p5918_p7 = scmp.ne.s32.totalorder %s7810_s22, %s5917_s12  ;;  %p5925_p0 = scmp.lt.s32.totalorder %s5923_s9, %s5917_s12 }
 0x437   : > { %v4336_v57 = vmax.f32 %v4304_v23, 0.0  ;;  %v4302_v7 = vadd.f32 %v4270_v6, %v4194_v9  ;;  %v4215_v22 = vadd.f32 %v5567_v51, %v7735_v58 }
 0x438   : > { %v4206_v13 = vpop.f32.mrf.mxu0  ;;  %p5919_p12 = pnand %p5918_p7, %p8119_p1  ;;  %p5926_p2 = por %p5925_p0, %p5924_p13 }
 0x439   : > { %v4866_v39 = vpack.c.bf16 %v4336_v57, %v4335_v10  ;;  %v4334_v54 = vmax.f32 %v4302_v7, 0.0  ;;  %v4207_v18 = vadd.f32 %v7735_v58, %v4206_v13  ;;  %v4307_v0 = vadd.f32 %v4275_v5, %v4215_v22 }
 0x43a   : > { %v5568_v26 = vpop.f32.mrf.mxu0  ;;  %v4282_v57 = vunpack.c.h.bf16 %v5810_v52  ;;  %p5920_p9 = pneg %p5919_p12 }
 0x43b   : > { %4906 = vst [vmem:[%s7749_s11 + $0x48] sm:$0xff] %v4866_v39   ;;  %v4861_v47 = vpack.c.bf16 %v4334_v54, %v4333_v42  ;;  %v4218_v34 = vadd.f32 %v5568_v26, %v7735_v58  ;;  %v4305_v46 = vadd.f32 %v4273_v59, %v4207_v18  ;;  %v4339_v44 = vmax.f32 %v4307_v0, 0.0 }
 0x43c   : > { %v4209_v40 = vpop.f32.mrf.mxu0  ;;  %p5927_p10 = pnand %p5926_p2, %p5920_p9 }
 0x43d   : > { %4905 = vst [vmem:[%s7749_s11 + $0x40] sm:$0xff] %v4861_v47   ;;  %v4308_v4 = vadd.f32 %v4276_v25, %v4218_v34  ;;  %v4210_v33 = vadd.f32 %v7735_v58, %v4209_v40  ;;  %v4337_v8 = vmax.f32 %v4305_v46, 0.0 }
 0x43e   : > { %v5571_v2 = vpop.f32.mrf.mxu0 }
 0x43f   : > { %v4340_v20 = vmax.f32 %v4308_v4, 0.0  ;;  %v4306_v19 = vadd.f32 %v4274_v49, %v4210_v33  ;;  %v4231_v35 = vadd.f32 %v5571_v2, %v7735_v58 }
 0x440   : > { %v4222_v30 = vpop.f32.mrf.mxu0 }
 0x441   : > { %v4876_v60 = vpack.c.bf16 %v4340_v20, %v4339_v44  ;;  %v4338_v31 = vmax.f32 %v4306_v19, 0.0  ;;  %v4223_v43 = vadd.f32 %v7735_v58, %v4222_v30  ;;  %v4311_v24 = vadd.f32 %v4279_v16, %v4231_v35 }
 0x442   : > { %v5572_v28 = vpop.f32.mrf.mxu0 }
 0x443   : > { %4908 = vst [vmem:[%s7749_s11 + $0x58] sm:$0xff] %v4876_v60   ;;  %v4871_v50 = vpack.c.bf16 %v4338_v31, %v4337_v8  ;;  %v4234_v27 = vadd.f32 %v5572_v28, %v7735_v58  ;;  %v4309_v29 = vadd.f32 %v4277_v3, %v4223_v43  ;;  %v4343_v48 = vmax.f32 %v4311_v24, 0.0 }
 0x444   : > { %v4225_v11 = vpop.f32.mrf.mxu0 }
 0x445   : > { %4907 = vst [vmem:[%s7749_s11 + $0x50] sm:$0xff] %v4871_v50   ;;  %v4312_v15 = vadd.f32 %v4280_v45, %v4234_v27  ;;  %v4226_v21 = vadd.f32 %v7735_v58, %v4225_v11  ;;  %v4341_v14 = vmax.f32 %v4309_v29, 0.0 }
 0x446   : > { %v5575_v32 = vpop.f32.mrf.mxu0 }
 0x447   : > { %v4344_v53 = vmax.f32 %v4312_v15, 0.0  ;;  %v4310_v56 = vadd.f32 %v4278_v37, %v4226_v21  ;;  %v4247_v12 = vadd.f32 %v5575_v32, %v7735_v58 }
 0x448   : > { %v4238_v6 = vpop.f32.mrf.mxu0 }
 0x449   : > { %v4886_v62 = vpack.c.bf16 %v4344_v53, %v4343_v48  ;;  %v4342_v23 = vmax.f32 %v4310_v56, 0.0  ;;  %v4239_v9 = vadd.f32 %v7735_v58, %v4238_v6  ;;  %v4315_v5 = vadd.f32 %v4283_v61, %v4247_v12 }
 0x44a   : > { %v5576_v51 = vpop.f32.mrf.mxu0 }
 0x44b   : > { %4910 = vst [vmem:[%s7749_s11 + $0x68] sm:$0xff] %v4886_v62   ;;  %v4881_v1 = vpack.c.bf16 %v4342_v23, %v4341_v14  ;;  %v4250_v10 = vadd.f32 %v5576_v51, %v7735_v58  ;;  %v4313_v22 = vadd.f32 %v4281_v63, %v4239_v9  ;;  %v4347_v59 = vmax.f32 %v4315_v5, 0.0 }
 0x44c   : > { %v4241_v7 = vpop.f32.mrf.mxu0 }
 0x44d   : > { %4909 = vst [vmem:[%s7749_s11 + $0x60] sm:$0xff] %v4881_v1   ;;  %v4316_v13 = vadd.f32 %v4284_v41, %v4250_v10  ;;  %v4242_v55 = vadd.f32 %v7735_v58, %v4241_v7  ;;  %v4345_v39 = vmax.f32 %v4313_v22, 0.0 }
 0x44f   : > { %v4348_v25 = vmax.f32 %v4316_v13, 0.0  ;;  %v4314_v42 = vadd.f32 %v4282_v57, %v4242_v55 }
 0x451   : > { %v4896_v54 = vpack.c.bf16 %v4348_v25, %v4347_v59  ;;  %v4346_v18 = vmax.f32 %v4314_v42, 0.0 }
 0x453   : > { %4912 = vst [vmem:[%s7749_s11 + $0x78] sm:$0xff] %v4896_v54   ;;  %v4891_v58 = vpack.c.bf16 %v4346_v18, %v4345_v39 }
 0x455   : > { %4911 = vst [vmem:[%s7749_s11 + $0x70] sm:$0xff] %v4891_v58  }
 0x456   : > { %5930 = shalt.err (!%p5927_p10)
}
 0x457   : > { %s5931_s10 = scalar_lea.hbm %s7808_s1, 2048  ;;  %s5935_s29 = scalar_lea.hbm %s7862_s7, 4096 }
 0x458   : > { %p5932_p6 = scmp.ne.s32.totalorder %s7808_s1, %s5931_s10  ;;  %p5936_p3 = scmp.lt.s32.totalorder %s7808_s1, %s7862_s7 }
 0x459   : > { %p5937_p11 = scmp.lt.s32.totalorder %s5935_s29, %s5931_s10 }
 0x45a   : > { %p5933_p4 = pnand %p5932_p6, %p8119_p1 }
 0x45b   : > { %p5938_p5 = por %p5937_p11, %p5936_p3 }
 0x45c   : > { %p5934_p8 = pneg %p5933_p4 }
 0x45e   : > { %p5939_p7 = pnand %p5938_p5, %p5934_p8 }
 0x460   : > { %5942 = shalt.err (!%p5939_p7)
}
 0x461   : > { %s5999_s18 = smov 64   ;;  %s6000_s23 = smov 4  }
 0x462   : > { %5607 = dma.vmem_to_hbm [thread:$0]  (%p8119_p1), %s7810_s22, 2048, %s7808_s1, %s4510_s16, %s5999_s18, %s5999_s18, %s6000_s23  }
 0x463 PF: > { %s4538_s12 = sand.u32 1, %s5977_s24   ;;  %p8120_p12 = scmp.ne.s32.totalorder %s7893_s8, 0 }
 0x464   : > { %p8121_p9 = scmp.ge.s32.totalorder %s5989_s27, 2  ;;  %s4539_s28 = scalar_lea.sflag [#allocation4], %s4538_s12 }
 0x466   : > { %p5624_p13 = pnand %p8121_p9, %p8120_p12 }
 0x468   : > { %p5625_p0 = pneg %p5624_p13 }
 0x46a   : > { %5972 = dma.done.wait (%p5625_p0), %s4539_s28, 2048  }
 0x46b   : > { %5974 = vsyncadd (%p5625_p0), %s4539_s28, 4294965248  ;;  %p22_p2 = scmp.ge.s32.totalorder %s6130_s14, 4   ;;  %s8122_s24 = smov %s5981_s25 }
 0x46c   : > { %s8123_s25 = smov %s5985_s26  ;;  %s8124_s26 = smov %s6140_s17 }
 0x46d   : > { %s8125_s27 = smov %s6130_s14  ;;  %24 = sbr.rel (!%p22_p2) target bundleno = 9 (0x9), region = 113 }
 0x472   :  { %4544 = vsyncpa [#allocation3], 1 }
 0x473   :  { %4546 = vsyncpa [#allocation3 + $0x1], 1 }
 0x474   :  { %4547 = vsyncpa [#allocation6], 1 }
 0x475   :  { %4548 = vsyncpa [#allocation9], 1 }
 0x476   :  { %4549 = vsyncpa [#allocation4], 1 }
 0x477   :  { %4551 = vsyncpa [#allocation4 + $0x1], 1 }

</bundles_post_ra>
